<compile_context>
chip_gen: v7x
topology: tpu7x:2x2x1
jax: 0.10.0
libtpu: 0.0.40
codegen_flags: <defaults>
</compile_context>

<pallas_src>
import math

import jax
import jax.numpy as jnp
from jax.experimental import pallas as pl
from jax.experimental.pallas import tpu as pltpu


# ---------------------------------------------------------------------------
# Kernels
# ---------------------------------------------------------------------------

def _linear_kernel_direct(x_ref, w_ref, b_ref, o_ref):
    """f32-output path: accumulate straight into the resident output block.

    x_ref: (tm, tk)   activations tile
    w_ref: (tk, tn)   weight tile, already transposed to (K, N)
    b_ref: (1,  tn)   bias tile
    o_ref: (tm, tn)   f32 output tile (block index constant across k -> resident)
    """
    k = pl.program_id(2)

    @pl.when(k == 0)
    def _():
        # Fold the bias into the accumulator init: no separate bias pass later.
        o_ref[...] = jnp.broadcast_to(b_ref[...], o_ref.shape).astype(o_ref.dtype)

    o_ref[...] += jnp.dot(x_ref[...], w_ref[...],
                          preferred_element_type=jnp.float32)


def _linear_kernel_acc(x_ref, w_ref, b_ref, o_ref, acc_ref):
    """Low-precision-output path: f32 scratch accumulator, cast at finalize."""
    k = pl.program_id(2)

    @pl.when(k == 0)
    def _():
        acc_ref[...] = jnp.broadcast_to(
            b_ref[...].astype(jnp.float32), acc_ref.shape)

    acc_ref[...] += jnp.dot(x_ref[...], w_ref[...],
                            preferred_element_type=jnp.float32)

    @pl.when(k == pl.num_programs(2) - 1)
    def _():
        o_ref[...] = acc_ref[...].astype(o_ref.dtype)


# ---------------------------------------------------------------------------
# Tiling helpers
# ---------------------------------------------------------------------------

def _round_up(x: int, m: int) -> int:
    return ((x + m - 1) // m) * m


def _sublane_multiple(dtype) -> int:
    itemsize = jnp.dtype(dtype).itemsize
    if itemsize >= 4:
        return 8
    if itemsize == 2:
        return 16
    return 32


def _largest_aligned_divisor(total: int, align: int, cap: int) -> int:
    """Largest multiple of `align` that divides `total` (a multiple of `align`)
    and is <= cap.  Falls back to `align` itself."""
    q = total // align
    best = 1
    d = 1
    while d * d <= q:
        if q % d == 0:
            for cand in (d, q // d):
                if cand * align <= cap and cand > best:
                    best = cand
        d += 1
    return best * align


def _choose_tiles(m_pad: int, k_pad: int, n_pad: int, dtype):
    """Divisor-based tiles: no extra padding beyond the 128/sublane rounding.

    Caps keep the double-buffered footprint ~<= 11 MiB (f32) / ~10 MiB (bf16),
    comfortably inside every generation's VMEM (v5e 16 MiB scoped default,
    v7x 64 MiB physical per TC) while raising arithmetic intensity well above
    the old 256x256 plan.
    """
    sub = _sublane_multiple(dtype)
    cap_mn = 512
    cap_k = 2048 if jnp.dtype(dtype).itemsize <= 2 else 1024
    tm = _largest_aligned_divisor(m_pad, sub, cap_mn)
    tk = _largest_aligned_divisor(k_pad, 128, cap_k)
    tn = _largest_aligned_divisor(n_pad, 128, cap_mn)
    return tm, tk, tn


# Below this many MACs the per-grid-step overhead + pad/slice ops dominate;
# just use a plain XLA dot.
_TINY_MACS = 1 << 21


# ---------------------------------------------------------------------------
# Wrapper
# ---------------------------------------------------------------------------

def basic_expert_forward(x, weight, bias):
    """y = x @ weight.T + bias over the last axis of x.

    x:      (..., feature_in)
    weight: (feature_out, feature_in)   -- PyTorch nn.Linear convention
    bias:   (feature_out,)
    """
    feature_out, feature_in = weight.shape
    orig_shape = x.shape
    rows = math.prod(orig_shape[:-1]) if len(orig_shape) > 1 else 1
    out_dtype = x.dtype

    x2d = x.reshape(rows, feature_in)

    # Tiny-problem fast path: Pallas only pays off with a real grid.
    if rows * feature_in * feature_out <= _TINY_MACS:
        y2d = x2d @ weight.T + bias
        return y2d.reshape(*orig_shape[:-1], feature_out)

    sub = _sublane_multiple(out_dtype)
    m_pad = _round_up(rows, sub)
    k_pad = _round_up(feature_in, 128)
    n_pad = _round_up(feature_out, 128)
    tm, tk, tn = _choose_tiles(m_pad, k_pad, n_pad, out_dtype)

    # Pad only when actually needed (zeros on K contribute nothing to the dot;
    # padded M rows / N cols are sliced off below).
    if (m_pad, k_pad) != (rows, feature_in):
        x2d = jnp.pad(x2d, ((0, m_pad - rows), (0, k_pad - feature_in)))

    # Weight: transpose once to (K, N) so the kernel runs the standard
    # contraction.  This is a parameter — in production pre-transpose / cache
    # it outside the per-token call; here it is fused with the (optional) pad.
    w_t = weight.T                                   # (feature_in, feature_out)
    if (k_pad, n_pad) != (feature_in, feature_out):
        w_t = jnp.pad(w_t, ((0, k_pad - feature_in), (0, n_pad - feature_out)))

    b2d = bias
    if n_pad != feature_out:
        b2d = jnp.pad(bias, (0, n_pad - feature_out))
    b2d = b2d.reshape(1, n_pad)

    grid = (m_pad // tm, n_pad // tn, k_pad // tk)

    in_specs = [
        pl.BlockSpec((tm, tk), lambda i, j, k: (i, k)),   # x tile
        pl.BlockSpec((tk, tn), lambda i, j, k: (k, j)),   # W tile (K, N) — lane-dense in N
        pl.BlockSpec((1, tn), lambda i, j, k: (0, j)),    # bias tile
    ]
    out_spec = pl.BlockSpec((tm, tn), lambda i, j, k: (i, j))
    compiler_params = pltpu.CompilerParams(
        dimension_semantics=("parallel", "parallel", "arbitrary"),
        vmem_limit_bytes=32 * 1024 * 1024,
    )

    if out_dtype == jnp.float32:
        # Accumulate directly into the resident f32 output block: no scratch,
        # no finalize copy.
        out_p = pl.pallas_call(
            _linear_kernel_direct,
            out_shape=jax.ShapeDtypeStruct((m_pad, n_pad), jnp.float32),
            grid_spec=pltpu.PrefetchScalarGridSpec(
                num_scalar_prefetch=0,
                grid=grid,
                in_specs=in_specs,
                out_specs=out_spec,
            ),
            compiler_params=compiler_params,
        )(x2d, w_t, b2d)
    else:
        out_p = pl.pallas_call(
            _linear_kernel_acc,
            out_shape=jax.ShapeDtypeStruct((m_pad, n_pad), out_dtype),
            grid_spec=pltpu.PrefetchScalarGridSpec(
                num_scalar_prefetch=0,
                grid=grid,
                in_specs=in_specs,
                out_specs=out_spec,
                scratch_shapes=[pltpu.VMEM((tm, tn), jnp.float32)],
            ),
            compiler_params=compiler_params,
        )(x2d, w_t, b2d)

    out2d = out_p
    if (m_pad, n_pad) != (rows, feature_out):
        out2d = out2d[:rows, :feature_out]
    return out2d.reshape(*orig_shape[:-1], feature_out)


# ---------------------------------------------------------------------------
# Self-test
# ---------------------------------------------------------------------------

if __name__ == "__main__":
    # 1) Small, deterministic setup consistent with BasicExpert(feature_in, feature_out).
    #    (Tiny -> fast XLA path; semantics check.)
    batch, seq = 2, 8
    feature_in, feature_out = 32, 16

    key = jax.random.PRNGKey(0)
    kx, kw, kb = jax.random.split(key, 3)
    x = jax.random.normal(kx, (batch, seq, feature_in), dtype=jnp.float32)
    bound = 1.0 / (feature_in ** 0.5)
    weight = jax.random.uniform(kw, (feature_out, feature_in),
                                minval=-bound, maxval=bound, dtype=jnp.float32)
    bias = jax.random.uniform(kb, (feature_out,),
                              minval=-bound, maxval=bound, dtype=jnp.float32)

    y = basic_expert_forward(x, weight, bias)
    jax.block_until_ready(y)
    y_ref = x @ weight.T + bias
    assert y.shape == (batch, seq, feature_out)
    assert jnp.allclose(y, y_ref, atol=1e-5, rtol=1e-5)

    # 2) Multi-step grid (M,N,K all > one tile), f32, divisor tiles -> no padding.
    #    rows=2048, K=1536, N=1024 -> tiles (512, 768, 512), grid (4, 2, 2).
    kx2, kw2, kb2 = jax.random.split(jax.random.PRNGKey(1), 3)
    x2 = jax.random.normal(kx2, (8, 256, 1536), dtype=jnp.float32)
    w2 = jax.random.normal(kw2, (1024, 1536), dtype=jnp.float32) * 0.02
    b2 = jax.random.normal(kb2, (1024,), dtype=jnp.float32) * 0.02
    y2 = basic_expert_forward(x2, w2, b2)
    jax.block_until_ready(y2)
    y2_ref = x2 @ w2.T + b2
    assert jnp.allclose(y2, y2_ref, atol=2e-3, rtol=2e-3)

    # 3) Unaligned K/N (padding path): K=200 -> 256, N=100 -> 128.
    kx3, kw3, kb3 = jax.random.split(jax.random.PRNGKey(2), 3)
    x3 = jax.random.normal(kx3, (4, 96, 200), dtype=jnp.float32)
    w3 = jax.random.normal(kw3, (100, 200), dtype=jnp.float32) * 0.05
    b3 = jax.random.normal(kb3, (100,), dtype=jnp.float32) * 0.05
    y3 = basic_expert_forward(x3, w3, b3)
    jax.block_until_ready(y3)
    y3_ref = x3 @ w3.T + b3
    assert jnp.allclose(y3, y3_ref, atol=1e-3, rtol=1e-3)

    # 4) Native bf16 path (MXU-native, f32 scratch accumulator, cast at finalize).
    kx4, kw4, kb4 = jax.random.split(jax.random.PRNGKey(3), 3)
    x4 = jax.random.normal(kx4, (4, 128, 1536), dtype=jnp.float32).astype(jnp.bfloat16)
    w4 = (jax.random.normal(kw4, (512, 1536), dtype=jnp.float32) * 0.02).astype(jnp.bfloat16)
    b4 = (jax.random.normal(kb4, (512,), dtype=jnp.float32) * 0.02).astype(jnp.bfloat16)
    y4 = basic_expert_forward(x4, w4, b4)
    jax.block_until_ready(y4)
    y4_ref = (x4.astype(jnp.float32) @ w4.astype(jnp.float32).T
              + b4.astype(jnp.float32))
    assert y4.dtype == jnp.bfloat16
    assert jnp.allclose(y4.astype(jnp.float32), y4_ref, atol=3e-2, rtol=3e-2)

    print("KERNEL_OK")
</pallas_src>

<mosaic_0001>
module attributes {stable_mosaic.version = 11 : i64} {
  func.func @_linear_kernel_direct(%arg0: i32, %arg1: i32, %arg2: i32, %arg3: memref<512x768xf32, #tpu.memory_space<vmem>>, %arg4: memref<768x512xf32, #tpu.memory_space<vmem>>, %arg5: memref<1x512xf32, #tpu.memory_space<vmem>>, %arg6: memref<512x512xf32, #tpu.memory_space<vmem>>) attributes {dimension_semantics = [#tpu.dimension_semantics<parallel>, #tpu.dimension_semantics<parallel>, #tpu.dimension_semantics<arbitrary>], iteration_bounds = array<i64: 4, 2, 2>, scalar_prefetch = 0 : i64, scratch_operands = 0 : i64, tpu.core_type = #tpu.core_type<tc>, window_params = [{transform_indices = @transform_0, window_bounds = array<i64: 512, 768>}, {transform_indices = @transform_1, window_bounds = array<i64: 768, 512>}, {transform_indices = @transform_2, window_bounds = array<i64: 1, 512>}, {transform_indices = @transform_3, window_bounds = array<i64: 512, 512>}]} {
    %c0_i32 = arith.constant 0 : i32
    %0 = arith.cmpi eq, %arg2, %c0_i32 : i32
    %1 = arith.extui %0 : i1 to i32
    %c0_i32_0 = arith.constant 0 : i32
    %2 = arith.cmpi ne, %1, %c0_i32_0 : i32
    scf.if %2 {
      %c0_8 = arith.constant 0 : index
      %c0_9 = arith.constant 0 : index
      %9 = vector.load %arg5[%c0_8, %c0_9] : memref<1x512xf32, #tpu.memory_space<vmem>>, vector<1x512xf32>
      %10 = vector.shape_cast %9 : vector<1x512xf32> to vector<1x512xf32>
      %11 = vector.broadcast %10 : vector<1x512xf32> to vector<512x512xf32>
      %c0_10 = arith.constant 0 : index
      %c0_11 = arith.constant 0 : index
      %12 = vector.load %arg6[%c0_10, %c0_11] : memref<512x512xf32, #tpu.memory_space<vmem>>, vector<512x512xf32>
      tpu.vector_store %arg6[%c0_10, %c0_11], %11 {strides = array<i32>} : memref<512x512xf32, #tpu.memory_space<vmem>>, vector<512x512xf32>,
    } else {
    }
    %c0 = arith.constant 0 : index
    %c0_1 = arith.constant 0 : index
    %3 = vector.load %arg6[%c0, %c0_1] : memref<512x512xf32, #tpu.memory_space<vmem>>, vector<512x512xf32>
    %c0_2 = arith.constant 0 : index
    %c0_3 = arith.constant 0 : index
    %4 = vector.load %arg3[%c0_2, %c0_3] : memref<512x768xf32, #tpu.memory_space<vmem>>, vector<512x768xf32>
    %c0_4 = arith.constant 0 : index
    %c0_5 = arith.constant 0 : index
    %5 = vector.load %arg4[%c0_4, %c0_5] : memref<768x512xf32, #tpu.memory_space<vmem>>, vector<768x512xf32>
    %cst = arith.constant dense<0.000000e+00> : vector<512x512xf32>
    %6 = tpu.matmul %4, %5, %cst {dimension_numbers = #tpu.dot_dimension_numbers<[1], [0], [0], [1], [0, 0, 1, 1], [], []>} : vector<512x768xf32>, vector<768x512xf32>, vector<512x512xf32> -> vector<512x512xf32>
    %7 = arith.addf %3, %6 : vector<512x512xf32>
    %c0_6 = arith.constant 0 : index
    %c0_7 = arith.constant 0 : index
    %8 = vector.load %arg6[%c0_6, %c0_7] : memref<512x512xf32, #tpu.memory_space<vmem>>, vector<512x512xf32>
    tpu.vector_store %arg6[%c0_6, %c0_7], %7 {strides = array<i32>} : memref<512x512xf32, #tpu.memory_space<vmem>>, vector<512x512xf32>,
    return
  }
  func.func @transform_0(%arg0: i32, %arg1: i32, %arg2: i32) -> (i32, i32) {
    %c0_i32 = arith.constant 0 : i32
    return %arg0, %arg2 : i32, i32
  }
  func.func @transform_1(%arg0: i32, %arg1: i32, %arg2: i32) -> (i32, i32) {
    %c0_i32 = arith.constant 0 : i32
    return %arg2, %arg1 : i32, i32
  }
  func.func @transform_2(%arg0: i32, %arg1: i32, %arg2: i32) -> (i32, i32) {
    %c0_i32 = arith.constant 0 : i32
    %c0_i32_0 = arith.constant 0 : i32
    return %c0_i32, %arg1 : i32, i32
  }
  func.func @transform_3(%arg0: i32, %arg1: i32, %arg2: i32) -> (i32, i32) {
    %c0_i32 = arith.constant 0 : i32
    return %arg0, %arg1 : i32, i32
  }
}

</mosaic_0001>

<bundles_post_ra>
// kernel: tpu_custom_call.1
= control target key start
LH: loop header
LB: loop body
LE: loop exit
PB: predicated region body
PF: predicated region fallthrough
CT: control target
= control target key end

     0   :  { %s8685_s0 = inlined_call_operand.hbm [shape: f32[2048,1536], index: 0, kind: input, shape index: {}]   ;;  %s8686_s1 = inlined_call_operand.hbm [shape: f32[1536,1024], index: 1, kind: input, shape index: {}]   ;;  %s8687_s2 = inlined_call_operand.hbm [shape: f32[1,1024], index: 2, kind: input, shape index: {}]   ;;  %s8688_s3 = inlined_call_operand.hbm [shape: f32[2048,1024], index: 3, kind: output, shape index: {}]  }
   0x1   :  { %8709 = sst [smem:[#allocation30_spill]] %s8685_s0 }
   0x2   :  { %8710 = sst [smem:[#allocation31_spill]] %s8686_s1 }
   0x3   :  { %8711 = sst [smem:[#allocation32_spill]] %s8687_s2 }
   0x4   :  { %8712 = sst [smem:[#allocation33_spill]] %s8688_s3 }
   0x5   :  { %8 = vsyncpa [#allocation3], 0 }
   0x6   :  { %10 = vsyncpa [#allocation3 + $0x1], 0 }
   0x7   :  { %11 = vsyncpa [#allocation6], 0 }
   0x8   :  { %13 = vsyncpa [#allocation6 + $0x1], 0 }
   0x9   :  { %14 = vsyncpa [#allocation4], 0 }
   0xa   :  { %16 = vsyncpa [#allocation4 + $0x1], 0  ;;  %s6405_s12 = smov 0   ;;  %s6407_s13 = smov 0  }
   0xb   :  { %s6409_s14 = smov 0   ;;  %s6411_s15 = smov 0  }
   0xc   :  { %s6413_s16 = smov 0   ;;  %s6415_s17 = smov 0  }
   0xd   :  { %s6417_s18 = smov 0   ;;  %s6419_s19 = smov 0  }
   0xe   :  { %s6421_s20 = smov 0   ;;  %s6423_s21 = smov 0  }
   0xf   :  { %s6425_s22 = smov 0   ;;  %s6427_s23 = smov 0  }
  0x10   :  { %s6429_s24 = smov 0   ;;  %s6431_s25 = smov 0  }
  0x11   :  { %s6433_s26 = smov 0   ;;  %s6435_s27 = smov 0  }
  0x12   :  { %s6437_s28 = smov 0   ;;  %s6439_s29 = smov 0  }
  0x13   :  { %s6441_s30 = smov 0  }
  0x14 LB: > { %8713 = sst [smem:[#allocation13_spill]] %s6298_s12  ;;  %s34_s4 = sadd.s32 1, %s6358_s27  ;;  %s6370_s30 = sphi %s6441_s30, %s22_s30   ;;  %s6366_s29 = sphi %s6439_s29, %s8796_s29   ;;  %s6362_s28 = sphi %s6437_s28, %s8795_s28   ;;  %s6358_s27 = sphi %s6435_s27, %s8794_s27   ;;  %s6354_s26 = sphi %s6433_s26, %s8781_s26   ;;  %s6350_s25 = sphi %s6431_s25, %s8793_s25   ;;  %s6346_s24 = sphi %s6429_s24, %s8780_s24   ;;  %s6342_s23 = sphi %s6427_s23, %s8779_s23   ;;  %s6338_s22 = sphi %s6425_s22, %s8792_s22   ;;  %s6334_s21 = sphi %s6423_s21, %s8791_s21   ;;  %s6330_s20 = sphi %s6421_s20, %s8790_s20   ;;  %s6326_s19 = sphi %s6419_s19, %s8789_s19   ;;  %s6322_s18 = sphi %s6417_s18, %s8777_s18   ;;  %s6318_s17 = sphi %s6415_s17, %s8788_s17   ;;  %s6314_s16 = sphi %s6413_s16, %s8776_s16   ;;  %s6310_s15 = sphi %s6411_s15, %s8775_s15   ;;  %s6306_s14 = sphi %s6409_s14, %s8786_s14   ;;  %s6302_s13 = sphi %s6407_s13, %s8784_s13   ;;  %s6298_s12 = sphi %s6405_s12, %s8774_s12  }
  0x15   : > { %8714 = sst [smem:[#allocation14_spill]] %s6302_s13  ;;  %s37_s5 = sadd.s32 1, %s6362_s28 }
  0x16   : > { %8715 = sst [smem:[#allocation15_spill]] %s6310_s15  ;;  %p35_p0 = scmp.ge.s32.totalorder %s34_s4, 2 }
  0x17   : > { %8716 = sst [smem:[#allocation16_spill]] %s6314_s16  ;;  %p8699_p1 = scmp.eq.s32.totalorder %s6370_s30, 0 }
  0x18   : > { %8717 = sst [smem:[#allocation17_spill]] %s6318_s17  ;;  %s78_s6 = sadd.s32 1, %s6330_s20 }
  0x19   : > { %8718 = sst [smem:[#allocation18_spill]] %s6322_s18  ;;  %p85_p2 = scmp.ne.s32.totalorder %s6330_s20, %s6326_s19 }
  0x1a   : > { %8719 = sst [smem:[#allocation19_spill]] %s6326_s19  ;;  %s8798_s4 = smov (%p35_p0, %s34_s4), 0 }
  0x1b   : > { %8720 = sst [smem:[#allocation20_spill]] %s6342_s23  ;;  %s8800_s5 = smov (!%p35_p0, %s37_s5), %s6362_s28 }
  0x1c   : > { %8721 = sst [smem:[#allocation21_spill]] %s6346_s24  ;;  %s6513_s7 = ssub.s32 %s6358_s27, %s8798_s4 }
  0x1d   : > { %8722 = sst [smem:[#allocation22_spill]] %s6350_s25  ;;  %p6517_p3 = por %p85_p2, %p8699_p1 }
  0x1e   : > { %8723 = sst [smem:[#allocation23_spill]] %s6354_s26  ;;  %p39_p4 = scmp.ge.s32.totalorder %s8800_s5, 2 }
  0x1f   : > { %8724 = sst [smem:[#allocation24_spill]] %s6358_s27  ;;  %p8698_p6 = scmp.lt.s32.totalorder %s6370_s30, 16 }
  0x20   : > { %8725 = sst [smem:[#allocation25_spill]] %s6366_s29  ;;  %s193_s10 = sand.u32 1, %s6370_s30  }
  0x21   : > { %8726 = sst [smem:[#allocation26_spill]] %s8798_s4  ;;  %s195_s11 = sand.u32 1, %s6330_s20  }
  0x22   : > { %s6528_s9 = scalar_select %p39_p4, 0, %s8800_s5  }
  0x23   : > { %s5898_s26 = smul.u32 3072, %s195_s11  ;;  %s4980_s25 = sshll.u32 %s6362_s28, 2 }
  0x24   : > { %8728 = sst [smem:[#allocation27_spill]] %s6528_s9  ;;  %s6534_s3 = ssub.s32 %s6362_s28, %s6528_s9 }
  0x25   : > { %s75_s4 = sor.u32 %s6534_s3, %s6513_s7  ;;  %s4997_s24 = smul.u32 768, %s6358_s27 }
  0x26   : > { %p76_p7 = scmp.eq.s32.totalorder %s75_s4, 0  ;;  %s197_s13 = scalar_lea.vmem [#allocation5], %s5898_s26 }
  0x27   : > { %s204_s12 = sadd.s32 %s4997_s24, %s4980_s25  ;;  %s207_s15 = sshll.u32 %s197_s13, 4  ;;  %s6543_s15 = int_to_ptr.vmem [resolvable:$true] %s207_s15 }
  0x28   : > { %s6541_s2 = scalar_select %p76_p7, %s6330_s20, %s78_s6  }
  0x29   : > { %s4982_s16 = sshll.u32 %s204_s12, 7  ;;  %s8729_s1 = sld [smem:[#allocation31_spill]] }
  0x2a   : > { %p6554_p8 = pnand %p8698_p6, %p6517_p3  ;;  %s6558_s12 = scalar_lea.sflag [#allocation6], %s193_s10 }
  0x2c   : > { %p6088_p10 = pneg %p6554_p8 }
  0x2f   : > { %s6548_s17 = scalar_lea.hbm %s8729_s1, %s4982_s16  ;;  %s6091_s19 = scalar_lea.hbm %s8729_s1, 196608 }
  0x30   : > { %s6086_s13 = scalar_lea.hbm %s6548_s17, 49152  ;;  %p6092_p13 = scmp.lt.u32.totalorder %s6548_s17, %s8729_s1 }
  0x31   : > { %p6087_p9 = scmp.ne.s32.totalorder %s6548_s17, %s6086_s13  ;;  %p6093_p0 = scmp.lt.u32.totalorder %s6091_s19, %s6086_s13 }
  0x32   : > { %p6095_p3 = scmp.lt.u32.totalorder %s6086_s13, %s6548_s17 }
  0x33   : > { %p6089_p11 = pnand %p6088_p10, %p6087_p9  ;;  %p6094_p2 = por %p6093_p0, %p6092_p13 }
  0x35   : > { %p6090_p12 = pneg %p6089_p11  ;;  %p6096_p7 = por %p6095_p3, %p6094_p2 }
  0x37   : > { %p6097_p5 = pnand %p6096_p7, %p6090_p12 }
  0x39   : > { %6100 = shalt.err (!%p6097_p5)
}
  0x3a   : > { %s6101_s26 = scalar_lea.vmem %s6543_s15, 49152  ;;  %s6372_s6 = smov [#allocation5]  }
  0x3b   : > { %p6102_p9 = scmp.ne.s32.totalorder %s6543_s15, %s6101_s26  ;;  %s6106_s8 = sshll.u32 %s6372_s6, 4  ;;  %s6107_s8 = int_to_ptr.vmem [resolvable:$false] %s6106_s8 }
  0x3c   : > { %s6108_s10 = scalar_lea.vmem %s6107_s8, 98304  ;;  %p6109_p1 = scmp.lt.s32.totalorder %s6543_s15, %s6107_s8 }
  0x3d   : > { %p6104_p11 = pnand %p6102_p9, %p6088_p10  ;;  %p6110_p13 = scmp.lt.s32.totalorder %s6108_s10, %s6101_s26 }
  0x3f   : > { %p6105_p6 = pneg %p6104_p11  ;;  %p6111_p0 = por %p6110_p13, %p6109_p1 }
  0x41   : > { %p6112_p2 = pnand %p6111_p0, %p6105_p6 }
  0x43   : > { %6115 = shalt.err (!%p6112_p2)
}
  0x44   : > { %s6373_s11 = smov 1024   ;;  %s6374_s13 = smov 512  }
  0x45   : > { %s6375_s16 = smov 32   ;;  %p4986_p1 = scmp.ge.s32.totalorder %s6370_s30, 1 }
  0x46   : > { %5915 = dma.hbm_to_vmem [thread:$0]  (!%p6554_p8), %s6548_s17, 49152, %s6543_s15, %s6558_s12, %s6373_s11, %s6374_s13, %s6375_s16  }
  0x47   : > { %p234_p5 = scmp.lt.s32.totalorder %s6370_s30, 17  ;;  %s41_s19 = sadd.s32 1, %s6366_s29 }
  0x48   : > { %s8802_s19 = smov (!%p39_p4, %s41_s19), %s6366_s29  ;;  %s50_s24 = sadd.s32 1, %s6342_s23 }
  0x49   : > { %p6588_p6 = pnand %p4986_p1, %p234_p5  ;;  %p57_p10 = scmp.ne.s32.totalorder %s6342_s23, %s6338_s22 }
  0x4a   : > { %p43_p12 = scmp.ge.s32.totalorder %s8802_s19, 4  ;;  %p8732_p8 = scmp.eq.s32.totalorder %s6370_s30, 0 }
  0x4b   : > { %s132_s15 = sadd.s32 1, %s6306_s14  ;;  %s169_s17 = sand.u32 1, %s6342_s23  }
  0x4c   : > { %p59_p7 = por %p8732_p8, %p57_p10  ;;  %s8804_s19 = smov (%p43_p12, %s8802_s19), 0 }
  0x4d   : > { %8733 = sst [smem:[#allocation28_spill]] %s8804_s19  ;;  %s175_s4 = smul.u32 6, %s6358_s27 }
  0x4e   : > { %s45_s25 = ssub.s32 %s6366_s29, %s8804_s19  ;;  %s5896_s6 = smul.u32 3072, %s169_s17 }
  0x4f   : > { %s47_s26 = sor.u32 %s6513_s7, %s45_s25  ;;  %s129_s5 = sor.u32 %s6534_s3, %s45_s25 }
  0x50   : > { %p48_p4 = scmp.eq.s32.totalorder %s47_s26, 0  ;;  %p130_p9 = scmp.eq.s32.totalorder %s129_s5, 0 }
  0x51   : > { %p8734_p11 = scmp.lt.s32.totalorder %s6370_s30, 16  ;;  %s5897_s13 = smul.u32 768, %s6366_s29 }
  0x52   : > { %s6619_s10 = scalar_select %p48_p4, %s6342_s23, %s50_s24  }
  0x53   : > { %p6614_p13 = pnand %p8734_p11, %p59_p7  ;;  %s173_s16 = scalar_lea.vmem [#allocation2], %s5896_s6 }
  0x54   : > { %8736 = sst [smem:[#allocation29_spill]] %s6619_s10  ;;  %s183_s1 = sshll.u32 %s173_s16, 4  ;;  %s6625_s1 = int_to_ptr.vmem [resolvable:$true] %s183_s1 }
  0x55   : > { %s6622_s11 = scalar_select %p130_p9, %s6306_s14, %s132_s15  }
  0x56   : > { %s180_s19 = sadd.s32 %s5897_s13, %s175_s4  ;;  %s8737_s0 = sld [smem:[#allocation30_spill]] }
  0x57   : > { %s4979_s7 = sshll.u32 %s180_s19, 7  ;;  %s6632_s24 = scalar_lea.sflag [#allocation3], %s169_s17 }
  0x58   : > { %p6118_p2 = pneg %p6614_p13 }
  0x5c   : > { %s6630_s5 = scalar_lea.hbm %s8737_s0, %s4979_s7  ;;  %s6121_s6 = scalar_lea.hbm %s8737_s0, 393216 }
  0x5d   : > { %s6116_s15 = scalar_lea.hbm %s6630_s5, 49152  ;;  %p6122_p10 = scmp.lt.u32.totalorder %s6630_s5, %s8737_s0 }
  0x5e   : > { %p6117_p0 = scmp.ne.s32.totalorder %s6630_s5, %s6116_s15  ;;  %p6123_p12 = scmp.lt.u32.totalorder %s6121_s6, %s6116_s15 }
  0x5f   : > { %p6125_p7 = scmp.lt.u32.totalorder %s6116_s15, %s6630_s5 }
  0x60   : > { %p6119_p1 = pnand %p6118_p2, %p6117_p0  ;;  %p6124_p8 = por %p6123_p12, %p6122_p10 }
  0x62   : > { %p6120_p5 = pneg %p6119_p1  ;;  %p6126_p4 = por %p6125_p7, %p6124_p8 }
  0x64   : > { %p6127_p9 = pnand %p6126_p4, %p6120_p5 }
  0x66   : > { %6130 = shalt.err (!%p6127_p9)
}
  0x67   : > { %s6131_s17 = scalar_lea.vmem %s6625_s1, 49152  ;;  %s6376_s7 = smov [#allocation2]  }
  0x68   : > { %p6132_p11 = scmp.ne.s32.totalorder %s6625_s1, %s6131_s17  ;;  %s6136_s25 = sshll.u32 %s6376_s7, 4  ;;  %s6137_s25 = int_to_ptr.vmem [resolvable:$false] %s6136_s25 }
  0x69   : > { %s6138_s26 = scalar_lea.vmem %s6137_s25, 98304  ;;  %p6139_p3 = scmp.lt.s32.totalorder %s6625_s1, %s6137_s25 }
  0x6a   : > { %p6134_p0 = pnand %p6132_p11, %p6118_p2  ;;  %p6140_p10 = scmp.lt.s32.totalorder %s6138_s26, %s6131_s17 }
  0x6c   : > { %p6135_p1 = pneg %p6134_p0  ;;  %p6141_p12 = por %p6140_p10, %p6139_p3 }
  0x6e   : > { %p6142_p8 = pnand %p6141_p12, %p6135_p1 }
  0x70   : > { %6145 = shalt.err (!%p6142_p8)
}
  0x71   : > { %s6377_s15 = smov 1536   ;;  %s8738_s19 = sld [smem:[#allocation17_spill]] }
  0x72   : > { %s8739_s4 = sld [smem:[#allocation19_spill]]  ;;  %s8740_s6 = sld [smem:[#allocation18_spill]] }
  0x73   : > { %s8741_s13 = sld [smem:[#allocation16_spill]]  ;;  %s8742_s16 = sld [smem:[#allocation15_spill]] }
  0x74   : > { %s8743_s17 = sld [smem:[#allocation14_spill]]  ;;  %s6378_s7 = smov 768  }
  0x75   : > { %s6379_s25 = smov 48   ;;  %s8744_s26 = sld [smem:[#allocation13_spill]] }
  0x76   : > { %5912 = dma.hbm_to_vmem [thread:$0]  (!%p6614_p13), %s6630_s5, 49152, %s6625_s1, %s6632_s24, %s6377_s15, %s6378_s7, %s6379_s25  }
  0x77   : > { %s6661_s0 = sadd.s32 4294967295, %s6370_s30   ;;  %s4974_s9 = sadd.s32 4294967294, %s6370_s30  }
  0x78   : > { %p64_p3 = scmp.eq.s32.totalorder %s6661_s0, 0  ;;  %p102_p2 = scmp.eq.s32.totalorder %s6534_s3, 0 }
  0x79   : > { %s104_s29 = sadd.s32 1, %s8738_s19  ;;  %p8745_p5 = scmp.ne.s32.totalorder %s6338_s22, %s6334_s21 }
  0x7a   : > { %p8747_p4 = scmp.ne.s32.totalorder %s8739_s4, %s8740_s6  ;;  %p111_p13 = scmp.ne.s32.totalorder %s8738_s19, %s8741_s13 }
  0x7b   : > { %p6670_p7 = por %p64_p3, %p8745_p5  ;;  %p117_p11 = scmp.ne.s32.totalorder %s8741_s13, %s8742_s16 }
  0x7c   : > { %p6677_p9 = por %p8747_p4, %p64_p3  ;;  %p142_p0 = scmp.ne.s32.totalorder %s6306_s14, %s8743_s17 }
  0x7d   : > { %s8746_s27 = scalar_select %p6670_p7, 1, 0 }
  0x7e   : > { %s8748_s1 = scalar_select %p6677_p9, 1, 0 }
  0x7f   : > { %s6682_s8 = scalar_select %p102_p2, %s8738_s19, %s104_s29  }
  0x80   : > { %p143_p1 = scmp.eq.s32.totalorder %s6661_s0, 15  ;;  %p8749_p10 = scmp.eq.s32.totalorder %s6370_s30, 0 }
  0x81   : > { %p6697_p8 = por %p117_p11, %p64_p3  ;;  %p148_p2 = scmp.ne.s32.totalorder %s8743_s17, %s8744_s26 }
  0x82   : > { %p6693_p12 = por %p111_p13, %p8749_p10  ;;  %p6701_p5 = por %p143_p1, %p142_p0 }
  0x83   : > { %s8751_s21 = scalar_select %p6697_p8, 1, 0 }
  0x84   : > { %s8752_s5 = scalar_select %p6701_p5, 1, 0 }
  0x85   : > { %p149_p4 = scmp.eq.s32.totalorder %s4974_s9, 15  ;;  %s219_s29 = sand.u32 1, %s8738_s19  }
  0x86   : > { %s4983_s24 = sshll.u32 %s219_s29, 2  ;;  %s4998_s15 = sshll.u32 %s6362_s28, 6 }
  0x87   : > { %p6709_p9 = por %p149_p4, %p148_p2  ;;  %s8754_s16 = sld [smem:[#allocation32_spill]] }
  0x88   : > { %s221_s10 = scalar_lea.vmem [#allocation7], %s4983_s24  ;;  %p8756_p3 = scmp.lt.s32.totalorder %s6370_s30, 16 }
  0x89   : > { %s8753_s4 = scalar_select %p6709_p9, 1, 0 }
  0x8a   : > { %s229_s23 = sshll.u32 %s221_s10, 4  ;;  %p6724_p13 = pnand %p8756_p3, %p6693_p12  ;;  %s6718_s23 = int_to_ptr.vmem [resolvable:$true] %s229_s23 }
  0x8c   : > { %p6148_p0 = pneg %p6724_p13 }
  0x8d   : > { %s8755_s7 = smov %s8754_s16  ;;  %s6716_s25 = scalar_lea.hbm %s8754_s16, %s4998_s15 }
  0x8e   : > { %s6146_s19 = scalar_lea.hbm %s6716_s25, 64  ;;  %s6151_s26 = scalar_lea.hbm %s8755_s7, 128 }
  0x8f   : > { %p6147_p11 = scmp.ne.s32.totalorder %s6716_s25, %s6146_s19  ;;  %p6152_p12 = scmp.lt.u32.totalorder %s6716_s25, %s8755_s7 }
  0x90   : > { %p6153_p2 = scmp.lt.u32.totalorder %s6151_s26, %s6146_s19  ;;  %p6155_p3 = scmp.lt.u32.totalorder %s6146_s19, %s6716_s25 }
  0x91   : > { %p6149_p1 = pnand %p6148_p0, %p6147_p11 }
  0x92   : > { %p6154_p4 = por %p6153_p2, %p6152_p12 }
  0x93   : > { %p6150_p10 = pneg %p6149_p1 }
  0x94   : > { %p6156_p9 = por %p6155_p3, %p6154_p4 }
  0x96   : > { %p6157_p5 = pnand %p6156_p9, %p6150_p10 }
  0x98   : > { %6160 = shalt.err (!%p6157_p5)
}
  0x99   : > { %s6161_s24 = scalar_lea.vmem %s6718_s23, 64  ;;  %s6380_s15 = smov [#allocation7]  }
  0x9a   : > { %p6162_p11 = scmp.ne.s32.totalorder %s6718_s23, %s6161_s24  ;;  %s6166_s6 = sshll.u32 %s6380_s15, 4  ;;  %s6167_s6 = int_to_ptr.vmem [resolvable:$false] %s6166_s6 }
  0x9b   : > { %s6168_s13 = scalar_lea.vmem %s6167_s6, 128  ;;  %p6169_p7 = scmp.lt.s32.totalorder %s6718_s23, %s6167_s6 }
  0x9c   : > { %p6164_p1 = pnand %p6162_p11, %p6148_p0  ;;  %p6170_p12 = scmp.lt.s32.totalorder %s6168_s13, %s6161_s24 }
  0x9e   : > { %p6165_p8 = pneg %p6164_p1  ;;  %p6171_p2 = por %p6170_p12, %p6169_p7 }
  0xa0   : > { %p6172_p4 = pnand %p6171_p2, %p6165_p8 }
  0xa2   : > { %6175 = shalt.err (!%p6172_p4)
}
  0xa3   : > { %5918 = dma.hbm_to_vmem [thread:$0]  (!%p6724_p13), %s6716_s25, 64, %s6718_s23, %s6558_s12  }
  0xa4   : > { %238 = sbr.rel (%p6588_p6) target bundleno = 1400 (0x578), region = 32  ;;  %s240_s16 = sand.u32 (!%p6588_p6), 1, %s6338_s22  }
  0xa5   : > { %s5899_s19 = smul.u32 (!%p6588_p6), 3072, %s240_s16  ;;  %s241_s17 = scalar_lea.sflag (!%p6588_p6), [#allocation3], %s240_s16 }
  0xa6   : > { %p8758_p9 = scmp.ne.s32.totalorder (!%p6588_p6), %s8746_s27, 0 }
  0xa7   : > { %s6757_s10 = scalar_lea.vmem (!%p6588_p6), [#allocation2], %s5899_s19 }
  0xab   : > { %6281 = dma.done.wait (%p8758_p9), %s241_s17, 49152  }
  0xac   : > { %6283 = vsyncadd (%p8758_p9), %s241_s17, 4294918144  ;;  %s8759_s9 = sld [smem:[#allocation19_spill]]  ;;  %s249_s26 = sand.u32 1, %s6661_s0  }
  0xad   : > { %s250_s18 = scalar_lea.sflag [#allocation6], %s249_s26  ;;  %p8760_p6 = scmp.ne.s32.totalorder %s8748_s1, 0 }
  0xb2   : > { %s251_s23 = sand.u32 1, %s8759_s9  }
  0xb3   : > { %s5900_s12 = smul.u32 3072, %s251_s23 }
  0xb5   : > { %s6765_s25 = scalar_lea.vmem [#allocation5], %s5900_s12 }
  0xb6   : > { %6285 = dma.done.wait (%p8760_p6), %s250_s18, 49152  }
  0xb7   : > { %6287 = vsyncadd (%p8760_p6), %s250_s18, 4294918144  ;;  %s8761_s3 = sld [smem:[#allocation16_spill]]  ;;  %p8762_p7 = scmp.ne.s32.totalorder %s8751_s21, 0 }
  0xbd   : > { %s260_s29 = sand.u32 1, %s8761_s3  }
  0xbe   : > { %s4987_s24 = sshll.u32 %s260_s29, 2 }
  0xbf   : > { %s262_s27 = scalar_lea.vmem [#allocation7], %s4987_s24 }
  0xc0   : > { %6289 = dma.done.wait (%p8762_p7), %s250_s18, 64  }
  0xc1   : > { %6291 = vsyncadd (%p8762_p7), %s250_s18, 4294967232  ;;  %s8763_s0 = sld [smem:[#allocation14_spill]]  ;;  %s8764_s16 = sld [smem:[#allocation21_spill]] }
  0xc7   : > { %s292_s15 = sand.u32 1, %s8763_s0   ;;  %p4989_p8 = scmp.ne.s32.totalorder %s8764_s16, 0 }
  0xc8   : > { %s4988_s6 = sshll.u32 %s292_s15, 11  ;;  %v308_v0 = vlaneseq (!%p4989_p8)  ;;  %v306_v2 = vld [vmem:[%s262_s27] sm:$0xf] (!%p4989_p8) }
  0xc9   : > { %s6779_s13 = scalar_lea.vmem [#allocation8], %s4988_s6  ;;  %305 = sbr.rel (%p4989_p8) target bundleno = 336 (0x150), region = 48 }
  0xca   : > { %v309_v1 = vshrl.u32 (!%p4989_p8), %v308_v0, 7 }
  0xcc   : > { %v310_v3 = vsub.s32 (!%p4989_p8), 0, %v309_v1  ;;  %v314_v4 = vsub.s32 (!%p4989_p8), 1, %v309_v1  ;;  %v318_v5 = vsub.s32 (!%p4989_p8), 2, %v309_v1  ;;  %v322_v6 = vsub.s32 (!%p4989_p8), 3, %v309_v1 }
  0xce   : > { %v6782_v7 = vrot.slane (!%p4989_p8), %v306_v2, %v310_v3  ;;  %v6784_v8 = vrot.slane (!%p4989_p8), %v306_v2, %v314_v4  ;;  %v6786_v9 = vrot.slane (!%p4989_p8), %v306_v2, %v318_v5  ;;  %v6788_v10 = vrot.slane (!%p4989_p8), %v306_v2, %v322_v6 }
  0xd0   : > { %328 = vst [vmem:[%s6779_s13] sm:$0xff] %v6782_v7  ;;  %332 = vst [vmem:[%s6779_s13 + $0x20] sm:$0xff] %v6782_v7 }
  0xd1   : > { %336 = vst [vmem:[%s6779_s13 + $0x40] sm:$0xff] %v6782_v7  ;;  %340 = vst [vmem:[%s6779_s13 + $0x60] sm:$0xff] %v6782_v7 }
  0xd2   : > { %344 = vst [vmem:[%s6779_s13 + $0x80] sm:$0xff] %v6782_v7  ;;  %348 = vst [vmem:[%s6779_s13 + $0xa0] sm:$0xff] %v6782_v7 }
  0xd3   : > { %352 = vst [vmem:[%s6779_s13 + $0xc0] sm:$0xff] %v6782_v7  ;;  %356 = vst [vmem:[%s6779_s13 + $0xe0] sm:$0xff] %v6782_v7 }
  0xd4   : > { %360 = vst [vmem:[%s6779_s13 + $0x100] sm:$0xff] %v6782_v7  ;;  %364 = vst [vmem:[%s6779_s13 + $0x120] sm:$0xff] %v6782_v7 }
  0xd5   : > { %368 = vst [vmem:[%s6779_s13 + $0x140] sm:$0xff] %v6782_v7  ;;  %372 = vst [vmem:[%s6779_s13 + $0x160] sm:$0xff] %v6782_v7 }
  0xd6   : > { %376 = vst [vmem:[%s6779_s13 + $0x180] sm:$0xff] %v6782_v7  ;;  %380 = vst [vmem:[%s6779_s13 + $0x1a0] sm:$0xff] %v6782_v7 }
  0xd7   : > { %384 = vst [vmem:[%s6779_s13 + $0x1c0] sm:$0xff] %v6782_v7  ;;  %388 = vst [vmem:[%s6779_s13 + $0x1e0] sm:$0xff] %v6782_v7 }
  0xd8   : > { %392 = vst [vmem:[%s6779_s13 + $0x200] sm:$0xff] %v6782_v7  ;;  %396 = vst [vmem:[%s6779_s13 + $0x220] sm:$0xff] %v6782_v7 }
  0xd9   : > { %400 = vst [vmem:[%s6779_s13 + $0x240] sm:$0xff] %v6782_v7  ;;  %404 = vst [vmem:[%s6779_s13 + $0x260] sm:$0xff] %v6782_v7 }
  0xda   : > { %408 = vst [vmem:[%s6779_s13 + $0x280] sm:$0xff] %v6782_v7  ;;  %412 = vst [vmem:[%s6779_s13 + $0x2a0] sm:$0xff] %v6782_v7 }
  0xdb   : > { %416 = vst [vmem:[%s6779_s13 + $0x2c0] sm:$0xff] %v6782_v7  ;;  %420 = vst [vmem:[%s6779_s13 + $0x2e0] sm:$0xff] %v6782_v7 }
  0xdc   : > { %424 = vst [vmem:[%s6779_s13 + $0x300] sm:$0xff] %v6782_v7  ;;  %428 = vst [vmem:[%s6779_s13 + $0x320] sm:$0xff] %v6782_v7 }
  0xdd   : > { %432 = vst [vmem:[%s6779_s13 + $0x340] sm:$0xff] %v6782_v7  ;;  %436 = vst [vmem:[%s6779_s13 + $0x360] sm:$0xff] %v6782_v7 }
  0xde   : > { %440 = vst [vmem:[%s6779_s13 + $0x380] sm:$0xff] %v6782_v7  ;;  %444 = vst [vmem:[%s6779_s13 + $0x3a0] sm:$0xff] %v6782_v7 }
  0xdf   : > { %448 = vst [vmem:[%s6779_s13 + $0x3c0] sm:$0xff] %v6782_v7  ;;  %452 = vst [vmem:[%s6779_s13 + $0x3e0] sm:$0xff] %v6782_v7 }
  0xe0   : > { %456 = vst [vmem:[%s6779_s13 + $0x400] sm:$0xff] %v6782_v7  ;;  %460 = vst [vmem:[%s6779_s13 + $0x420] sm:$0xff] %v6782_v7 }
  0xe1   : > { %464 = vst [vmem:[%s6779_s13 + $0x440] sm:$0xff] %v6782_v7  ;;  %468 = vst [vmem:[%s6779_s13 + $0x460] sm:$0xff] %v6782_v7 }
  0xe2   : > { %472 = vst [vmem:[%s6779_s13 + $0x480] sm:$0xff] %v6782_v7  ;;  %476 = vst [vmem:[%s6779_s13 + $0x4a0] sm:$0xff] %v6782_v7 }
  0xe3   : > { %480 = vst [vmem:[%s6779_s13 + $0x4c0] sm:$0xff] %v6782_v7  ;;  %484 = vst [vmem:[%s6779_s13 + $0x4e0] sm:$0xff] %v6782_v7 }
  0xe4   : > { %488 = vst [vmem:[%s6779_s13 + $0x500] sm:$0xff] %v6782_v7  ;;  %492 = vst [vmem:[%s6779_s13 + $0x520] sm:$0xff] %v6782_v7 }
  0xe5   : > { %496 = vst [vmem:[%s6779_s13 + $0x540] sm:$0xff] %v6782_v7  ;;  %500 = vst [vmem:[%s6779_s13 + $0x560] sm:$0xff] %v6782_v7 }
  0xe6   : > { %504 = vst [vmem:[%s6779_s13 + $0x580] sm:$0xff] %v6782_v7  ;;  %508 = vst [vmem:[%s6779_s13 + $0x5a0] sm:$0xff] %v6782_v7 }
  0xe7   : > { %512 = vst [vmem:[%s6779_s13 + $0x5c0] sm:$0xff] %v6782_v7  ;;  %516 = vst [vmem:[%s6779_s13 + $0x5e0] sm:$0xff] %v6782_v7 }
  0xe8   : > { %520 = vst [vmem:[%s6779_s13 + $0x600] sm:$0xff] %v6782_v7  ;;  %524 = vst [vmem:[%s6779_s13 + $0x620] sm:$0xff] %v6782_v7 }
  0xe9   : > { %528 = vst [vmem:[%s6779_s13 + $0x640] sm:$0xff] %v6782_v7  ;;  %532 = vst [vmem:[%s6779_s13 + $0x660] sm:$0xff] %v6782_v7 }
  0xea   : > { %536 = vst [vmem:[%s6779_s13 + $0x680] sm:$0xff] %v6782_v7  ;;  %540 = vst [vmem:[%s6779_s13 + $0x6a0] sm:$0xff] %v6782_v7 }
  0xeb   : > { %544 = vst [vmem:[%s6779_s13 + $0x6c0] sm:$0xff] %v6782_v7  ;;  %548 = vst [vmem:[%s6779_s13 + $0x6e0] sm:$0xff] %v6782_v7 }
  0xec   : > { %552 = vst [vmem:[%s6779_s13 + $0x700] sm:$0xff] %v6782_v7  ;;  %556 = vst [vmem:[%s6779_s13 + $0x720] sm:$0xff] %v6782_v7 }
  0xed   : > { %560 = vst [vmem:[%s6779_s13 + $0x740] sm:$0xff] %v6782_v7  ;;  %564 = vst [vmem:[%s6779_s13 + $0x760] sm:$0xff] %v6782_v7 }
  0xee   : > { %568 = vst [vmem:[%s6779_s13 + $0x780] sm:$0xff] %v6782_v7  ;;  %572 = vst [vmem:[%s6779_s13 + $0x7a0] sm:$0xff] %v6782_v7 }
  0xef   : > { %576 = vst [vmem:[%s6779_s13 + $0x7c0] sm:$0xff] %v6782_v7  ;;  %580 = vst [vmem:[%s6779_s13 + $0x7e0] sm:$0xff] %v6782_v7 }
  0xf0   : > { %329 = vst [vmem:[%s6779_s13 + $0x8] sm:$0xff] %v6784_v8  ;;  %333 = vst [vmem:[%s6779_s13 + $0x28] sm:$0xff] %v6784_v8 }
  0xf1   : > { %337 = vst [vmem:[%s6779_s13 + $0x48] sm:$0xff] %v6784_v8  ;;  %341 = vst [vmem:[%s6779_s13 + $0x68] sm:$0xff] %v6784_v8 }
  0xf2   : > { %345 = vst [vmem:[%s6779_s13 + $0x88] sm:$0xff] %v6784_v8  ;;  %349 = vst [vmem:[%s6779_s13 + $0xa8] sm:$0xff] %v6784_v8 }
  0xf3   : > { %353 = vst [vmem:[%s6779_s13 + $0xc8] sm:$0xff] %v6784_v8  ;;  %357 = vst [vmem:[%s6779_s13 + $0xe8] sm:$0xff] %v6784_v8 }
  0xf4   : > { %361 = vst [vmem:[%s6779_s13 + $0x108] sm:$0xff] %v6784_v8  ;;  %365 = vst [vmem:[%s6779_s13 + $0x128] sm:$0xff] %v6784_v8 }
  0xf5   : > { %369 = vst [vmem:[%s6779_s13 + $0x148] sm:$0xff] %v6784_v8  ;;  %373 = vst [vmem:[%s6779_s13 + $0x168] sm:$0xff] %v6784_v8 }
  0xf6   : > { %377 = vst [vmem:[%s6779_s13 + $0x188] sm:$0xff] %v6784_v8  ;;  %381 = vst [vmem:[%s6779_s13 + $0x1a8] sm:$0xff] %v6784_v8 }
  0xf7   : > { %385 = vst [vmem:[%s6779_s13 + $0x1c8] sm:$0xff] %v6784_v8  ;;  %389 = vst [vmem:[%s6779_s13 + $0x1e8] sm:$0xff] %v6784_v8 }
  0xf8   : > { %393 = vst [vmem:[%s6779_s13 + $0x208] sm:$0xff] %v6784_v8  ;;  %397 = vst [vmem:[%s6779_s13 + $0x228] sm:$0xff] %v6784_v8 }
  0xf9   : > { %401 = vst [vmem:[%s6779_s13 + $0x248] sm:$0xff] %v6784_v8  ;;  %405 = vst [vmem:[%s6779_s13 + $0x268] sm:$0xff] %v6784_v8 }
  0xfa   : > { %409 = vst [vmem:[%s6779_s13 + $0x288] sm:$0xff] %v6784_v8  ;;  %413 = vst [vmem:[%s6779_s13 + $0x2a8] sm:$0xff] %v6784_v8 }
  0xfb   : > { %417 = vst [vmem:[%s6779_s13 + $0x2c8] sm:$0xff] %v6784_v8  ;;  %421 = vst [vmem:[%s6779_s13 + $0x2e8] sm:$0xff] %v6784_v8 }
  0xfc   : > { %425 = vst [vmem:[%s6779_s13 + $0x308] sm:$0xff] %v6784_v8  ;;  %429 = vst [vmem:[%s6779_s13 + $0x328] sm:$0xff] %v6784_v8 }
  0xfd   : > { %433 = vst [vmem:[%s6779_s13 + $0x348] sm:$0xff] %v6784_v8  ;;  %437 = vst [vmem:[%s6779_s13 + $0x368] sm:$0xff] %v6784_v8 }
  0xfe   : > { %441 = vst [vmem:[%s6779_s13 + $0x388] sm:$0xff] %v6784_v8  ;;  %445 = vst [vmem:[%s6779_s13 + $0x3a8] sm:$0xff] %v6784_v8 }
  0xff   : > { %449 = vst [vmem:[%s6779_s13 + $0x3c8] sm:$0xff] %v6784_v8  ;;  %453 = vst [vmem:[%s6779_s13 + $0x3e8] sm:$0xff] %v6784_v8 }
 0x100   : > { %457 = vst [vmem:[%s6779_s13 + $0x408] sm:$0xff] %v6784_v8  ;;  %461 = vst [vmem:[%s6779_s13 + $0x428] sm:$0xff] %v6784_v8 }
 0x101   : > { %465 = vst [vmem:[%s6779_s13 + $0x448] sm:$0xff] %v6784_v8  ;;  %469 = vst [vmem:[%s6779_s13 + $0x468] sm:$0xff] %v6784_v8 }
 0x102   : > { %473 = vst [vmem:[%s6779_s13 + $0x488] sm:$0xff] %v6784_v8  ;;  %477 = vst [vmem:[%s6779_s13 + $0x4a8] sm:$0xff] %v6784_v8 }
 0x103   : > { %481 = vst [vmem:[%s6779_s13 + $0x4c8] sm:$0xff] %v6784_v8  ;;  %485 = vst [vmem:[%s6779_s13 + $0x4e8] sm:$0xff] %v6784_v8 }
 0x104   : > { %489 = vst [vmem:[%s6779_s13 + $0x508] sm:$0xff] %v6784_v8  ;;  %493 = vst [vmem:[%s6779_s13 + $0x528] sm:$0xff] %v6784_v8 }
 0x105   : > { %497 = vst [vmem:[%s6779_s13 + $0x548] sm:$0xff] %v6784_v8  ;;  %501 = vst [vmem:[%s6779_s13 + $0x568] sm:$0xff] %v6784_v8 }
 0x106   : > { %505 = vst [vmem:[%s6779_s13 + $0x588] sm:$0xff] %v6784_v8  ;;  %509 = vst [vmem:[%s6779_s13 + $0x5a8] sm:$0xff] %v6784_v8 }
 0x107   : > { %513 = vst [vmem:[%s6779_s13 + $0x5c8] sm:$0xff] %v6784_v8  ;;  %517 = vst [vmem:[%s6779_s13 + $0x5e8] sm:$0xff] %v6784_v8 }
 0x108   : > { %521 = vst [vmem:[%s6779_s13 + $0x608] sm:$0xff] %v6784_v8  ;;  %525 = vst [vmem:[%s6779_s13 + $0x628] sm:$0xff] %v6784_v8 }
 0x109   : > { %529 = vst [vmem:[%s6779_s13 + $0x648] sm:$0xff] %v6784_v8  ;;  %533 = vst [vmem:[%s6779_s13 + $0x668] sm:$0xff] %v6784_v8 }
 0x10a   : > { %537 = vst [vmem:[%s6779_s13 + $0x688] sm:$0xff] %v6784_v8  ;;  %541 = vst [vmem:[%s6779_s13 + $0x6a8] sm:$0xff] %v6784_v8 }
 0x10b   : > { %545 = vst [vmem:[%s6779_s13 + $0x6c8] sm:$0xff] %v6784_v8  ;;  %549 = vst [vmem:[%s6779_s13 + $0x6e8] sm:$0xff] %v6784_v8 }
 0x10c   : > { %553 = vst [vmem:[%s6779_s13 + $0x708] sm:$0xff] %v6784_v8  ;;  %557 = vst [vmem:[%s6779_s13 + $0x728] sm:$0xff] %v6784_v8 }
 0x10d   : > { %561 = vst [vmem:[%s6779_s13 + $0x748] sm:$0xff] %v6784_v8  ;;  %565 = vst [vmem:[%s6779_s13 + $0x768] sm:$0xff] %v6784_v8 }
 0x10e   : > { %569 = vst [vmem:[%s6779_s13 + $0x788] sm:$0xff] %v6784_v8  ;;  %573 = vst [vmem:[%s6779_s13 + $0x7a8] sm:$0xff] %v6784_v8 }
 0x10f   : > { %577 = vst [vmem:[%s6779_s13 + $0x7c8] sm:$0xff] %v6784_v8  ;;  %581 = vst [vmem:[%s6779_s13 + $0x7e8] sm:$0xff] %v6784_v8 }
 0x110   : > { %330 = vst [vmem:[%s6779_s13 + $0x10] sm:$0xff] %v6786_v9  ;;  %334 = vst [vmem:[%s6779_s13 + $0x30] sm:$0xff] %v6786_v9 }
 0x111   : > { %338 = vst [vmem:[%s6779_s13 + $0x50] sm:$0xff] %v6786_v9  ;;  %342 = vst [vmem:[%s6779_s13 + $0x70] sm:$0xff] %v6786_v9 }
 0x112   : > { %346 = vst [vmem:[%s6779_s13 + $0x90] sm:$0xff] %v6786_v9  ;;  %350 = vst [vmem:[%s6779_s13 + $0xb0] sm:$0xff] %v6786_v9 }
 0x113   : > { %354 = vst [vmem:[%s6779_s13 + $0xd0] sm:$0xff] %v6786_v9  ;;  %358 = vst [vmem:[%s6779_s13 + $0xf0] sm:$0xff] %v6786_v9 }
 0x114   : > { %362 = vst [vmem:[%s6779_s13 + $0x110] sm:$0xff] %v6786_v9  ;;  %366 = vst [vmem:[%s6779_s13 + $0x130] sm:$0xff] %v6786_v9 }
 0x115   : > { %370 = vst [vmem:[%s6779_s13 + $0x150] sm:$0xff] %v6786_v9  ;;  %374 = vst [vmem:[%s6779_s13 + $0x170] sm:$0xff] %v6786_v9 }
 0x116   : > { %378 = vst [vmem:[%s6779_s13 + $0x190] sm:$0xff] %v6786_v9  ;;  %382 = vst [vmem:[%s6779_s13 + $0x1b0] sm:$0xff] %v6786_v9 }
 0x117   : > { %386 = vst [vmem:[%s6779_s13 + $0x1d0] sm:$0xff] %v6786_v9  ;;  %390 = vst [vmem:[%s6779_s13 + $0x1f0] sm:$0xff] %v6786_v9 }
 0x118   : > { %394 = vst [vmem:[%s6779_s13 + $0x210] sm:$0xff] %v6786_v9  ;;  %398 = vst [vmem:[%s6779_s13 + $0x230] sm:$0xff] %v6786_v9 }
 0x119   : > { %402 = vst [vmem:[%s6779_s13 + $0x250] sm:$0xff] %v6786_v9  ;;  %406 = vst [vmem:[%s6779_s13 + $0x270] sm:$0xff] %v6786_v9 }
 0x11a   : > { %410 = vst [vmem:[%s6779_s13 + $0x290] sm:$0xff] %v6786_v9  ;;  %414 = vst [vmem:[%s6779_s13 + $0x2b0] sm:$0xff] %v6786_v9 }
 0x11b   : > { %418 = vst [vmem:[%s6779_s13 + $0x2d0] sm:$0xff] %v6786_v9  ;;  %422 = vst [vmem:[%s6779_s13 + $0x2f0] sm:$0xff] %v6786_v9 }
 0x11c   : > { %426 = vst [vmem:[%s6779_s13 + $0x310] sm:$0xff] %v6786_v9  ;;  %430 = vst [vmem:[%s6779_s13 + $0x330] sm:$0xff] %v6786_v9 }
 0x11d   : > { %434 = vst [vmem:[%s6779_s13 + $0x350] sm:$0xff] %v6786_v9  ;;  %438 = vst [vmem:[%s6779_s13 + $0x370] sm:$0xff] %v6786_v9 }
 0x11e   : > { %442 = vst [vmem:[%s6779_s13 + $0x390] sm:$0xff] %v6786_v9  ;;  %446 = vst [vmem:[%s6779_s13 + $0x3b0] sm:$0xff] %v6786_v9 }
 0x11f   : > { %450 = vst [vmem:[%s6779_s13 + $0x3d0] sm:$0xff] %v6786_v9  ;;  %454 = vst [vmem:[%s6779_s13 + $0x3f0] sm:$0xff] %v6786_v9 }
 0x120   : > { %458 = vst [vmem:[%s6779_s13 + $0x410] sm:$0xff] %v6786_v9  ;;  %462 = vst [vmem:[%s6779_s13 + $0x430] sm:$0xff] %v6786_v9 }
 0x121   : > { %466 = vst [vmem:[%s6779_s13 + $0x450] sm:$0xff] %v6786_v9  ;;  %470 = vst [vmem:[%s6779_s13 + $0x470] sm:$0xff] %v6786_v9 }
 0x122   : > { %474 = vst [vmem:[%s6779_s13 + $0x490] sm:$0xff] %v6786_v9  ;;  %478 = vst [vmem:[%s6779_s13 + $0x4b0] sm:$0xff] %v6786_v9 }
 0x123   : > { %482 = vst [vmem:[%s6779_s13 + $0x4d0] sm:$0xff] %v6786_v9  ;;  %486 = vst [vmem:[%s6779_s13 + $0x4f0] sm:$0xff] %v6786_v9 }
 0x124   : > { %490 = vst [vmem:[%s6779_s13 + $0x510] sm:$0xff] %v6786_v9  ;;  %494 = vst [vmem:[%s6779_s13 + $0x530] sm:$0xff] %v6786_v9 }
 0x125   : > { %498 = vst [vmem:[%s6779_s13 + $0x550] sm:$0xff] %v6786_v9  ;;  %502 = vst [vmem:[%s6779_s13 + $0x570] sm:$0xff] %v6786_v9 }
 0x126   : > { %506 = vst [vmem:[%s6779_s13 + $0x590] sm:$0xff] %v6786_v9  ;;  %510 = vst [vmem:[%s6779_s13 + $0x5b0] sm:$0xff] %v6786_v9 }
 0x127   : > { %514 = vst [vmem:[%s6779_s13 + $0x5d0] sm:$0xff] %v6786_v9  ;;  %518 = vst [vmem:[%s6779_s13 + $0x5f0] sm:$0xff] %v6786_v9 }
 0x128   : > { %522 = vst [vmem:[%s6779_s13 + $0x610] sm:$0xff] %v6786_v9  ;;  %526 = vst [vmem:[%s6779_s13 + $0x630] sm:$0xff] %v6786_v9 }
 0x129   : > { %530 = vst [vmem:[%s6779_s13 + $0x650] sm:$0xff] %v6786_v9  ;;  %534 = vst [vmem:[%s6779_s13 + $0x670] sm:$0xff] %v6786_v9 }
 0x12a   : > { %538 = vst [vmem:[%s6779_s13 + $0x690] sm:$0xff] %v6786_v9  ;;  %542 = vst [vmem:[%s6779_s13 + $0x6b0] sm:$0xff] %v6786_v9 }
 0x12b   : > { %546 = vst [vmem:[%s6779_s13 + $0x6d0] sm:$0xff] %v6786_v9  ;;  %550 = vst [vmem:[%s6779_s13 + $0x6f0] sm:$0xff] %v6786_v9 }
 0x12c   : > { %554 = vst [vmem:[%s6779_s13 + $0x710] sm:$0xff] %v6786_v9  ;;  %558 = vst [vmem:[%s6779_s13 + $0x730] sm:$0xff] %v6786_v9 }
 0x12d   : > { %562 = vst [vmem:[%s6779_s13 + $0x750] sm:$0xff] %v6786_v9  ;;  %566 = vst [vmem:[%s6779_s13 + $0x770] sm:$0xff] %v6786_v9 }
 0x12e   : > { %570 = vst [vmem:[%s6779_s13 + $0x790] sm:$0xff] %v6786_v9  ;;  %574 = vst [vmem:[%s6779_s13 + $0x7b0] sm:$0xff] %v6786_v9 }
 0x12f   : > { %578 = vst [vmem:[%s6779_s13 + $0x7d0] sm:$0xff] %v6786_v9  ;;  %582 = vst [vmem:[%s6779_s13 + $0x7f0] sm:$0xff] %v6786_v9 }
 0x130   : > { %331 = vst [vmem:[%s6779_s13 + $0x18] sm:$0xff] %v6788_v10  ;;  %335 = vst [vmem:[%s6779_s13 + $0x38] sm:$0xff] %v6788_v10 }
 0x131   : > { %339 = vst [vmem:[%s6779_s13 + $0x58] sm:$0xff] %v6788_v10  ;;  %343 = vst [vmem:[%s6779_s13 + $0x78] sm:$0xff] %v6788_v10 }
 0x132   : > { %347 = vst [vmem:[%s6779_s13 + $0x98] sm:$0xff] %v6788_v10  ;;  %351 = vst [vmem:[%s6779_s13 + $0xb8] sm:$0xff] %v6788_v10 }
 0x133   : > { %355 = vst [vmem:[%s6779_s13 + $0xd8] sm:$0xff] %v6788_v10  ;;  %359 = vst [vmem:[%s6779_s13 + $0xf8] sm:$0xff] %v6788_v10 }
 0x134   : > { %363 = vst [vmem:[%s6779_s13 + $0x118] sm:$0xff] %v6788_v10  ;;  %367 = vst [vmem:[%s6779_s13 + $0x138] sm:$0xff] %v6788_v10 }
 0x135   : > { %371 = vst [vmem:[%s6779_s13 + $0x158] sm:$0xff] %v6788_v10  ;;  %375 = vst [vmem:[%s6779_s13 + $0x178] sm:$0xff] %v6788_v10 }
 0x136   : > { %379 = vst [vmem:[%s6779_s13 + $0x198] sm:$0xff] %v6788_v10  ;;  %383 = vst [vmem:[%s6779_s13 + $0x1b8] sm:$0xff] %v6788_v10 }
 0x137   : > { %387 = vst [vmem:[%s6779_s13 + $0x1d8] sm:$0xff] %v6788_v10  ;;  %391 = vst [vmem:[%s6779_s13 + $0x1f8] sm:$0xff] %v6788_v10 }
 0x138   : > { %395 = vst [vmem:[%s6779_s13 + $0x218] sm:$0xff] %v6788_v10  ;;  %399 = vst [vmem:[%s6779_s13 + $0x238] sm:$0xff] %v6788_v10 }
 0x139   : > { %403 = vst [vmem:[%s6779_s13 + $0x258] sm:$0xff] %v6788_v10  ;;  %407 = vst [vmem:[%s6779_s13 + $0x278] sm:$0xff] %v6788_v10 }
 0x13a   : > { %411 = vst [vmem:[%s6779_s13 + $0x298] sm:$0xff] %v6788_v10  ;;  %415 = vst [vmem:[%s6779_s13 + $0x2b8] sm:$0xff] %v6788_v10 }
 0x13b   : > { %419 = vst [vmem:[%s6779_s13 + $0x2d8] sm:$0xff] %v6788_v10  ;;  %423 = vst [vmem:[%s6779_s13 + $0x2f8] sm:$0xff] %v6788_v10 }
 0x13c   : > { %427 = vst [vmem:[%s6779_s13 + $0x318] sm:$0xff] %v6788_v10  ;;  %431 = vst [vmem:[%s6779_s13 + $0x338] sm:$0xff] %v6788_v10 }
 0x13d   : > { %435 = vst [vmem:[%s6779_s13 + $0x358] sm:$0xff] %v6788_v10  ;;  %439 = vst [vmem:[%s6779_s13 + $0x378] sm:$0xff] %v6788_v10 }
 0x13e   : > { %443 = vst [vmem:[%s6779_s13 + $0x398] sm:$0xff] %v6788_v10  ;;  %447 = vst [vmem:[%s6779_s13 + $0x3b8] sm:$0xff] %v6788_v10 }
 0x13f   : > { %451 = vst [vmem:[%s6779_s13 + $0x3d8] sm:$0xff] %v6788_v10  ;;  %455 = vst [vmem:[%s6779_s13 + $0x3f8] sm:$0xff] %v6788_v10 }
 0x140   : > { %459 = vst [vmem:[%s6779_s13 + $0x418] sm:$0xff] %v6788_v10  ;;  %463 = vst [vmem:[%s6779_s13 + $0x438] sm:$0xff] %v6788_v10 }
 0x141   : > { %467 = vst [vmem:[%s6779_s13 + $0x458] sm:$0xff] %v6788_v10  ;;  %471 = vst [vmem:[%s6779_s13 + $0x478] sm:$0xff] %v6788_v10 }
 0x142   : > { %475 = vst [vmem:[%s6779_s13 + $0x498] sm:$0xff] %v6788_v10  ;;  %479 = vst [vmem:[%s6779_s13 + $0x4b8] sm:$0xff] %v6788_v10 }
 0x143   : > { %483 = vst [vmem:[%s6779_s13 + $0x4d8] sm:$0xff] %v6788_v10  ;;  %487 = vst [vmem:[%s6779_s13 + $0x4f8] sm:$0xff] %v6788_v10 }
 0x144   : > { %491 = vst [vmem:[%s6779_s13 + $0x518] sm:$0xff] %v6788_v10  ;;  %495 = vst [vmem:[%s6779_s13 + $0x538] sm:$0xff] %v6788_v10 }
 0x145   : > { %499 = vst [vmem:[%s6779_s13 + $0x558] sm:$0xff] %v6788_v10  ;;  %503 = vst [vmem:[%s6779_s13 + $0x578] sm:$0xff] %v6788_v10 }
 0x146   : > { %507 = vst [vmem:[%s6779_s13 + $0x598] sm:$0xff] %v6788_v10  ;;  %511 = vst [vmem:[%s6779_s13 + $0x5b8] sm:$0xff] %v6788_v10 }
 0x147   : > { %515 = vst [vmem:[%s6779_s13 + $0x5d8] sm:$0xff] %v6788_v10  ;;  %519 = vst [vmem:[%s6779_s13 + $0x5f8] sm:$0xff] %v6788_v10 }
 0x148   : > { %523 = vst [vmem:[%s6779_s13 + $0x618] sm:$0xff] %v6788_v10  ;;  %527 = vst [vmem:[%s6779_s13 + $0x638] sm:$0xff] %v6788_v10 }
 0x149   : > { %531 = vst [vmem:[%s6779_s13 + $0x658] sm:$0xff] %v6788_v10  ;;  %535 = vst [vmem:[%s6779_s13 + $0x678] sm:$0xff] %v6788_v10 }
 0x14a   : > { %539 = vst [vmem:[%s6779_s13 + $0x698] sm:$0xff] %v6788_v10  ;;  %543 = vst [vmem:[%s6779_s13 + $0x6b8] sm:$0xff] %v6788_v10 }
 0x14b   : > { %547 = vst [vmem:[%s6779_s13 + $0x6d8] sm:$0xff] %v6788_v10  ;;  %551 = vst [vmem:[%s6779_s13 + $0x6f8] sm:$0xff] %v6788_v10 }
 0x14c   : > { %555 = vst [vmem:[%s6779_s13 + $0x718] sm:$0xff] %v6788_v10  ;;  %559 = vst [vmem:[%s6779_s13 + $0x738] sm:$0xff] %v6788_v10 }
 0x14d   : > { %563 = vst [vmem:[%s6779_s13 + $0x758] sm:$0xff] %v6788_v10  ;;  %567 = vst [vmem:[%s6779_s13 + $0x778] sm:$0xff] %v6788_v10 }
 0x14e   : > { %571 = vst [vmem:[%s6779_s13 + $0x798] sm:$0xff] %v6788_v10  ;;  %575 = vst [vmem:[%s6779_s13 + $0x7b8] sm:$0xff] %v6788_v10 }
 0x14f   : > { %579 = vst [vmem:[%s6779_s13 + $0x7d8] sm:$0xff] %v6788_v10  ;;  %583 = vst [vmem:[%s6779_s13 + $0x7f8] sm:$0xff] %v6788_v10 }
 0x150 PF: > { %v1225_v11 = vld [vmem:[%s6765_s25 + $0x8] sm:$0xff]  ;;  %v1227_v13 = vld [vmem:[%s6765_s25 + $0x18] sm:$0xff]  ;;  %v1224_v16 = vld [vmem:[%s6765_s25] sm:$0xff]  ;;  %s8765_s1 = sld [smem:[#allocation22_spill]]  ;;  %s8766_s21 = sld [smem:[#allocation23_spill]] }
 0x151   : > { %v1229_v12 = vld [vmem:[%s6765_s25 + $0x28] sm:$0xff]  ;;  %v1231_v15 = vld [vmem:[%s6765_s25 + $0x38] sm:$0xff]  ;;  %v1228_v17 = vld [vmem:[%s6765_s25 + $0x20] sm:$0xff]  ;;  %s4831_s26 = sshll.u32 %s6779_s13, 4  ;;  %s8594_s24 = scalar_lea.sflag [#allocation4], %s292_s15  ;;  %s8586_s26 = int_to_ptr.vmem [resolvable:$true] %s4831_s26 }
 0x152   : > { %v5000_v14 = vpack.c.bf16 %v1229_v12, %v1225_v11  ;;  %v5192_v18 = vpack.c.bf16 %v1231_v15, %v1227_v13  ;;  %v5002_v19 = vpack.c.bf16 %v1228_v17, %v1224_v16  ;;  %v1226_v20 = vld [vmem:[%s6765_s25 + $0x10] sm:$0xff]  ;;  %v1233_v22 = vld [vmem:[%s6765_s25 + $0x48] sm:$0xff]  ;;  %v1235_v25 = vld [vmem:[%s6765_s25 + $0x58] sm:$0xff]  ;;  %s6176_s27 = scalar_lea.vmem %s8586_s26, 32768  ;;  %p8770_p13 = scmp.ne.s32.totalorder %s8752_s5, 0 }
 0x153   : > { %v1230_v21 = vld [vmem:[%s6765_s25 + $0x30] sm:$0xff]  ;;  %v1237_v24 = vld [vmem:[%s6765_s25 + $0x68] sm:$0xff]  ;;  %v1239_v26 = vld [vmem:[%s6765_s25 + $0x78] sm:$0xff]  ;;  %p6177_p5 = scmp.ne.s32.totalorder %s8586_s26, %s6176_s27  ;;  %s6381_s0 = smov [#allocation8]  }
 0x154   : > { %5001 = vmatprep.subr.bf16.mxu0 %v5000_v14  ;;  %v5194_v23 = vpack.c.bf16 %v1230_v21, %v1226_v20  ;;  %5193 = vmatprep.subr.bf16.mxu1 %v5192_v18  ;;  %v5004_v27 = vpack.c.bf16 %v1237_v24, %v1233_v22  ;;  %v5196_v28 = vpack.c.bf16 %v1239_v26, %v1235_v25  ;;  %v1232_v29 = vld [vmem:[%s6765_s25 + $0x40] sm:$0xff]  ;;  %v1234_v31 = vld [vmem:[%s6765_s25 + $0x50] sm:$0xff]  ;;  %v1241_v34 = vld [vmem:[%s6765_s25 + $0x88] sm:$0xff]  ;;  %s6180_s6 = sshll.u32 %s6381_s0, 4  ;;  %s6181_s6 = int_to_ptr.vmem [resolvable:$false] %s6180_s6 }
 0x155   : > { %5003 = vmatpush1.bf16.msra.mxu0 %v5002_v19  ;;  %v1236_v30 = vld [vmem:[%s6765_s25 + $0x60] sm:$0xff]  ;;  %v1238_v33 = vld [vmem:[%s6765_s25 + $0x70] sm:$0xff]  ;;  %v1245_v35 = vld [vmem:[%s6765_s25 + $0xa8] sm:$0xff]  ;;  %p6178_p0 = pnand %p6177_p5, %p8770_p13  ;;  %s6182_s16 = scalar_lea.vmem %s6181_s6, 65536 }
 0x156   : > { %5195 = vmatpush1.bf16.msra.mxu1 %v5194_v23  ;;  %v5006_v32 = vpack.c.bf16 %v1236_v30, %v1232_v29  ;;  %5005 = vmatprep.subr.bf16.mxu0 %v5004_v27  ;;  %v5198_v36 = vpack.c.bf16 %v1238_v33, %v1234_v31  ;;  %v5008_v37 = vpack.c.bf16 %v1245_v35, %v1241_v34  ;;  %v1243_v38 = vld [vmem:[%s6765_s25 + $0x98] sm:$0xff]  ;;  %v1240_v40 = vld [vmem:[%s6765_s25 + $0x80] sm:$0xff]  ;;  %v1242_v43 = vld [vmem:[%s6765_s25 + $0x90] sm:$0xff]  ;;  %s4992_s19 = sshll.u32 %s8765_s1, 2  ;;  %s4999_s17 = sshll.u32 %s8766_s21, 9 }
 0x157   : > { %5197 = vmatprep.subr.bf16.mxu1 %v5196_v28  ;;  %v1247_v39 = vld [vmem:[%s6765_s25 + $0xb8] sm:$0xff]  ;;  %v1244_v42 = vld [vmem:[%s6765_s25 + $0xa0] sm:$0xff]  ;;  %v1246_v44 = vld [vmem:[%s6765_s25 + $0xb0] sm:$0xff]  ;;  %p6179_p10 = pneg %p6178_p0  ;;  %p6183_p3 = scmp.lt.s32.totalorder %s8586_s26, %s6181_s6 }
 0x158   : > { %v5200_v41 = vpack.c.bf16 %v1247_v39, %v1243_v38  ;;  %v5010_v45 = vpack.c.bf16 %v1244_v42, %v1240_v40  ;;  %v1249_v46 = vld [vmem:[%s6765_s25 + $0xc8] sm:$0xff]  ;;  %v1251_v48 = vld [vmem:[%s6765_s25 + $0xd8] sm:$0xff]  ;;  %v5202_v49 = vpack.c.bf16 %v1246_v44, %v1242_v43  ;;  %v1248_v52 = vld [vmem:[%s6765_s25 + $0xc0] sm:$0xff]  ;;  %p6184_p11 = scmp.lt.s32.totalorder %s6182_s16, %s6176_s27 }
 0x159   : > { %5007 = vmatpush1.bf16.msra.mxu0 %v5006_v32  ;;  %v1253_v47 = vld [vmem:[%s6765_s25 + $0xe8] sm:$0xff]  ;;  %v1255_v51 = vld [vmem:[%s6765_s25 + $0xf8] sm:$0xff]  ;;  %v1252_v53 = vld [vmem:[%s6765_s25 + $0xe0] sm:$0xff] }
 0x15a   : > { %5199 = vmatpush1.bf16.msra.mxu1 %v5198_v36  ;;  %5009 = vmatprep.subr.bf16.mxu0 %v5008_v37  ;;  %v5012_v50 = vpack.c.bf16 %v1253_v47, %v1249_v46  ;;  %v5204_v54 = vpack.c.bf16 %v1255_v51, %v1251_v48  ;;  %v1250_v55 = vld [vmem:[%s6765_s25 + $0xd0] sm:$0xff]  ;;  %v1257_v57 = vld [vmem:[%s6765_s25 + $0x108] sm:$0xff]  ;;  %v1259_v59 = vld [vmem:[%s6765_s25 + $0x118] sm:$0xff]  ;;  %v5014_v61 = vpack.c.bf16 %v1252_v53, %v1248_v52  ;;  %p6185_p1 = por %p6184_p11, %p6183_p3 }
 0x15b   : > { %5201 = vmatprep.subr.bf16.mxu1 %v5200_v41  ;;  %v1254_v56 = vld [vmem:[%s6765_s25 + $0xf0] sm:$0xff]  ;;  %v1261_v58 = vld [vmem:[%s6765_s25 + $0x128] sm:$0xff]  ;;  %v1263_v60 = vld [vmem:[%s6765_s25 + $0x138] sm:$0xff] }
 0x15c   : > { %v5206_v62 = vpack.c.bf16 %v1254_v56, %v1250_v55  ;;  %v5016_v63 = vpack.c.bf16 %v1261_v58, %v1257_v57  ;;  %v1256_v0 = vld [vmem:[%s6765_s25 + $0x100] sm:$0xff]  ;;  %v1258_v2 = vld [vmem:[%s6765_s25 + $0x110] sm:$0xff]  ;;  %v5208_v3 = vpack.c.bf16 %v1263_v60, %v1259_v59  ;;  %v1265_v5 = vld [vmem:[%s6765_s25 + $0x148] sm:$0xff]  ;;  %p6186_p12 = pnand %p6185_p1, %p6179_p10 }
 0x15d   : > { %5011 = vmatpush1.bf16.msra.mxu0 %v5010_v45  ;;  %v1260_v1 = vld [vmem:[%s6765_s25 + $0x120] sm:$0xff]  ;;  %v1262_v4 = vld [vmem:[%s6765_s25 + $0x130] sm:$0xff]  ;;  %v1269_v6 = vld [vmem:[%s6765_s25 + $0x168] sm:$0xff] }
 0x15e   : > { %5203 = vmatpush1.bf16.msra.mxu1 %v5202_v49  ;;  %5013 = vmatprep.subr.bf16.mxu0 %v5012_v50  ;;  %v1267_v7 = vld [vmem:[%s6765_s25 + $0x158] sm:$0xff]  ;;  %v5018_v9 = vpack.c.bf16 %v1260_v1, %v1256_v0  ;;  %v5210_v10 = vpack.c.bf16 %v1262_v4, %v1258_v2  ;;  %v5020_v11 = vpack.c.bf16 %v1269_v6, %v1265_v5  ;;  %v1264_v12 = vld [vmem:[%s6765_s25 + $0x140] sm:$0xff]  ;;  %v1266_v14 = vld [vmem:[%s6765_s25 + $0x150] sm:$0xff] }
 0x15f   : > { %5205 = vmatprep.subr.bf16.mxu1 %v5204_v54  ;;  %v1271_v8 = vld [vmem:[%s6765_s25 + $0x178] sm:$0xff]  ;;  %v1268_v13 = vld [vmem:[%s6765_s25 + $0x160] sm:$0xff]  ;;  %v1270_v16 = vld [vmem:[%s6765_s25 + $0x170] sm:$0xff] }
 0x160   : > { %v5212_v15 = vpack.c.bf16 %v1271_v8, %v1267_v7  ;;  %v1273_v17 = vld [vmem:[%s6765_s25 + $0x188] sm:$0xff]  ;;  %v1275_v19 = vld [vmem:[%s6765_s25 + $0x198] sm:$0xff]  ;;  %v5022_v21 = vpack.c.bf16 %v1268_v13, %v1264_v12  ;;  %v5214_v22 = vpack.c.bf16 %v1270_v16, %v1266_v14  ;;  %v1272_v24 = vld [vmem:[%s6765_s25 + $0x180] sm:$0xff] }
 0x161   : > { %5015 = vmatpush1.bf16.msra.mxu0 %v5014_v61  ;;  %v1277_v18 = vld [vmem:[%s6765_s25 + $0x1a8] sm:$0xff]  ;;  %v1279_v20 = vld [vmem:[%s6765_s25 + $0x1b8] sm:$0xff]  ;;  %v1276_v25 = vld [vmem:[%s6765_s25 + $0x1a0] sm:$0xff] }
 0x162   : > { %5207 = vmatpush1.bf16.msra.mxu1 %v5206_v62  ;;  %5017 = vmatprep.subr.bf16.mxu0 %v5016_v63  ;;  %v5024_v23 = vpack.c.bf16 %v1277_v18, %v1273_v17  ;;  %v1274_v26 = vld [vmem:[%s6765_s25 + $0x190] sm:$0xff]  ;;  %v5216_v27 = vpack.c.bf16 %v1279_v20, %v1275_v19  ;;  %v1281_v29 = vld [vmem:[%s6765_s25 + $0x1c8] sm:$0xff]  ;;  %v1283_v31 = vld [vmem:[%s6765_s25 + $0x1d8] sm:$0xff]  ;;  %v5026_v33 = vpack.c.bf16 %v1276_v25, %v1272_v24 }
 0x163   : > { %5209 = vmatprep.subr.bf16.mxu1 %v5208_v3  ;;  %v1278_v28 = vld [vmem:[%s6765_s25 + $0x1b0] sm:$0xff]  ;;  %v1285_v30 = vld [vmem:[%s6765_s25 + $0x1e8] sm:$0xff]  ;;  %v1287_v32 = vld [vmem:[%s6765_s25 + $0x1f8] sm:$0xff] }
 0x164   : > { %v5218_v34 = vpack.c.bf16 %v1278_v28, %v1274_v26  ;;  %v5028_v35 = vpack.c.bf16 %v1285_v30, %v1281_v29  ;;  %v1280_v36 = vld [vmem:[%s6765_s25 + $0x1c0] sm:$0xff]  ;;  %v1282_v38 = vld [vmem:[%s6765_s25 + $0x1d0] sm:$0xff]  ;;  %v5220_v39 = vpack.c.bf16 %v1287_v32, %v1283_v31  ;;  %v1289_v41 = vld [vmem:[%s6765_s25 + $0x208] sm:$0xff] }
 0x165   : > { %5019 = vmatpush1.bf16.msra.mxu0 %v5018_v9  ;;  %v1284_v37 = vld [vmem:[%s6765_s25 + $0x1e0] sm:$0xff]  ;;  %v1286_v40 = vld [vmem:[%s6765_s25 + $0x1f0] sm:$0xff]  ;;  %v1293_v42 = vld [vmem:[%s6765_s25 + $0x228] sm:$0xff] }
 0x166   : > { %5211 = vmatpush1.bf16.msra.mxu1 %v5210_v10  ;;  %5021 = vmatprep.subr.bf16.mxu0 %v5020_v11  ;;  %v1291_v43 = vld [vmem:[%s6765_s25 + $0x218] sm:$0xff]  ;;  %v5030_v45 = vpack.c.bf16 %v1284_v37, %v1280_v36  ;;  %v5222_v46 = vpack.c.bf16 %v1286_v40, %v1282_v38  ;;  %v5032_v47 = vpack.c.bf16 %v1293_v42, %v1289_v41  ;;  %v1288_v48 = vld [vmem:[%s6765_s25 + $0x200] sm:$0xff]  ;;  %v1290_v50 = vld [vmem:[%s6765_s25 + $0x210] sm:$0xff] }
 0x167   : > { %5213 = vmatprep.subr.bf16.mxu1 %v5212_v15  ;;  %v1295_v44 = vld [vmem:[%s6765_s25 + $0x238] sm:$0xff]  ;;  %v1292_v49 = vld [vmem:[%s6765_s25 + $0x220] sm:$0xff]  ;;  %v1294_v52 = vld [vmem:[%s6765_s25 + $0x230] sm:$0xff] }
 0x168   : > { %v5224_v51 = vpack.c.bf16 %v1295_v44, %v1291_v43  ;;  %v1297_v53 = vld [vmem:[%s6765_s25 + $0x248] sm:$0xff]  ;;  %v1299_v55 = vld [vmem:[%s6765_s25 + $0x258] sm:$0xff]  ;;  %v5034_v57 = vpack.c.bf16 %v1292_v49, %v1288_v48  ;;  %v5226_v58 = vpack.c.bf16 %v1294_v52, %v1290_v50  ;;  %v1296_v60 = vld [vmem:[%s6765_s25 + $0x240] sm:$0xff] }
 0x169   : > { %5023 = vmatpush1.bf16.msra.mxu0 %v5022_v21  ;;  %v1301_v54 = vld [vmem:[%s6765_s25 + $0x268] sm:$0xff]  ;;  %v1303_v56 = vld [vmem:[%s6765_s25 + $0x278] sm:$0xff]  ;;  %v1300_v61 = vld [vmem:[%s6765_s25 + $0x260] sm:$0xff] }
 0x16a   : > { %5215 = vmatpush1.bf16.msra.mxu1 %v5214_v22  ;;  %5025 = vmatprep.subr.bf16.mxu0 %v5024_v23  ;;  %v5036_v59 = vpack.c.bf16 %v1301_v54, %v1297_v53  ;;  %v1298_v62 = vld [vmem:[%s6765_s25 + $0x250] sm:$0xff]  ;;  %v5228_v63 = vpack.c.bf16 %v1303_v56, %v1299_v55  ;;  %v1305_v1 = vld [vmem:[%s6765_s25 + $0x288] sm:$0xff]  ;;  %v1307_v3 = vld [vmem:[%s6765_s25 + $0x298] sm:$0xff]  ;;  %v5038_v5 = vpack.c.bf16 %v1300_v61, %v1296_v60 }
 0x16b   : > { %5217 = vmatprep.subr.bf16.mxu1 %v5216_v27  ;;  %v1302_v0 = vld [vmem:[%s6765_s25 + $0x270] sm:$0xff]  ;;  %v1309_v2 = vld [vmem:[%s6765_s25 + $0x2a8] sm:$0xff]  ;;  %v1311_v4 = vld [vmem:[%s6765_s25 + $0x2b8] sm:$0xff] }
 0x16c   : > { %v5230_v6 = vpack.c.bf16 %v1302_v0, %v1298_v62  ;;  %v5040_v7 = vpack.c.bf16 %v1309_v2, %v1305_v1  ;;  %v1304_v8 = vld [vmem:[%s6765_s25 + $0x280] sm:$0xff]  ;;  %v1306_v10 = vld [vmem:[%s6765_s25 + $0x290] sm:$0xff]  ;;  %v5232_v11 = vpack.c.bf16 %v1311_v4, %v1307_v3  ;;  %v1313_v13 = vld [vmem:[%s6765_s25 + $0x2c8] sm:$0xff] }
 0x16d   : > { %5027 = vmatpush1.bf16.msra.mxu0 %v5026_v33  ;;  %v1308_v9 = vld [vmem:[%s6765_s25 + $0x2a0] sm:$0xff]  ;;  %v1310_v12 = vld [vmem:[%s6765_s25 + $0x2b0] sm:$0xff]  ;;  %v1317_v14 = vld [vmem:[%s6765_s25 + $0x2e8] sm:$0xff] }
 0x16e   : > { %5219 = vmatpush1.bf16.msra.mxu1 %v5218_v34  ;;  %5029 = vmatprep.subr.bf16.mxu0 %v5028_v35  ;;  %v1315_v15 = vld [vmem:[%s6765_s25 + $0x2d8] sm:$0xff]  ;;  %v5042_v17 = vpack.c.bf16 %v1308_v9, %v1304_v8  ;;  %v1312_v18 = vld [vmem:[%s6765_s25 + $0x2c0] sm:$0xff]  ;;  %v5234_v19 = vpack.c.bf16 %v1310_v12, %v1306_v10  ;;  %v5044_v20 = vpack.c.bf16 %v1317_v14, %v1313_v13  ;;  %v1314_v22 = vld [vmem:[%s6765_s25 + $0x2d0] sm:$0xff] }
 0x16f   : > { %5221 = vmatprep.subr.bf16.mxu1 %v5220_v39  ;;  %v1319_v16 = vld [vmem:[%s6765_s25 + $0x2f8] sm:$0xff]  ;;  %v1316_v21 = vld [vmem:[%s6765_s25 + $0x2e0] sm:$0xff]  ;;  %v1318_v23 = vld [vmem:[%s6765_s25 + $0x2f0] sm:$0xff] }
 0x170   : > { %v5236_v24 = vpack.c.bf16 %v1319_v16, %v1315_v15  ;;  %v1321_v25 = vld [vmem:[%s6765_s25 + $0x308] sm:$0xff]  ;;  %v1323_v28 = vld [vmem:[%s6765_s25 + $0x318] sm:$0xff]  ;;  %v5046_v30 = vpack.c.bf16 %v1316_v21, %v1312_v18  ;;  %v5238_v31 = vpack.c.bf16 %v1318_v23, %v1314_v22  ;;  %v1320_v33 = vld [vmem:[%s6765_s25 + $0x300] sm:$0xff] }
 0x171   : > { %5031 = vmatpush1.bf16.msra.mxu0 %v5030_v45  ;;  %v1325_v26 = vld [vmem:[%s6765_s25 + $0x328] sm:$0xff]  ;;  %v1327_v29 = vld [vmem:[%s6765_s25 + $0x338] sm:$0xff]  ;;  %v1324_v34 = vld [vmem:[%s6765_s25 + $0x320] sm:$0xff] }
 0x172   : > { %5223 = vmatpush1.bf16.msra.mxu1 %v5222_v46  ;;  %5033 = vmatprep.subr.bf16.mxu0 %v5032_v47  ;;  %v841_v27 = vld [vmem:[%s6757_s10 + $0x8] sm:$0xff]  ;;  %v5048_v32 = vpack.c.bf16 %v1325_v26, %v1321_v25  ;;  %v1322_v35 = vld [vmem:[%s6765_s25 + $0x310] sm:$0xff]  ;;  %v5240_v36 = vpack.c.bf16 %v1327_v29, %v1323_v28  ;;  %v1331_v40 = vld [vmem:[%s6765_s25 + $0x358] sm:$0xff]  ;;  %v5050_v42 = vpack.c.bf16 %v1324_v34, %v1320_v33 }
 0x173   : > { %5225 = vmatprep.subr.bf16.mxu1 %v5224_v51  ;;  %1672 = vmatprep.mubr.f32.mxu0 %v841_v27  ;;  %v1326_v37 = vld [vmem:[%s6765_s25 + $0x330] sm:$0xff]  ;;  %v1329_v38 = vld [vmem:[%s6765_s25 + $0x348] sm:$0xff]  ;;  %v1335_v41 = vld [vmem:[%s6765_s25 + $0x378] sm:$0xff] }
 0x174   : > { %3019 = vmatprep.mubr.f32.mxu1 %v841_v27  ;;  %v1333_v39 = vld [vmem:[%s6765_s25 + $0x368] sm:$0xff]  ;;  %v5242_v43 = vpack.c.bf16 %v1326_v37, %v1322_v35  ;;  %v1328_v45 = vld [vmem:[%s6765_s25 + $0x340] sm:$0xff]  ;;  %v1330_v47 = vld [vmem:[%s6765_s25 + $0x350] sm:$0xff]  ;;  %v5244_v48 = vpack.c.bf16 %v1335_v41, %v1331_v40 }
 0x175   : > { %5035 = vmatpush1.bf16.msra.mxu0 %v5034_v57  ;;  %v5052_v44 = vpack.c.bf16 %v1333_v39, %v1329_v38  ;;  %v1332_v46 = vld [vmem:[%s6765_s25 + $0x360] sm:$0xff]  ;;  %v1334_v49 = vld [vmem:[%s6765_s25 + $0x370] sm:$0xff]  ;;  %v1337_v50 = vld [vmem:[%s6765_s25 + $0x388] sm:$0xff] }
 0x176   : > { %5227 = vmatpush1.bf16.msra.mxu1 %v5226_v58  ;;  %5037 = vmatprep.subr.bf16.mxu0 %v5036_v59  ;;  %v1341_v51 = vld [vmem:[%s6765_s25 + $0x3a8] sm:$0xff]  ;;  %v1339_v52 = vld [vmem:[%s6765_s25 + $0x398] sm:$0xff]  ;;  %v5054_v54 = vpack.c.bf16 %v1332_v46, %v1328_v45  ;;  %v5246_v55 = vpack.c.bf16 %v1334_v49, %v1330_v47  ;;  %v1336_v57 = vld [vmem:[%s6765_s25 + $0x380] sm:$0xff] }
 0x177   : > { %5229 = vmatprep.subr.bf16.mxu1 %v5228_v63  ;;  %v1343_v53 = vld [vmem:[%s6765_s25 + $0x3b8] sm:$0xff]  ;;  %v5056_v56 = vpack.c.bf16 %v1341_v51, %v1337_v50  ;;  %v1340_v58 = vld [vmem:[%s6765_s25 + $0x3a0] sm:$0xff]  ;;  %v1338_v59 = vld [vmem:[%s6765_s25 + $0x390] sm:$0xff] }
 0x178   : > { %v5248_v60 = vpack.c.bf16 %v1343_v53, %v1339_v52  ;;  %v1342_v61 = vld [vmem:[%s6765_s25 + $0x3b0] sm:$0xff]  ;;  %v1345_v62 = vld [vmem:[%s6765_s25 + $0x3c8] sm:$0xff]  ;;  %v1347_v0 = vld [vmem:[%s6765_s25 + $0x3d8] sm:$0xff]  ;;  %v5058_v2 = vpack.c.bf16 %v1340_v58, %v1336_v57 }
 0x179   : > { %5039 = vmatpush1.bf16.msra.mxu0 %v5038_v5  ;;  %v1349_v63 = vld [vmem:[%s6765_s25 + $0x3e8] sm:$0xff]  ;;  %v1351_v1 = vld [vmem:[%s6765_s25 + $0x3f8] sm:$0xff]  ;;  %v5250_v3 = vpack.c.bf16 %v1342_v61, %v1338_v59  ;;  %v1344_v5 = vld [vmem:[%s6765_s25 + $0x3c0] sm:$0xff] }
 0x17a   : > { %5231 = vmatpush1.bf16.msra.mxu1 %v5230_v6  ;;  %5041 = vmatprep.subr.bf16.mxu0 %v5040_v7  ;;  %v5060_v4 = vpack.c.bf16 %v1349_v63, %v1345_v62  ;;  %v1348_v6 = vld [vmem:[%s6765_s25 + $0x3e0] sm:$0xff]  ;;  %v1346_v7 = vld [vmem:[%s6765_s25 + $0x3d0] sm:$0xff]  ;;  %v5252_v8 = vpack.c.bf16 %v1351_v1, %v1347_v0  ;;  %v1353_v10 = vld [vmem:[%s6765_s25 + $0x408] sm:$0xff] }
 0x17b   : > { %5233 = vmatprep.subr.bf16.mxu1 %v5232_v11  ;;  %v1350_v9 = vld [vmem:[%s6765_s25 + $0x3f0] sm:$0xff]  ;;  %v1357_v11 = vld [vmem:[%s6765_s25 + $0x428] sm:$0xff]  ;;  %v1355_v12 = vld [vmem:[%s6765_s25 + $0x418] sm:$0xff]  ;;  %v5062_v14 = vpack.c.bf16 %v1348_v6, %v1344_v5 }
 0x17c   : > { %v1359_v13 = vld [vmem:[%s6765_s25 + $0x438] sm:$0xff]  ;;  %v5254_v15 = vpack.c.bf16 %v1350_v9, %v1346_v7  ;;  %v5064_v16 = vpack.c.bf16 %v1357_v11, %v1353_v10  ;;  %v1356_v18 = vld [vmem:[%s6765_s25 + $0x420] sm:$0xff]  ;;  %v1358_v21 = vld [vmem:[%s6765_s25 + $0x430] sm:$0xff] }
 0x17d   : > { %5043 = vmatpush1.bf16.msra.mxu0 %v5042_v17  ;;  %v1352_v17 = vld [vmem:[%s6765_s25 + $0x400] sm:$0xff]  ;;  %v1361_v22 = vld [vmem:[%s6765_s25 + $0x448] sm:$0xff]  ;;  %v1363_v26 = vld [vmem:[%s6765_s25 + $0x458] sm:$0xff] }
 0x17e   : > { %5235 = vmatpush1.bf16.msra.mxu1 %v5234_v19  ;;  %5045 = vmatprep.subr.bf16.mxu0 %v5044_v20  ;;  %v5256_v19 = vpack.c.bf16 %v1359_v13, %v1355_v12  ;;  %v1354_v20 = vld [vmem:[%s6765_s25 + $0x410] sm:$0xff]  ;;  %v1365_v23 = vld [vmem:[%s6765_s25 + $0x468] sm:$0xff]  ;;  %v5066_v25 = vpack.c.bf16 %v1356_v18, %v1352_v17  ;;  %v1367_v27 = vld [vmem:[%s6765_s25 + $0x478] sm:$0xff] }
 0x17f   : > { %5237 = vmatprep.subr.bf16.mxu1 %v5236_v24  ;;  %v840_v24 = vld [vmem:[%s6757_s10] sm:$0xff]  ;;  %v5258_v28 = vpack.c.bf16 %v1358_v21, %v1354_v20  ;;  %v847_v29 = vld [vmem:[%s6757_s10 + $0x38] sm:$0xff]  ;;  %v1362_v33 = vld [vmem:[%s6765_s25 + $0x450] sm:$0xff]  ;;  %v5260_v34 = vpack.c.bf16 %v1367_v27, %v1363_v26 }
 0x180   : > { %v1366_v35 = vld [vmem:[%s6765_s25 + $0x470] sm:$0xff]  ;;  %v1373_v37 = vld [vmem:[%s6765_s25 + $0x4a8] sm:$0xff]  ;;  %v1371_v39 = vld [vmem:[%s6765_s25 + $0x498] sm:$0xff] }
 0x181   : > { %5047 = vmatpush1.bf16.msra.mxu0 %v5046_v30  ;;  %v5068_v30 = vpack.c.bf16 %v1365_v23, %v1361_v22  ;;  %v846_v38 = vld [vmem:[%s6757_s10 + $0x30] sm:$0xff]  ;;  %v1375_v40 = vld [vmem:[%s6765_s25 + $0x4b8] sm:$0xff]  ;;  %v853_v41 = vld [vmem:[%s6757_s10 + $0x68] sm:$0xff] }
 0x182   : > { %5239 = vmatpush1.bf16.msra.mxu1 %v5238_v31  ;;  %5049 = vmatprep.subr.bf16.mxu0 %v5048_v32  ;;  %v1360_v31 = vld [vmem:[%s6765_s25 + $0x440] sm:$0xff]  ;;  %v1370_v47 = vld [vmem:[%s6765_s25 + $0x490] sm:$0xff]  ;;  %v1377_v50 = vld [vmem:[%s6765_s25 + $0x4c8] sm:$0xff] }
 0x183   : > { %5241 = vmatprep.subr.bf16.mxu1 %v5240_v36  ;;  %v1364_v32 = vld [vmem:[%s6765_s25 + $0x460] sm:$0xff]  ;;  %v1369_v36 = vld [vmem:[%s6765_s25 + $0x488] sm:$0xff]  ;;  %v1374_v49 = vld [vmem:[%s6765_s25 + $0x4b0] sm:$0xff] }
 0x184   : > { %v1368_v45 = vld [vmem:[%s6765_s25 + $0x480] sm:$0xff]  ;;  %v1381_v51 = vld [vmem:[%s6765_s25 + $0x4e8] sm:$0xff]  ;;  %v1379_v53 = vld [vmem:[%s6765_s25 + $0x4d8] sm:$0xff]  ;;  %v5266_v57 = vpack.c.bf16 %v1374_v49, %v1370_v47 }
 0x185   : > { %5051 = vmatpush1.bf16.msra.mxu0 %v5050_v42  ;;  %v5070_v42 = vpack.c.bf16 %v1364_v32, %v1360_v31  ;;  %v1372_v46 = vld [vmem:[%s6765_s25 + $0x4a0] sm:$0xff]  ;;  %v5076_v58 = vpack.c.bf16 %v1381_v51, %v1377_v50  ;;  %v1378_v61 = vld [vmem:[%s6765_s25 + $0x4d0] sm:$0xff]  ;;  %v1385_v0 = vld [vmem:[%s6765_s25 + $0x508] sm:$0xff] }
 0x186   : > { %5243 = vmatpush1.bf16.msra.mxu1 %v5242_v43  ;;  %5053 = vmatprep.subr.bf16.mxu0 %v5052_v44  ;;  %v5262_v43 = vpack.c.bf16 %v1366_v35, %v1362_v33  ;;  %v5072_v44 = vpack.c.bf16 %v1373_v37, %v1369_v36  ;;  %v852_v52 = vld [vmem:[%s6757_s10 + $0x60] sm:$0xff]  ;;  %v1382_v63 = vld [vmem:[%s6765_s25 + $0x4f0] sm:$0xff]  ;;  %v1389_v1 = vld [vmem:[%s6765_s25 + $0x528] sm:$0xff] }
 0x187   : > { %5245 = vmatprep.subr.bf16.mxu1 %v5244_v48  ;;  %v5264_v48 = vpack.c.bf16 %v1375_v40, %v1371_v39  ;;  %v1376_v59 = vld [vmem:[%s6765_s25 + $0x4c0] sm:$0xff]  ;;  %v865_v5 = vld [vmem:[%s6757_s10 + $0xc8] sm:$0xff]  ;;  %v5270_v7 = vpack.c.bf16 %v1382_v63, %v1378_v61  ;;  %v1386_v11 = vld [vmem:[%s6765_s25 + $0x510] sm:$0xff] }
 0x188   : > { %v1384_v9 = vld [vmem:[%s6765_s25 + $0x500] sm:$0xff]  ;;  %v1390_v13 = vld [vmem:[%s6765_s25 + $0x530] sm:$0xff]  ;;  %v1395_v17 = vld [vmem:[%s6765_s25 + $0x558] sm:$0xff] }
 0x189   : > { %5055 = vmatpush1.bf16.msra.mxu0 %v5054_v54  ;;  %v1383_v54 = vld [vmem:[%s6765_s25 + $0x4f8] sm:$0xff]  ;;  %v1388_v10 = vld [vmem:[%s6765_s25 + $0x520] sm:$0xff]  ;;  %v5274_v21 = vpack.c.bf16 %v1390_v13, %v1386_v11  ;;  %v1398_v27 = vld [vmem:[%s6765_s25 + $0x570] sm:$0xff] }
 0x18a   : > { %5247 = vmatpush1.bf16.msra.mxu1 %v5246_v55  ;;  %5057 = vmatprep.subr.bf16.mxu0 %v5056_v56  ;;  %v859_v55 = vld [vmem:[%s6757_s10 + $0x98] sm:$0xff]  ;;  %v5074_v56 = vpack.c.bf16 %v1372_v46, %v1368_v45  ;;  %v5268_v62 = vpack.c.bf16 %v1383_v54, %v1379_v53  ;;  %v5082_v20 = vpack.c.bf16 %v1388_v10, %v1384_v9  ;;  %v1392_v23 = vld [vmem:[%s6765_s25 + $0x540] sm:$0xff]  ;;  %v877_v33 = vld [vmem:[%s6757_s10 + $0x128] sm:$0xff] }
 0x18b   : > { %5249 = vmatprep.subr.bf16.mxu1 %v5248_v60  ;;  %v1380_v60 = vld [vmem:[%s6765_s25 + $0x4e0] sm:$0xff]  ;;  %v1399_v18 = vld [vmem:[%s6765_s25 + $0x578] sm:$0xff]  ;;  %v1402_v39 = vld [vmem:[%s6765_s25 + $0x590] sm:$0xff] }
 0x18c   : > { %v5078_v6 = vpack.c.bf16 %v1380_v60, %v1376_v59  ;;  %v5276_v26 = vpack.c.bf16 %v1399_v18, %v1395_v17  ;;  %v1403_v31 = vld [vmem:[%s6765_s25 + $0x598] sm:$0xff]  ;;  %v1400_v37 = vld [vmem:[%s6765_s25 + $0x580] sm:$0xff]  ;;  %v1410_v53 = vld [vmem:[%s6765_s25 + $0x5d0] sm:$0xff] }
 0x18d   : > { %5059 = vmatpush1.bf16.msra.mxu0 %v5058_v2  ;;  %v858_v2 = vld [vmem:[%s6757_s10 + $0x90] sm:$0xff]  ;;  %v1407_v32 = vld [vmem:[%s6765_s25 + $0x5b8] sm:$0xff]  ;;  %v1408_v51 = vld [vmem:[%s6765_s25 + $0x5c0] sm:$0xff] }
 0x18e   : > { %5251 = vmatpush1.bf16.msra.mxu1 %v5250_v3  ;;  %5061 = vmatprep.subr.bf16.mxu0 %v5060_v4  ;;  %v1387_v3 = vld [vmem:[%s6765_s25 + $0x518] sm:$0xff]  ;;  %v5280_v40 = vpack.c.bf16 %v1407_v32, %v1403_v31  ;;  %v889_v61 = vld [vmem:[%s6757_s10 + $0x188] sm:$0xff]  ;;  %v1426_v17 = vld [vmem:[%s6765_s25 + $0x650] sm:$0xff] }
 0x18f   : > { %5253 = vmatprep.subr.bf16.mxu1 %v5252_v8  ;;  %v1391_v4 = vld [vmem:[%s6765_s25 + $0x538] sm:$0xff]  ;;  %v5080_v8 = vpack.c.bf16 %v1389_v1, %v1385_v0  ;;  %v1416_v1 = vld [vmem:[%s6765_s25 + $0x600] sm:$0xff]  ;;  %v1434_v32 = vld [vmem:[%s6765_s25 + $0x690] sm:$0xff] }
 0x190   : > { %v5272_v12 = vpack.c.bf16 %v1391_v4, %v1387_v3  ;;  %v1411_v45 = vld [vmem:[%s6765_s25 + $0x5d8] sm:$0xff]  ;;  %v1418_v3 = vld [vmem:[%s6765_s25 + $0x610] sm:$0xff] }
 0x191   : > { %5063 = vmatpush1.bf16.msra.mxu0 %v5062_v14  ;;  %v1393_v14 = vld [vmem:[%s6765_s25 + $0x548] sm:$0xff]  ;;  %v1415_v46 = vld [vmem:[%s6765_s25 + $0x5f8] sm:$0xff] }
 0x192   : > { %5255 = vmatpush1.bf16.msra.mxu1 %v5254_v15  ;;  %5065 = vmatprep.subr.bf16.mxu0 %v5064_v16  ;;  %v1397_v15 = vld [vmem:[%s6765_s25 + $0x568] sm:$0xff]  ;;  %v864_v16 = vld [vmem:[%s6757_s10 + $0xc0] sm:$0xff]  ;;  %v883_v47 = vld [vmem:[%s6757_s10 + $0x158] sm:$0xff]  ;;  %v5284_v54 = vpack.c.bf16 %v1415_v46, %v1411_v45 }
 0x193   : > { %5257 = vmatprep.subr.bf16.mxu1 %v5256_v19  ;;  %v871_v19 = vld [vmem:[%s6757_s10 + $0xf8] sm:$0xff]  ;;  %v5084_v22 = vpack.c.bf16 %v1397_v15, %v1393_v14  ;;  %v1424_v15 = vld [vmem:[%s6765_s25 + $0x640] sm:$0xff]  ;;  %v1445_v45 = vld [vmem:[%s6765_s25 + $0x6e8] sm:$0xff] }
 0x194   : > { %1673 = vmatmul.mubr.f32.vlgmr.msra.gmra.mrb[0].mxu0 %v840_v24  ;;  %v1419_v59 = vld [vmem:[%s6765_s25 + $0x618] sm:$0xff] }
 0x195   : > { %3020 = vmatmul.mubr.f32.vlgmr.msra.gmra.mrb[0].mxu1 %v840_v24  ;;  %5067 = vmatpush1.bf16.msra.mxu0 %v5066_v25  ;;  %v1396_v24 = vld [vmem:[%s6765_s25 + $0x560] sm:$0xff]  ;;  %v1394_v25 = vld [vmem:[%s6765_s25 + $0x550] sm:$0xff]  ;;  %v1423_v60 = vld [vmem:[%s6765_s25 + $0x638] sm:$0xff] }
 0x196   : > { %5259 = vmatpush1.bf16.msra.mxu1 %v5258_v28  ;;  %1678 = vmatprep.mubr.f32.mxu0 %v847_v29  ;;  %v1401_v28 = vld [vmem:[%s6765_s25 + $0x588] sm:$0xff]  ;;  %v5278_v35 = vpack.c.bf16 %v1398_v27, %v1394_v25  ;;  %v5288_v4 = vpack.c.bf16 %v1423_v60, %v1419_v59  ;;  %v1427_v9 = vld [vmem:[%s6765_s25 + $0x658] sm:$0xff]  ;;  %v936_v60 = vld [vmem:[%s6757_s10 + $0x300] sm:$0xff] }
 0x197   : > { %3025 = vmatprep.mubr.f32.mxu1 %v847_v29  ;;  %5069 = vmatprep.subr.bf16.mxu0 %v5068_v30  ;;  %v1405_v29 = vld [vmem:[%s6765_s25 + $0x5a8] sm:$0xff]  ;;  %v870_v30 = vld [vmem:[%s6757_s10 + $0xf0] sm:$0xff]  ;;  %v1431_v10 = vld [vmem:[%s6765_s25 + $0x678] sm:$0xff] }
 0x198   : > { %1679 = vmatmul.mubr.f32.gmra.mrb[2].mxu0 %v846_v38  ;;  %5261 = vmatprep.subr.bf16.mxu1 %v5260_v34  ;;  %v5086_v34 = vpack.c.bf16 %v1396_v24, %v1392_v23  ;;  %v5088_v36 = vpack.c.bf16 %v1405_v29, %v1401_v28  ;;  %v895_v11 = vld [vmem:[%s6757_s10 + $0x1b8] sm:$0xff]  ;;  %v5292_v18 = vpack.c.bf16 %v1431_v10, %v1427_v9  ;;  %v901_v25 = vld [vmem:[%s6757_s10 + $0x1e8] sm:$0xff]  ;;  %v1432_v29 = vld [vmem:[%s6765_s25 + $0x680] sm:$0xff] }
 0x199   : > { %3026 = vmatmul.mubr.f32.gmra.mrb[2].mxu1 %v846_v38  ;;  %1684 = vmatprep.mubr.f32.mxu0 %v853_v41  ;;  %v1404_v38 = vld [vmem:[%s6765_s25 + $0x5a0] sm:$0xff]  ;;  %v1435_v23 = vld [vmem:[%s6765_s25 + $0x698] sm:$0xff]  ;;  %v937_v59 = vld [vmem:[%s6757_s10 + $0x308] sm:$0xff] }
 0x19a   : > { %3031 = vmatprep.mubr.f32.mxu1 %v853_v41  ;;  %5071 = vmatpush1.bf16.msra.mxu0 %v5070_v42  ;;  %v1406_v41 = vld [vmem:[%s6765_s25 + $0x5b0] sm:$0xff]  ;;  %v1409_v42 = vld [vmem:[%s6765_s25 + $0x5c8] sm:$0xff]  ;;  %v1439_v24 = vld [vmem:[%s6765_s25 + $0x6b8] sm:$0xff] }
 0x19b   : > { %5263 = vmatpush1.bf16.msra.mxu1 %v5262_v43  ;;  %5073 = vmatprep.subr.bf16.mxu0 %v5072_v44  ;;  %v1413_v43 = vld [vmem:[%s6765_s25 + $0x5e8] sm:$0xff]  ;;  %v876_v44 = vld [vmem:[%s6757_s10 + $0x120] sm:$0xff]  ;;  %v5282_v49 = vpack.c.bf16 %v1406_v41, %v1402_v39  ;;  %v5296_v31 = vpack.c.bf16 %v1439_v24, %v1435_v23  ;;  %v919_v41 = vld [vmem:[%s6757_s10 + $0x278] sm:$0xff] }
 0x19c   : > { %1685 = vmatmul.mubr.f32.gmra.mrb[4].mxu0 %v852_v52  ;;  %5265 = vmatprep.subr.bf16.mxu1 %v5264_v48  ;;  %v5090_v48 = vpack.c.bf16 %v1404_v38, %v1400_v37  ;;  %v5092_v50 = vpack.c.bf16 %v1413_v43, %v1409_v42  ;;  %v906_v38 = vld [vmem:[%s6757_s10 + $0x210] sm:$0xff]  ;;  %v913_v39 = vld [vmem:[%s6757_s10 + $0x248] sm:$0xff]  ;;  %v1459_v23 = vld [vmem:[%s6765_s25 + $0x758] sm:$0xff] }
 0x19d   : > { %3032 = vmatmul.mubr.f32.gmra.mrb[4].mxu1 %v852_v52  ;;  %1690 = vmatprep.mubr.f32.mxu0 %v859_v55  ;;  %v1412_v52 = vld [vmem:[%s6765_s25 + $0x5e0] sm:$0xff]  ;;  %v918_v42 = vld [vmem:[%s6757_s10 + $0x270] sm:$0xff]  ;;  %v925_v43 = vld [vmem:[%s6757_s10 + $0x2a8] sm:$0xff] }
 0x19e   : > { %3037 = vmatprep.mubr.f32.mxu1 %v859_v55  ;;  %5075 = vmatpush1.bf16.msra.mxu0 %v5074_v56  ;;  %v1414_v55 = vld [vmem:[%s6765_s25 + $0x5f0] sm:$0xff]  ;;  %v1417_v56 = vld [vmem:[%s6765_s25 + $0x608] sm:$0xff]  ;;  %v1463_v24 = vld [vmem:[%s6765_s25 + $0x778] sm:$0xff] }
 0x19f   : > { %5267 = vmatpush1.bf16.msra.mxu1 %v5266_v57  ;;  %5077 = vmatprep.subr.bf16.mxu0 %v5076_v58  ;;  %v1421_v57 = vld [vmem:[%s6765_s25 + $0x628] sm:$0xff]  ;;  %v882_v58 = vld [vmem:[%s6757_s10 + $0x150] sm:$0xff]  ;;  %v5286_v63 = vpack.c.bf16 %v1414_v55, %v1410_v53 }
 0x1a0   : > { %1691 = vmatmul.mubr.f32.gmra.mrb[6].mxu0 %v858_v2  ;;  %5269 = vmatprep.subr.bf16.mxu1 %v5268_v62  ;;  %v5094_v62 = vpack.c.bf16 %v1412_v52, %v1408_v51  ;;  %v5096_v0 = vpack.c.bf16 %v1421_v57, %v1417_v56  ;;  %v1444_v51 = vld [vmem:[%s6765_s25 + $0x6e0] sm:$0xff]  ;;  %v1442_v52 = vld [vmem:[%s6765_s25 + $0x6d0] sm:$0xff]  ;;  %v931_v57 = vld [vmem:[%s6757_s10 + $0x2d8] sm:$0xff] }
 0x1a1   : > { %3038 = vmatmul.mubr.f32.gmra.mrb[6].mxu1 %v858_v2  ;;  %1696 = vmatprep.mubr.f32.mxu0 %v865_v5  ;;  %v1420_v2 = vld [vmem:[%s6765_s25 + $0x620] sm:$0xff]  ;;  %v1446_v53 = vld [vmem:[%s6765_s25 + $0x6f0] sm:$0xff] }
 0x1a2   : > { %3043 = vmatprep.mubr.f32.mxu1 %v865_v5  ;;  %5079 = vmatpush1.bf16.msra.mxu0 %v5078_v6  ;;  %v1422_v5 = vld [vmem:[%s6765_s25 + $0x630] sm:$0xff]  ;;  %v1425_v6 = vld [vmem:[%s6765_s25 + $0x648] sm:$0xff]  ;;  %v5302_v55 = vpack.c.bf16 %v1446_v53, %v1442_v52  ;;  %v924_v56 = vld [vmem:[%s6757_s10 + $0x2a0] sm:$0xff] }
 0x1a3   : > { %5271 = vmatpush1.bf16.msra.mxu1 %v5270_v7  ;;  %5081 = vmatprep.subr.bf16.mxu0 %v5080_v8  ;;  %v1429_v7 = vld [vmem:[%s6765_s25 + $0x668] sm:$0xff]  ;;  %v888_v8 = vld [vmem:[%s6757_s10 + $0x180] sm:$0xff]  ;;  %v5290_v13 = vpack.c.bf16 %v1422_v5, %v1418_v3  ;;  %v1451_v3 = vld [vmem:[%s6765_s25 + $0x718] sm:$0xff] }
 0x1a4   : > { %1697 = vmatmul.mubr.f32.gmra.mrb[8].mxu0 %v864_v16  ;;  %5273 = vmatprep.subr.bf16.mxu1 %v5272_v12  ;;  %v5098_v12 = vpack.c.bf16 %v1420_v2, %v1416_v1  ;;  %v5100_v14 = vpack.c.bf16 %v1429_v7, %v1425_v6  ;;  %v1453_v1 = vld [vmem:[%s6765_s25 + $0x728] sm:$0xff]  ;;  %v1448_v5 = vld [vmem:[%s6765_s25 + $0x700] sm:$0xff]  ;;  %v1454_v9 = vld [vmem:[%s6765_s25 + $0x730] sm:$0xff] }
 0x1a5   : > { %3044 = vmatmul.mubr.f32.gmra.mrb[8].mxu1 %v864_v16  ;;  %1702 = vmatprep.mubr.f32.mxu0 %v871_v19  ;;  %v1428_v16 = vld [vmem:[%s6765_s25 + $0x660] sm:$0xff]  ;;  %v1003_v53 = vld [vmem:[%s6757_s10 + $0x518] sm:$0xff] }
 0x1a6   : > { %3049 = vmatprep.mubr.f32.mxu1 %v871_v19  ;;  %5083 = vmatpush1.bf16.msra.mxu0 %v5082_v20  ;;  %v1430_v19 = vld [vmem:[%s6765_s25 + $0x670] sm:$0xff]  ;;  %v1433_v20 = vld [vmem:[%s6765_s25 + $0x688] sm:$0xff]  ;;  %v1452_v7 = vld [vmem:[%s6765_s25 + $0x720] sm:$0xff] }
 0x1a7   : > { %5275 = vmatpush1.bf16.msra.mxu1 %v5274_v21  ;;  %5085 = vmatprep.subr.bf16.mxu0 %v5084_v22  ;;  %v1437_v21 = vld [vmem:[%s6765_s25 + $0x6a8] sm:$0xff]  ;;  %v894_v22 = vld [vmem:[%s6757_s10 + $0x1b0] sm:$0xff]  ;;  %v5294_v27 = vpack.c.bf16 %v1430_v19, %v1426_v17  ;;  %v5114_v10 = vpack.c.bf16 %v1452_v7, %v1448_v5  ;;  %v967_v17 = vld [vmem:[%s6757_s10 + $0x3f8] sm:$0xff] }
 0x1a8   : > { %1703 = vmatmul.mubr.f32.gmra.mrb[10].mxu0 %v870_v30  ;;  %5277 = vmatprep.subr.bf16.mxu1 %v5276_v26  ;;  %v5102_v26 = vpack.c.bf16 %v1428_v16, %v1424_v15  ;;  %v5104_v28 = vpack.c.bf16 %v1437_v21, %v1433_v20  ;;  %v961_v15 = vld [vmem:[%s6757_s10 + $0x3c8] sm:$0xff]  ;;  %v960_v16 = vld [vmem:[%s6757_s10 + $0x3c0] sm:$0xff]  ;;  %v1478_v5 = vld [vmem:[%s6765_s25 + $0x7f0] sm:$0xff] }
 0x1a9   : > { %3050 = vmatmul.mubr.f32.gmra.mrb[10].mxu1 %v870_v30  ;;  %1708 = vmatprep.mubr.f32.mxu0 %v877_v33  ;;  %v1436_v30 = vld [vmem:[%s6765_s25 + $0x6a0] sm:$0xff]  ;;  %v973_v19 = vld [vmem:[%s6757_s10 + $0x428] sm:$0xff] }
 0x1aa   : > { %3055 = vmatprep.mubr.f32.mxu1 %v877_v33  ;;  %5087 = vmatpush1.bf16.msra.mxu0 %v5086_v34  ;;  %v1438_v33 = vld [vmem:[%s6765_s25 + $0x6b0] sm:$0xff]  ;;  %v900_v34 = vld [vmem:[%s6757_s10 + $0x1e0] sm:$0xff]  ;;  %v1457_v20 = vld [vmem:[%s6765_s25 + $0x748] sm:$0xff] }
 0x1ab   : > { %5279 = vmatpush1.bf16.msra.mxu1 %v5278_v35  ;;  %5089 = vmatprep.subr.bf16.mxu0 %v5088_v36  ;;  %v907_v35 = vld [vmem:[%s6757_s10 + $0x218] sm:$0xff]  ;;  %v5106_v36 = vpack.c.bf16 %v1436_v30, %v1432_v29  ;;  %v5298_v37 = vpack.c.bf16 %v1438_v33, %v1434_v32  ;;  %v1461_v21 = vld [vmem:[%s6765_s25 + $0x768] sm:$0xff]  ;;  %v1462_v29 = vld [vmem:[%s6765_s25 + $0x770] sm:$0xff] }
 0x1ac   : > { %1709 = vmatmul.mubr.f32.gmra.mrb[12].mxu0 %v876_v44  ;;  %5281 = vmatprep.subr.bf16.mxu1 %v5280_v40  ;;  %v912_v40 = vld [vmem:[%s6757_s10 + $0x240] sm:$0xff]  ;;  %v979_v33 = vld [vmem:[%s6757_s10 + $0x458] sm:$0xff] }
 0x1ad   : > { %3056 = vmatmul.mubr.f32.gmra.mrb[12].mxu1 %v876_v44  ;;  %1714 = vmatprep.mubr.f32.mxu0 %v883_v47  ;;  %v1441_v44 = vld [vmem:[%s6765_s25 + $0x6c8] sm:$0xff]  ;;  %v972_v32 = vld [vmem:[%s6757_s10 + $0x420] sm:$0xff] }
 0x1ae   : > { %3061 = vmatprep.mubr.f32.mxu1 %v883_v47  ;;  %5091 = vmatpush1.bf16.msra.mxu0 %v5090_v48  ;;  %v5108_v46 = vpack.c.bf16 %v1445_v45, %v1441_v44  ;;  %v1443_v47 = vld [vmem:[%s6765_s25 + $0x6d8] sm:$0xff]  ;;  %v1464_v45 = vld [vmem:[%s6765_s25 + $0x780] sm:$0xff] }
 0x1af   : > { %5283 = vmatpush1.bf16.msra.mxu1 %v5282_v49  ;;  %5093 = vmatprep.subr.bf16.mxu0 %v5092_v50  ;;  %v1447_v48 = vld [vmem:[%s6765_s25 + $0x6f8] sm:$0xff]  ;;  %v1440_v49 = vld [vmem:[%s6765_s25 + $0x6c0] sm:$0xff] }
 0x1b0   : > { %1715 = vmatmul.mubr.f32.gmra.mrb[14].mxu0 %v882_v58  ;;  %5285 = vmatprep.subr.bf16.mxu1 %v5284_v54  ;;  %v5300_v50 = vpack.c.bf16 %v1447_v48, %v1443_v47  ;;  %v5110_v54 = vpack.c.bf16 %v1444_v51, %v1440_v49  ;;  %v1471_v44 = vld [vmem:[%s6765_s25 + $0x7b8] sm:$0xff]  ;;  %v1468_v47 = vld [vmem:[%s6765_s25 + $0x7a0] sm:$0xff]  ;;  %v1466_v48 = vld [vmem:[%s6765_s25 + $0x790] sm:$0xff] }
 0x1b1   : > { %3062 = vmatmul.mubr.f32.gmra.mrb[14].mxu1 %v882_v58  ;;  %1720 = vmatprep.mubr.f32.mxu0 %v889_v61  ;;  %v930_v58 = vld [vmem:[%s6757_s10 + $0x2d0] sm:$0xff]  ;;  %v996_v52 = vld [vmem:[%s6757_s10 + $0x4e0] sm:$0xff] }
 0x1b2   : > { %3067 = vmatprep.mubr.f32.mxu1 %v889_v61  ;;  %5095 = vmatpush1.bf16.msra.mxu0 %v5094_v62  ;;  %v943_v61 = vld [vmem:[%s6757_s10 + $0x338] sm:$0xff]  ;;  %v942_v62 = vld [vmem:[%s6757_s10 + $0x330] sm:$0xff] }
 0x1b3   : > { %5287 = vmatpush1.bf16.msra.mxu1 %v5286_v63  ;;  %5097 = vmatprep.subr.bf16.mxu0 %v5096_v0  ;;  %v949_v63 = vld [vmem:[%s6757_s10 + $0x368] sm:$0xff]  ;;  %v1470_v49 = vld [vmem:[%s6765_s25 + $0x7b0] sm:$0xff] }
 0x1b4   : > { %1721 = vmatmul.mubr.f32.gmra.mrb[16].mxu0 %v888_v8  ;;  %5289 = vmatprep.subr.bf16.mxu1 %v5288_v4  ;;  %v1449_v0 = vld [vmem:[%s6765_s25 + $0x708] sm:$0xff]  ;;  %v1455_v4 = vld [vmem:[%s6765_s25 + $0x738] sm:$0xff]  ;;  %v5314_v51 = vpack.c.bf16 %v1470_v49, %v1466_v48  ;;  %v1122_v48 = vld [vmem:[%s6757_s10 + $0x8d0] sm:$0xff] }
 0x1b5   : > { %3068 = vmatmul.mubr.f32.gmra.mrb[16].mxu1 %v888_v8  ;;  %1726 = vmatprep.mubr.f32.mxu0 %v895_v11  ;;  %v5112_v2 = vpack.c.bf16 %v1453_v1, %v1449_v0  ;;  %v5304_v6 = vpack.c.bf16 %v1455_v4, %v1451_v3  ;;  %v1450_v8 = vld [vmem:[%s6765_s25 + $0x710] sm:$0xff]  ;;  %v1479_v0 = vld [vmem:[%s6765_s25 + $0x7f8] sm:$0xff]  ;;  %v1472_v1 = vld [vmem:[%s6765_s25 + $0x7c0] sm:$0xff] }
 0x1b6   : > { %3073 = vmatprep.mubr.f32.mxu1 %v895_v11  ;;  %5099 = vmatpush1.bf16.msra.mxu0 %v5098_v12  ;;  %v5306_v11 = vpack.c.bf16 %v1454_v9, %v1450_v8  ;;  %v948_v12 = vld [vmem:[%s6757_s10 + $0x360] sm:$0xff]  ;;  %v1474_v4 = vld [vmem:[%s6765_s25 + $0x7d0] sm:$0xff]  ;;  %v1027_v9 = vld [vmem:[%s6757_s10 + $0x5d8] sm:$0xff] }
 0x1b7   : > { %5291 = vmatpush1.bf16.msra.mxu1 %v5290_v13  ;;  %5101 = vmatprep.subr.bf16.mxu0 %v5100_v14  ;;  %v955_v13 = vld [vmem:[%s6757_s10 + $0x398] sm:$0xff]  ;;  %v954_v14 = vld [vmem:[%s6757_s10 + $0x390] sm:$0xff]  ;;  %v1476_v3 = vld [vmem:[%s6765_s25 + $0x7e0] sm:$0xff]  ;;  %v5318_v7 = vpack.c.bf16 %v1478_v5, %v1474_v4 }
 0x1b8   : > { %1727 = vmatmul.mubr.f32.gmra.mrb[18].mxu0 %v894_v22  ;;  %5293 = vmatprep.subr.bf16.mxu1 %v5292_v18  ;;  %v966_v18 = vld [vmem:[%s6757_s10 + $0x3f0] sm:$0xff]  ;;  %v1020_v8 = vld [vmem:[%s6757_s10 + $0x5a0] sm:$0xff]  ;;  %v1129_v49 = vld [vmem:[%s6757_s10 + $0x908] sm:$0xff] }
 0x1b9   : > { %3074 = vmatmul.mubr.f32.gmra.mrb[18].mxu1 %v894_v22  ;;  %1732 = vmatprep.mubr.f32.mxu0 %v901_v25  ;;  %v5116_v22 = vpack.c.bf16 %v1461_v21, %v1457_v20  ;;  %v1045_v20 = vld [vmem:[%s6757_s10 + $0x668] sm:$0xff]  ;;  %v1182_v4 = vld [vmem:[%s6757_s10 + $0xab0] sm:$0xff] }
 0x1ba   : > { %3079 = vmatprep.mubr.f32.mxu1 %v901_v25  ;;  %5103 = vmatpush1.bf16.msra.mxu0 %v5102_v26  ;;  %v1456_v25 = vld [vmem:[%s6765_s25 + $0x740] sm:$0xff]  ;;  %v5308_v26 = vpack.c.bf16 %v1463_v24, %v1459_v23  ;;  %v1051_v23 = vld [vmem:[%s6757_s10 + $0x698] sm:$0xff]  ;;  %v1050_v24 = vld [vmem:[%s6757_s10 + $0x690] sm:$0xff] }
 0x1bb   : > { %5295 = vmatpush1.bf16.msra.mxu1 %v5294_v27  ;;  %5105 = vmatprep.subr.bf16.mxu0 %v5104_v28  ;;  %v1460_v27 = vld [vmem:[%s6765_s25 + $0x760] sm:$0xff]  ;;  %v1458_v28 = vld [vmem:[%s6765_s25 + $0x750] sm:$0xff]  ;;  %v1189_v5 = vld [vmem:[%s6757_s10 + $0xae8] sm:$0xff] }
 0x1bc   : > { %1733 = vmatmul.mubr.f32.gmra.mrb[20].mxu0 %v900_v34  ;;  %5297 = vmatprep.subr.bf16.mxu1 %v5296_v31  ;;  %v5118_v30 = vpack.c.bf16 %v1460_v27, %v1456_v25  ;;  %v5310_v31 = vpack.c.bf16 %v1462_v29, %v1458_v28  ;;  %v1057_v25 = vld [vmem:[%s6757_s10 + $0x6c8] sm:$0xff]  ;;  %v1063_v27 = vld [vmem:[%s6757_s10 + $0x6f8] sm:$0xff]  ;;  %v1062_v28 = vld [vmem:[%s6757_s10 + $0x6f0] sm:$0xff] }
 0x1bd   : > { %3080 = vmatmul.mubr.f32.gmra.mrb[20].mxu1 %v900_v34  ;;  %1738 = vmatprep.mubr.f32.mxu0 %v907_v35  ;;  %v978_v34 = vld [vmem:[%s6757_s10 + $0x450] sm:$0xff]  ;;  %v1069_v29 = vld [vmem:[%s6757_s10 + $0x728] sm:$0xff] }
 0x1be   : > { %3085 = vmatprep.mubr.f32.mxu1 %v907_v35  ;;  %5107 = vmatpush1.bf16.msra.mxu0 %v5106_v36  ;;  %v985_v35 = vld [vmem:[%s6757_s10 + $0x488] sm:$0xff]  ;;  %v984_v36 = vld [vmem:[%s6757_s10 + $0x480] sm:$0xff] }
 0x1bf   : > { %5299 = vmatpush1.bf16.msra.mxu1 %v5298_v37  ;;  %5109 = vmatprep.subr.bf16.mxu0 %v5108_v46  ;;  %v991_v37 = vld [vmem:[%s6757_s10 + $0x4b8] sm:$0xff] }
 0x1c0   : > { %1739 = vmatmul.mubr.f32.gmra.mrb[22].mxu0 %v906_v38  ;;  %5301 = vmatprep.subr.bf16.mxu1 %v5300_v50  ;;  %v5122_v50 = vpack.c.bf16 %v1468_v47, %v1464_v45  ;;  %v1117_v45 = vld [vmem:[%s6757_s10 + $0x8a8] sm:$0xff]  ;;  %v1123_v47 = vld [vmem:[%s6757_s10 + $0x8d8] sm:$0xff] }
 0x1c1   : > { %3086 = vmatmul.mubr.f32.gmra.mrb[22].mxu1 %v906_v38  ;;  %1744 = vmatprep.mubr.f32.mxu0 %v913_v39  ;;  %v990_v38 = vld [vmem:[%s6757_s10 + $0x4b0] sm:$0xff] }
 0x1c2   : > { %3091 = vmatprep.mubr.f32.mxu1 %v913_v39  ;;  %5111 = vmatpush1.bf16.msra.mxu0 %v5110_v54  ;;  %v997_v39 = vld [vmem:[%s6757_s10 + $0x4e8] sm:$0xff]  ;;  %v1002_v54 = vld [vmem:[%s6757_s10 + $0x510] sm:$0xff] }
 0x1c3   : > { %5303 = vmatpush1.bf16.msra.mxu1 %v5302_v55  ;;  %5113 = vmatprep.subr.bf16.mxu0 %v5112_v2  ;;  %v1009_v55 = vld [vmem:[%s6757_s10 + $0x548] sm:$0xff] }
 0x1c4   : > { %1745 = vmatmul.mubr.f32.gmra.mrb[24].mxu0 %v912_v40  ;;  %5305 = vmatprep.subr.bf16.mxu1 %v5304_v6  ;;  %v5126_v6 = vpack.c.bf16 %v1476_v3, %v1472_v1  ;;  %v1177_v1 = vld [vmem:[%s6757_s10 + $0xa88] sm:$0xff]  ;;  %v1183_v3 = vld [vmem:[%s6757_s10 + $0xab8] sm:$0xff] }
 0x1c5   : > { %3092 = vmatmul.mubr.f32.gmra.mrb[24].mxu1 %v912_v40  ;;  %1750 = vmatprep.mubr.f32.mxu0 %v919_v41  ;;  %v1465_v40 = vld [vmem:[%s6765_s25 + $0x788] sm:$0xff] }
 0x1c6   : > { %3097 = vmatprep.mubr.f32.mxu1 %v919_v41  ;;  %5115 = vmatpush1.bf16.msra.mxu0 %v5114_v10  ;;  %v1469_v41 = vld [vmem:[%s6765_s25 + $0x7a8] sm:$0xff]  ;;  %v1026_v10 = vld [vmem:[%s6757_s10 + $0x5d0] sm:$0xff] }
 0x1c7   : > { %5307 = vmatpush1.bf16.msra.mxu1 %v5306_v11  ;;  %5117 = vmatprep.subr.bf16.mxu0 %v5116_v22  ;;  %v1033_v11 = vld [vmem:[%s6757_s10 + $0x608] sm:$0xff]  ;;  %v1044_v22 = vld [vmem:[%s6757_s10 + $0x660] sm:$0xff] }
 0x1c8   : > { %1751 = vmatmul.mubr.f32.gmra.mrb[26].mxu0 %v918_v42  ;;  %5309 = vmatprep.subr.bf16.mxu1 %v5308_v26  ;;  %v1056_v26 = vld [vmem:[%s6757_s10 + $0x6c0] sm:$0xff] }
 0x1c9   : > { %3098 = vmatmul.mubr.f32.gmra.mrb[26].mxu1 %v918_v42  ;;  %1756 = vmatprep.mubr.f32.mxu0 %v925_v43  ;;  %v5120_v42 = vpack.c.bf16 %v1469_v41, %v1465_v40  ;;  %v1098_v40 = vld [vmem:[%s6757_s10 + $0x810] sm:$0xff]  ;;  %v1105_v41 = vld [vmem:[%s6757_s10 + $0x848] sm:$0xff] }
 0x1ca   : > { %3103 = vmatprep.mubr.f32.mxu1 %v925_v43  ;;  %5119 = vmatpush1.bf16.msra.mxu0 %v5118_v30  ;;  %v1467_v43 = vld [vmem:[%s6765_s25 + $0x798] sm:$0xff]  ;;  %v1068_v30 = vld [vmem:[%s6757_s10 + $0x720] sm:$0xff] }
 0x1cb   : > { %5311 = vmatpush1.bf16.msra.mxu1 %v5310_v31  ;;  %v5312_v46 = vpack.c.bf16 %v1471_v44, %v1467_v43  ;;  %5121 = vmatprep.subr.bf16.mxu0 %v5120_v42  ;;  %v1075_v31 = vld [vmem:[%s6757_s10 + $0x758] sm:$0xff]  ;;  %v1104_v42 = vld [vmem:[%s6757_s10 + $0x840] sm:$0xff]  ;;  %v1110_v44 = vld [vmem:[%s6757_s10 + $0x870] sm:$0xff] }
 0x1cc   : > { %1757 = vmatmul.mubr.f32.gmra.mrb[28].mxu0 %v924_v56  ;;  %v1111_v43 = vld [vmem:[%s6757_s10 + $0x878] sm:$0xff] }
 0x1cd   : > { %3104 = vmatmul.mubr.f32.gmra.mrb[28].mxu1 %v924_v56  ;;  %1762 = vmatprep.mubr.f32.mxu0 %v931_v57  ;;  %v1008_v56 = vld [vmem:[%s6757_s10 + $0x540] sm:$0xff] }
 0x1ce   : > { %3109 = vmatprep.mubr.f32.mxu1 %v931_v57  ;;  %5313 = vmatprep.subr.bf16.mxu1 %v5312_v46  ;;  %v1015_v57 = vld [vmem:[%s6757_s10 + $0x578] sm:$0xff]  ;;  %v1116_v46 = vld [vmem:[%s6757_s10 + $0x8a0] sm:$0xff] }
 0x1cf   : > { %5123 = vmatpush1.bf16.msra.mxu0 %v5122_v50  ;;  %5315 = vmatpush1.bf16.msra.mxu1 %v5314_v51  ;;  %v1128_v50 = vld [vmem:[%s6757_s10 + $0x900] sm:$0xff]  ;;  %v1135_v51 = vld [vmem:[%s6757_s10 + $0x938] sm:$0xff] }
 0x1d0   : > { %1763 = vmatmul.mubr.f32.gmra.mrb[30].mxu0 %v930_v58 }
 0x1d1   : > { %3110 = vmatmul.mubr.f32.gmra.mrb[30].mxu1 %v930_v58  ;;  %1768 = vmatprep.mubr.f32.mxu0 %v937_v59  ;;  %v1014_v58 = vld [vmem:[%s6757_s10 + $0x570] sm:$0xff] }
 0x1d2   : > { %3115 = vmatprep.mubr.f32.mxu1 %v937_v59  ;;  %v1021_v59 = vld [vmem:[%s6757_s10 + $0x5a8] sm:$0xff] }
 0x1d4   : > { %1769 = vmatmul.mubr.f32.gmra.mrb[32].mxu0 %v936_v60 }
 0x1d5   : > { %3116 = vmatmul.mubr.f32.gmra.mrb[32].mxu1 %v936_v60  ;;  %1774 = vmatprep.mubr.f32.mxu0 %v943_v61  ;;  %v1473_v60 = vld [vmem:[%s6765_s25 + $0x7c8] sm:$0xff] }
 0x1d6   : > { %3121 = vmatprep.mubr.f32.mxu1 %v943_v61  ;;  %v1477_v61 = vld [vmem:[%s6765_s25 + $0x7e8] sm:$0xff] }
 0x1d8   : > { %1775 = vmatmul.mubr.f32.gmra.mrb[34].mxu0 %v942_v62 }
 0x1d9   : > { %3122 = vmatmul.mubr.f32.gmra.mrb[34].mxu1 %v942_v62  ;;  %1780 = vmatprep.mubr.f32.mxu0 %v949_v63  ;;  %v5124_v62 = vpack.c.bf16 %v1477_v61, %v1473_v60  ;;  %v1158_v60 = vld [vmem:[%s6757_s10 + $0x9f0] sm:$0xff]  ;;  %v1165_v61 = vld [vmem:[%s6757_s10 + $0xa28] sm:$0xff] }
 0x1da   : > { %3127 = vmatprep.mubr.f32.mxu1 %v949_v63  ;;  %v1475_v63 = vld [vmem:[%s6765_s25 + $0x7d8] sm:$0xff] }
 0x1db   : > { %v5316_v2 = vpack.c.bf16 %v1479_v0, %v1475_v63  ;;  %5125 = vmatprep.subr.bf16.mxu0 %v5124_v62  ;;  %v1164_v62 = vld [vmem:[%s6757_s10 + $0xa20] sm:$0xff]  ;;  %v1171_v63 = vld [vmem:[%s6757_s10 + $0xa58] sm:$0xff]  ;;  %v1170_v0 = vld [vmem:[%s6757_s10 + $0xa50] sm:$0xff] }
 0x1dc   : > { %1781 = vmatmul.mubr.f32.gmra.mrb[36].mxu0 %v948_v12 }
 0x1dd   : > { %3128 = vmatmul.mubr.f32.gmra.mrb[36].mxu1 %v948_v12  ;;  %1786 = vmatprep.mubr.f32.mxu0 %v955_v13  ;;  %v1032_v12 = vld [vmem:[%s6757_s10 + $0x600] sm:$0xff] }
 0x1de   : > { %3133 = vmatprep.mubr.f32.mxu1 %v955_v13  ;;  %5317 = vmatprep.subr.bf16.mxu1 %v5316_v2  ;;  %v1039_v13 = vld [vmem:[%s6757_s10 + $0x638] sm:$0xff]  ;;  %v1176_v2 = vld [vmem:[%s6757_s10 + $0xa80] sm:$0xff] }
 0x1df   : > { %5127 = vmatpush1.bf16.msra.mxu0 %v5126_v6  ;;  %5319 = vmatpush1.bf16.msra.mxu1 %v5318_v7  ;;  %v1188_v6 = vld [vmem:[%s6757_s10 + $0xae0] sm:$0xff]  ;;  %v1195_v7 = vld [vmem:[%s6757_s10 + $0xb18] sm:$0xff] }
 0x1e0   : > { %1787 = vmatmul.mubr.f32.gmra.mrb[38].mxu0 %v954_v14 }
 0x1e1   : > { %3134 = vmatmul.mubr.f32.gmra.mrb[38].mxu1 %v954_v14  ;;  %1792 = vmatprep.mubr.f32.mxu0 %v961_v15  ;;  %v1481_v14 = vld [vmem:[%s6765_s25 + $0x808] sm:$0xff] }
 0x1e2   : > { %3139 = vmatprep.mubr.f32.mxu1 %v961_v15  ;;  %v1485_v15 = vld [vmem:[%s6765_s25 + $0x828] sm:$0xff] }
 0x1e4   : > { %1793 = vmatmul.mubr.f32.gmra.mrb[40].mxu0 %v960_v16 }
 0x1e5   : > { %3140 = vmatmul.mubr.f32.gmra.mrb[40].mxu1 %v960_v16  ;;  %1798 = vmatprep.mubr.f32.mxu0 %v967_v17  ;;  %v1038_v16 = vld [vmem:[%s6757_s10 + $0x630] sm:$0xff] }
 0x1e6   : > { %3145 = vmatprep.mubr.f32.mxu1 %v967_v17  ;;  %v5128_v17 = vpack.c.bf16 %v1485_v15, %v1481_v14  ;;  %v1212_v14 = vld [vmem:[%s6757_s10 + $0xba0] sm:$0xff]  ;;  %v1219_v15 = vld [vmem:[%s6757_s10 + $0xbd8] sm:$0xff] }
 0x1e8   : > { %1799 = vmatmul.mubr.f32.gmra.mrb[42].mxu0 %v966_v18  ;;  %5129 = vmatprep.subr.bf16.mxu0 %v5128_v17  ;;  %v843_v17 = vld [vmem:[%s6757_s10 + $0x18] sm:$0xff] }
 0x1e9   : > { %3146 = vmatmul.mubr.f32.gmra.mrb[42].mxu1 %v966_v18  ;;  %1804 = vmatprep.mubr.f32.mxu0 %v973_v19  ;;  %v1483_v18 = vld [vmem:[%s6765_s25 + $0x818] sm:$0xff] }
 0x1ea   : > { %3151 = vmatprep.mubr.f32.mxu1 %v973_v19  ;;  %v1487_v19 = vld [vmem:[%s6765_s25 + $0x838] sm:$0xff] }
 0x1eb   : > { %v5320_v21 = vpack.c.bf16 %v1487_v19, %v1483_v18  ;;  %v1480_v18 = vld [vmem:[%s6765_s25 + $0x800] sm:$0xff] }
 0x1ec   : > { %1805 = vmatmul.mubr.f32.gmra.mrb[44].mxu0 %v972_v32  ;;  %v1484_v19 = vld [vmem:[%s6765_s25 + $0x820] sm:$0xff] }
 0x1ed   : > { %3152 = vmatmul.mubr.f32.gmra.mrb[44].mxu1 %v972_v32  ;;  %1810 = vmatprep.mubr.f32.mxu0 %v979_v33  ;;  %v1074_v32 = vld [vmem:[%s6757_s10 + $0x750] sm:$0xff] }
 0x1ee   : > { %3157 = vmatprep.mubr.f32.mxu1 %v979_v33  ;;  %5321 = vmatprep.subr.bf16.mxu1 %v5320_v21  ;;  %v1081_v33 = vld [vmem:[%s6757_s10 + $0x788] sm:$0xff]  ;;  %v1486_v21 = vld [vmem:[%s6765_s25 + $0x830] sm:$0xff] }
 0x1f0   : > { %1811 = vmatmul.mubr.f32.gmra.mrb[46].mxu0 %v978_v34 }
 0x1f1   : > { %3158 = vmatmul.mubr.f32.gmra.mrb[46].mxu1 %v978_v34  ;;  %1816 = vmatprep.mubr.f32.mxu0 %v985_v35  ;;  %v1080_v34 = vld [vmem:[%s6757_s10 + $0x780] sm:$0xff] }
 0x1f2   : > { %3163 = vmatprep.mubr.f32.mxu1 %v985_v35  ;;  %v1087_v35 = vld [vmem:[%s6757_s10 + $0x7b8] sm:$0xff] }
 0x1f4   : > { %1817 = vmatmul.mubr.f32.gmra.mrb[48].mxu0 %v984_v36 }
 0x1f5   : > { %3164 = vmatmul.mubr.f32.gmra.mrb[48].mxu1 %v984_v36  ;;  %1822 = vmatprep.mubr.f32.mxu0 %v991_v37  ;;  %v1086_v36 = vld [vmem:[%s6757_s10 + $0x7b0] sm:$0xff] }
 0x1f6   : > { %3169 = vmatprep.mubr.f32.mxu1 %v991_v37  ;;  %v1093_v37 = vld [vmem:[%s6757_s10 + $0x7e8] sm:$0xff] }
 0x1f8   : > { %1823 = vmatmul.mubr.f32.gmra.mrb[50].mxu0 %v990_v38 }
 0x1f9   : > { %3170 = vmatmul.mubr.f32.gmra.mrb[50].mxu1 %v990_v38  ;;  %1828 = vmatprep.mubr.f32.mxu0 %v997_v39  ;;  %v1092_v38 = vld [vmem:[%s6757_s10 + $0x7e0] sm:$0xff] }
 0x1fa   : > { %3175 = vmatprep.mubr.f32.mxu1 %v997_v39  ;;  %v1099_v39 = vld [vmem:[%s6757_s10 + $0x818] sm:$0xff] }
 0x1fc   : > { %1829 = vmatmul.mubr.f32.gmra.mrb[52].mxu0 %v996_v52 }
 0x1fd   : > { %3176 = vmatmul.mubr.f32.gmra.mrb[52].mxu1 %v996_v52  ;;  %1834 = vmatprep.mubr.f32.mxu0 %v1003_v53  ;;  %v1134_v52 = vld [vmem:[%s6757_s10 + $0x930] sm:$0xff] }
 0x1fe   : > { %3181 = vmatprep.mubr.f32.mxu1 %v1003_v53  ;;  %v1141_v53 = vld [vmem:[%s6757_s10 + $0x968] sm:$0xff] }
 0x200   : > { %1835 = vmatmul.mubr.f32.gmra.mrb[54].mxu0 %v1002_v54 }
 0x201   : > { %3182 = vmatmul.mubr.f32.gmra.mrb[54].mxu1 %v1002_v54  ;;  %1840 = vmatprep.mubr.f32.mxu0 %v1009_v55  ;;  %v1140_v54 = vld [vmem:[%s6757_s10 + $0x960] sm:$0xff] }
 0x202   : > { %3187 = vmatprep.mubr.f32.mxu1 %v1009_v55  ;;  %v1147_v55 = vld [vmem:[%s6757_s10 + $0x998] sm:$0xff] }
 0x204   : > { %1841 = vmatmul.mubr.f32.gmra.mrb[56].mxu0 %v1008_v56 }
 0x205   : > { %3188 = vmatmul.mubr.f32.gmra.mrb[56].mxu1 %v1008_v56  ;;  %1846 = vmatprep.mubr.f32.mxu0 %v1015_v57  ;;  %v1146_v56 = vld [vmem:[%s6757_s10 + $0x990] sm:$0xff] }
 0x206   : > { %3193 = vmatprep.mubr.f32.mxu1 %v1015_v57  ;;  %v1153_v57 = vld [vmem:[%s6757_s10 + $0x9c8] sm:$0xff] }
 0x208   : > { %1847 = vmatmul.mubr.f32.gmra.mrb[58].mxu0 %v1014_v58 }
 0x209   : > { %3194 = vmatmul.mubr.f32.gmra.mrb[58].mxu1 %v1014_v58  ;;  %1852 = vmatprep.mubr.f32.mxu0 %v1021_v59  ;;  %v1152_v58 = vld [vmem:[%s6757_s10 + $0x9c0] sm:$0xff] }
 0x20a   : > { %3199 = vmatprep.mubr.f32.mxu1 %v1021_v59  ;;  %v1159_v59 = vld [vmem:[%s6757_s10 + $0x9f8] sm:$0xff] }
 0x20c   : > { %1853 = vmatmul.mubr.f32.gmra.mrb[60].mxu0 %v1020_v8 }
 0x20d   : > { %3200 = vmatmul.mubr.f32.gmra.mrb[60].mxu1 %v1020_v8  ;;  %1858 = vmatprep.mubr.f32.mxu0 %v1027_v9  ;;  %v1194_v8 = vld [vmem:[%s6757_s10 + $0xb10] sm:$0xff] }
 0x20e   : > { %3205 = vmatprep.mubr.f32.mxu1 %v1027_v9  ;;  %v1201_v9 = vld [vmem:[%s6757_s10 + $0xb48] sm:$0xff] }
 0x210   : > { %1859 = vmatmul.mubr.f32.gmra.mrb[62].mxu0 %v1026_v10 }
 0x211   : > { %3206 = vmatmul.mubr.f32.gmra.mrb[62].mxu1 %v1026_v10  ;;  %1864 = vmatprep.mubr.f32.mxu0 %v1033_v11  ;;  %v1200_v10 = vld [vmem:[%s6757_s10 + $0xb40] sm:$0xff] }
 0x212   : > { %3211 = vmatprep.mubr.f32.mxu1 %v1033_v11  ;;  %v1207_v11 = vld [vmem:[%s6757_s10 + $0xb78] sm:$0xff] }
 0x214   : > { %1865 = vmatmul.mubr.f32.gmra.mrb[64].mxu0 %v1032_v12 }
 0x215   : > { %3212 = vmatmul.mubr.f32.gmra.mrb[64].mxu1 %v1032_v12  ;;  %1870 = vmatprep.mubr.f32.mxu0 %v1039_v13  ;;  %v1206_v12 = vld [vmem:[%s6757_s10 + $0xb70] sm:$0xff] }
 0x216   : > { %3217 = vmatprep.mubr.f32.mxu1 %v1039_v13  ;;  %v1213_v13 = vld [vmem:[%s6757_s10 + $0xba8] sm:$0xff] }
 0x218   : > { %1871 = vmatmul.mubr.f32.gmra.mrb[66].mxu0 %v1038_v16 }
 0x219   : > { %3218 = vmatmul.mubr.f32.gmra.mrb[66].mxu1 %v1038_v16  ;;  %1876 = vmatprep.mubr.f32.mxu0 %v1045_v20  ;;  %v1218_v16 = vld [vmem:[%s6757_s10 + $0xbd0] sm:$0xff] }
 0x21a   : > { %3223 = vmatprep.mubr.f32.mxu1 %v1045_v20  ;;  %v1482_v20 = vld [vmem:[%s6765_s25 + $0x810] sm:$0xff] }
 0x21c   : > { %1877 = vmatmul.mubr.f32.gmra.mrb[68].mxu0 %v1044_v22 }
 0x21d   : > { %3224 = vmatmul.mubr.f32.gmra.mrb[68].mxu1 %v1044_v22  ;;  %1882 = vmatprep.mubr.f32.mxu0 %v1051_v23  ;;  %v1489_v22 = vld [vmem:[%s6765_s25 + $0x848] sm:$0xff] }
 0x21e   : > { %3229 = vmatprep.mubr.f32.mxu1 %v1051_v23  ;;  %v1493_v23 = vld [vmem:[%s6765_s25 + $0x868] sm:$0xff] }
 0x220   : > { %1883 = vmatmul.mubr.f32.gmra.mrb[70].mxu0 %v1050_v24 }
 0x221   : > { %3230 = vmatmul.mubr.f32.gmra.mrb[70].mxu1 %v1050_v24  ;;  %1888 = vmatprep.mubr.f32.mxu0 %v1057_v25  ;;  %v842_v24 = vld [vmem:[%s6757_s10 + $0x10] sm:$0xff] }
 0x222   : > { %3235 = vmatprep.mubr.f32.mxu1 %v1057_v25  ;;  %v5130_v25 = vpack.c.bf16 %v1484_v19, %v1480_v18  ;;  %v1527_v18 = vld [vmem:[%s6765_s25 + $0x978] sm:$0xff]  ;;  %v873_v19 = vld [vmem:[%s6757_s10 + $0x108] sm:$0xff] }
 0x224   : > { %1889 = vmatmul.mubr.f32.gmra.mrb[72].mxu0 %v1056_v26 }
 0x225   : > { %3236 = vmatmul.mubr.f32.gmra.mrb[72].mxu1 %v1056_v26  ;;  %1894 = vmatprep.mubr.f32.mxu0 %v1063_v27  ;;  %v1491_v26 = vld [vmem:[%s6765_s25 + $0x858] sm:$0xff] }
 0x226   : > { %3241 = vmatprep.mubr.f32.mxu1 %v1063_v27  ;;  %v1495_v27 = vld [vmem:[%s6765_s25 + $0x878] sm:$0xff] }
 0x228   : > { %1895 = vmatmul.mubr.f32.gmra.mrb[74].mxu0 %v1062_v28 }
 0x229   : > { %3242 = vmatmul.mubr.f32.gmra.mrb[74].mxu1 %v1062_v28  ;;  %1900 = vmatprep.mubr.f32.mxu0 %v1069_v29  ;;  %v5322_v28 = vpack.c.bf16 %v1486_v21, %v1482_v20 }
 0x22a   : > { %3247 = vmatprep.mubr.f32.mxu1 %v1069_v29  ;;  %v849_v29 = vld [vmem:[%s6757_s10 + $0x48] sm:$0xff] }
 0x22c   : > { %1901 = vmatmul.mubr.f32.gmra.mrb[76].mxu0 %v1068_v30 }
 0x22d   : > { %3248 = vmatmul.mubr.f32.gmra.mrb[76].mxu1 %v1068_v30  ;;  %1906 = vmatprep.mubr.f32.mxu0 %v1075_v31  ;;  %v5132_v30 = vpack.c.bf16 %v1493_v23, %v1489_v22  ;;  %v1520_v23 = vld [vmem:[%s6765_s25 + $0x940] sm:$0xff] }
 0x22e   : > { %3253 = vmatprep.mubr.f32.mxu1 %v1075_v31  ;;  %v1488_v31 = vld [vmem:[%s6765_s25 + $0x840] sm:$0xff] }
 0x230   : > { %1907 = vmatmul.mubr.f32.gmra.mrb[78].mxu0 %v1074_v32 }
 0x231   : > { %3254 = vmatmul.mubr.f32.gmra.mrb[78].mxu1 %v1074_v32  ;;  %1912 = vmatprep.mubr.f32.mxu0 %v1081_v33  ;;  %v1492_v32 = vld [vmem:[%s6765_s25 + $0x860] sm:$0xff] }
 0x232   : > { %3259 = vmatprep.mubr.f32.mxu1 %v1081_v33  ;;  %v1490_v33 = vld [vmem:[%s6765_s25 + $0x850] sm:$0xff] }
 0x234   : > { %1913 = vmatmul.mubr.f32.gmra.mrb[80].mxu0 %v1080_v34 }
 0x235   : > { %3260 = vmatmul.mubr.f32.gmra.mrb[80].mxu1 %v1080_v34  ;;  %1918 = vmatprep.mubr.f32.mxu0 %v1087_v35  ;;  %v5324_v34 = vpack.c.bf16 %v1495_v27, %v1491_v26  ;;  %v1526_v27 = vld [vmem:[%s6765_s25 + $0x970] sm:$0xff] }
 0x236   : > { %3265 = vmatprep.mubr.f32.mxu1 %v1087_v35  ;;  %v1494_v35 = vld [vmem:[%s6765_s25 + $0x870] sm:$0xff] }
 0x238   : > { %1919 = vmatmul.mubr.f32.gmra.mrb[82].mxu0 %v1086_v36 }
 0x239   : > { %3266 = vmatmul.mubr.f32.gmra.mrb[82].mxu1 %v1086_v36  ;;  %1924 = vmatprep.mubr.f32.mxu0 %v1093_v37  ;;  %v1497_v36 = vld [vmem:[%s6765_s25 + $0x888] sm:$0xff] }
 0x23a   : > { %3271 = vmatprep.mubr.f32.mxu1 %v1093_v37  ;;  %v1501_v37 = vld [vmem:[%s6765_s25 + $0x8a8] sm:$0xff] }
 0x23c   : > { %1925 = vmatmul.mubr.f32.gmra.mrb[84].mxu0 %v1092_v38 }
 0x23d   : > { %3272 = vmatmul.mubr.f32.gmra.mrb[84].mxu1 %v1092_v38  ;;  %1930 = vmatprep.mubr.f32.mxu0 %v1099_v39  ;;  %v848_v38 = vld [vmem:[%s6757_s10 + $0x40] sm:$0xff] }
 0x23e   : > { %3277 = vmatprep.mubr.f32.mxu1 %v1099_v39  ;;  %v1499_v39 = vld [vmem:[%s6765_s25 + $0x898] sm:$0xff] }
 0x240   : > { %1931 = vmatmul.mubr.f32.gmra.mrb[86].mxu0 %v1098_v40 }
 0x241   : > { %3278 = vmatmul.mubr.f32.gmra.mrb[86].mxu1 %v1098_v40  ;;  %1936 = vmatprep.mubr.f32.mxu0 %v1105_v41  ;;  %v1503_v40 = vld [vmem:[%s6765_s25 + $0x8b8] sm:$0xff] }
 0x242   : > { %3283 = vmatprep.mubr.f32.mxu1 %v1105_v41  ;;  %v855_v41 = vld [vmem:[%s6757_s10 + $0x78] sm:$0xff] }
 0x244   : > { %1937 = vmatmul.mubr.f32.gmra.mrb[88].mxu0 %v1104_v42 }
 0x245   : > { %3284 = vmatmul.mubr.f32.gmra.mrb[88].mxu1 %v1104_v42  ;;  %1942 = vmatprep.mubr.f32.mxu0 %v1111_v43  ;;  %v5134_v42 = vpack.c.bf16 %v1492_v32, %v1488_v31  ;;  %v1531_v31 = vld [vmem:[%s6765_s25 + $0x998] sm:$0xff] }
 0x246   : > { %3289 = vmatprep.mubr.f32.mxu1 %v1111_v43  ;;  %v5326_v43 = vpack.c.bf16 %v1494_v35, %v1490_v33  ;;  %v1535_v32 = vld [vmem:[%s6765_s25 + $0x9b8] sm:$0xff] }
 0x247   : > { %v879_v33 = vld [vmem:[%s6757_s10 + $0x138] sm:$0xff] }
 0x248   : > { %1943 = vmatmul.mubr.f32.gmra.mrb[90].mxu0 %v1110_v44 }
 0x249   : > { %3290 = vmatmul.mubr.f32.gmra.mrb[90].mxu1 %v1110_v44  ;;  %1948 = vmatprep.mubr.f32.mxu0 %v1117_v45  ;;  %v5136_v44 = vpack.c.bf16 %v1501_v37, %v1497_v36  ;;  %v1528_v37 = vld [vmem:[%s6765_s25 + $0x980] sm:$0xff] }
 0x24a   : > { %3295 = vmatprep.mubr.f32.mxu1 %v1117_v45  ;;  %v1496_v45 = vld [vmem:[%s6765_s25 + $0x880] sm:$0xff] }
 0x24c   : > { %1949 = vmatmul.mubr.f32.gmra.mrb[92].mxu0 %v1116_v46 }
 0x24d   : > { %3296 = vmatmul.mubr.f32.gmra.mrb[92].mxu1 %v1116_v46  ;;  %1954 = vmatprep.mubr.f32.mxu0 %v1123_v47  ;;  %v1500_v46 = vld [vmem:[%s6765_s25 + $0x8a0] sm:$0xff] }
 0x24e   : > { %3301 = vmatprep.mubr.f32.mxu1 %v1123_v47  ;;  %v1498_v47 = vld [vmem:[%s6765_s25 + $0x890] sm:$0xff] }
 0x250   : > { %1955 = vmatmul.mubr.f32.gmra.mrb[94].mxu0 %v1122_v48 }
 0x251   : > { %3302 = vmatmul.mubr.f32.gmra.mrb[94].mxu1 %v1122_v48  ;;  %1960 = vmatprep.mubr.f32.mxu0 %v1129_v49  ;;  %v5328_v48 = vpack.c.bf16 %v1503_v40, %v1499_v39  ;;  %v1530_v39 = vld [vmem:[%s6765_s25 + $0x990] sm:$0xff]  ;;  %v5344_v40 = vpack.c.bf16 %v1535_v32, %v1531_v31 }
 0x252   : > { %3307 = vmatprep.mubr.f32.mxu1 %v1129_v49  ;;  %v1502_v49 = vld [vmem:[%s6765_s25 + $0x8b0] sm:$0xff] }
 0x253   : > { %v1562_v32 = vld [vmem:[%s6765_s25 + $0xa90] sm:$0xff] }
 0x254   : > { %1961 = vmatmul.mubr.f32.gmra.mrb[96].mxu0 %v1128_v50 }
 0x255   : > { %3308 = vmatmul.mubr.f32.gmra.mrb[96].mxu1 %v1128_v50  ;;  %1966 = vmatprep.mubr.f32.mxu0 %v1135_v51  ;;  %v1505_v50 = vld [vmem:[%s6765_s25 + $0x8c8] sm:$0xff] }
 0x256   : > { %3313 = vmatprep.mubr.f32.mxu1 %v1135_v51  ;;  %v1509_v51 = vld [vmem:[%s6765_s25 + $0x8e8] sm:$0xff] }
 0x258   : > { %1967 = vmatmul.mubr.f32.gmra.mrb[98].mxu0 %v1134_v52 }
 0x259   : > { %3314 = vmatmul.mubr.f32.gmra.mrb[98].mxu1 %v1134_v52  ;;  %1972 = vmatprep.mubr.f32.mxu0 %v1141_v53  ;;  %v854_v52 = vld [vmem:[%s6757_s10 + $0x70] sm:$0xff] }
 0x25a   : > { %3319 = vmatprep.mubr.f32.mxu1 %v1141_v53  ;;  %v1507_v53 = vld [vmem:[%s6765_s25 + $0x8d8] sm:$0xff] }
 0x25c   : > { %1973 = vmatmul.mubr.f32.gmra.mrb[100].mxu0 %v1140_v54 }
 0x25d   : > { %3320 = vmatmul.mubr.f32.gmra.mrb[100].mxu1 %v1140_v54  ;;  %1978 = vmatprep.mubr.f32.mxu0 %v1147_v55  ;;  %v1511_v54 = vld [vmem:[%s6765_s25 + $0x8f8] sm:$0xff] }
 0x25e   : > { %3325 = vmatprep.mubr.f32.mxu1 %v1147_v55  ;;  %v861_v55 = vld [vmem:[%s6757_s10 + $0xa8] sm:$0xff] }
 0x260   : > { %1979 = vmatmul.mubr.f32.gmra.mrb[102].mxu0 %v1146_v56 }
 0x261   : > { %3326 = vmatmul.mubr.f32.gmra.mrb[102].mxu1 %v1146_v56  ;;  %1984 = vmatprep.mubr.f32.mxu0 %v1153_v57  ;;  %v5138_v56 = vpack.c.bf16 %v1500_v46, %v1496_v45  ;;  %v1539_v45 = vld [vmem:[%s6765_s25 + $0x9d8] sm:$0xff] }
 0x262   : > { %3331 = vmatprep.mubr.f32.mxu1 %v1153_v57  ;;  %v5330_v57 = vpack.c.bf16 %v1502_v49, %v1498_v47  ;;  %v1543_v46 = vld [vmem:[%s6765_s25 + $0x9f8] sm:$0xff]  ;;  %v885_v47 = vld [vmem:[%s6757_s10 + $0x168] sm:$0xff] }
 0x264   : > { %1985 = vmatmul.mubr.f32.gmra.mrb[104].mxu0 %v1152_v58 }
 0x265   : > { %3332 = vmatmul.mubr.f32.gmra.mrb[104].mxu1 %v1152_v58  ;;  %1990 = vmatprep.mubr.f32.mxu0 %v1159_v59  ;;  %v5140_v58 = vpack.c.bf16 %v1509_v51, %v1505_v50  ;;  %v1536_v51 = vld [vmem:[%s6765_s25 + $0x9c0] sm:$0xff] }
 0x266   : > { %3337 = vmatprep.mubr.f32.mxu1 %v1159_v59  ;;  %v1504_v59 = vld [vmem:[%s6765_s25 + $0x8c0] sm:$0xff] }
 0x268   : > { %1991 = vmatmul.mubr.f32.gmra.mrb[106].mxu0 %v1158_v60 }
 0x269   : > { %3338 = vmatmul.mubr.f32.gmra.mrb[106].mxu1 %v1158_v60  ;;  %1996 = vmatprep.mubr.f32.mxu0 %v1165_v61  ;;  %v1508_v60 = vld [vmem:[%s6765_s25 + $0x8e0] sm:$0xff] }
 0x26a   : > { %3343 = vmatprep.mubr.f32.mxu1 %v1165_v61  ;;  %v1506_v61 = vld [vmem:[%s6765_s25 + $0x8d0] sm:$0xff] }
 0x26c   : > { %1997 = vmatmul.mubr.f32.gmra.mrb[108].mxu0 %v1164_v62 }
 0x26d   : > { %3344 = vmatmul.mubr.f32.gmra.mrb[108].mxu1 %v1164_v62  ;;  %2002 = vmatprep.mubr.f32.mxu0 %v1171_v63  ;;  %v5332_v62 = vpack.c.bf16 %v1511_v54, %v1507_v53  ;;  %v1538_v53 = vld [vmem:[%s6765_s25 + $0x9d0] sm:$0xff]  ;;  %v5348_v54 = vpack.c.bf16 %v1543_v46, %v1539_v45  ;;  %v1573_v45 = vld [vmem:[%s6765_s25 + $0xae8] sm:$0xff] }
 0x26e   : > { %3349 = vmatprep.mubr.f32.mxu1 %v1171_v63  ;;  %v1510_v63 = vld [vmem:[%s6765_s25 + $0x8f0] sm:$0xff] }
 0x270   : > { %2003 = vmatmul.mubr.f32.gmra.mrb[110].mxu0 %v1170_v0 }
 0x271   : > { %3350 = vmatmul.mubr.f32.gmra.mrb[110].mxu1 %v1170_v0  ;;  %2008 = vmatprep.mubr.f32.mxu0 %v1177_v1  ;;  %v1513_v0 = vld [vmem:[%s6765_s25 + $0x908] sm:$0xff] }
 0x272   : > { %3355 = vmatprep.mubr.f32.mxu1 %v1177_v1  ;;  %v1517_v1 = vld [vmem:[%s6765_s25 + $0x928] sm:$0xff] }
 0x274   : > { %2009 = vmatmul.mubr.f32.gmra.mrb[112].mxu0 %v1176_v2 }
 0x275   : > { %3356 = vmatmul.mubr.f32.gmra.mrb[112].mxu1 %v1176_v2  ;;  %2014 = vmatprep.mubr.f32.mxu0 %v1183_v3  ;;  %v860_v2 = vld [vmem:[%s6757_s10 + $0xa0] sm:$0xff] }
 0x276   : > { %3361 = vmatprep.mubr.f32.mxu1 %v1183_v3  ;;  %v1515_v3 = vld [vmem:[%s6765_s25 + $0x918] sm:$0xff] }
 0x278   : > { %2015 = vmatmul.mubr.f32.gmra.mrb[114].mxu0 %v1182_v4 }
 0x279   : > { %3362 = vmatmul.mubr.f32.gmra.mrb[114].mxu1 %v1182_v4  ;;  %2020 = vmatprep.mubr.f32.mxu0 %v1189_v5  ;;  %v1519_v4 = vld [vmem:[%s6765_s25 + $0x938] sm:$0xff] }
 0x27a   : > { %3367 = vmatprep.mubr.f32.mxu1 %v1189_v5  ;;  %v867_v5 = vld [vmem:[%s6757_s10 + $0xd8] sm:$0xff] }
 0x27c   : > { %2021 = vmatmul.mubr.f32.gmra.mrb[116].mxu0 %v1188_v6 }
 0x27d   : > { %3368 = vmatmul.mubr.f32.gmra.mrb[116].mxu1 %v1188_v6  ;;  %2026 = vmatprep.mubr.f32.mxu0 %v1195_v7  ;;  %v5142_v6 = vpack.c.bf16 %v1508_v60, %v1504_v59  ;;  %v1547_v59 = vld [vmem:[%s6765_s25 + $0xa18] sm:$0xff] }
 0x27e   : > { %3373 = vmatprep.mubr.f32.mxu1 %v1195_v7  ;;  %v5334_v7 = vpack.c.bf16 %v1510_v63, %v1506_v61  ;;  %v1551_v60 = vld [vmem:[%s6765_s25 + $0xa38] sm:$0xff] }
 0x27f   : > { %v891_v61 = vld [vmem:[%s6757_s10 + $0x198] sm:$0xff] }
 0x280   : > { %2027 = vmatmul.mubr.f32.gmra.mrb[118].mxu0 %v1194_v8 }
 0x281   : > { %3374 = vmatmul.mubr.f32.gmra.mrb[118].mxu1 %v1194_v8  ;;  %2032 = vmatprep.mubr.f32.mxu0 %v1201_v9  ;;  %v5144_v8 = vpack.c.bf16 %v1517_v1, %v1513_v0  ;;  %v1544_v1 = vld [vmem:[%s6765_s25 + $0xa00] sm:$0xff] }
 0x282   : > { %3379 = vmatprep.mubr.f32.mxu1 %v1201_v9  ;;  %v1512_v9 = vld [vmem:[%s6765_s25 + $0x900] sm:$0xff] }
 0x284   : > { %2033 = vmatmul.mubr.f32.gmra.mrb[120].mxu0 %v1200_v10 }
 0x285   : > { %3380 = vmatmul.mubr.f32.gmra.mrb[120].mxu1 %v1200_v10  ;;  %2038 = vmatprep.mubr.f32.mxu0 %v1207_v11  ;;  %v1516_v10 = vld [vmem:[%s6765_s25 + $0x920] sm:$0xff] }
 0x286   : > { %3385 = vmatprep.mubr.f32.mxu1 %v1207_v11  ;;  %v1514_v11 = vld [vmem:[%s6765_s25 + $0x910] sm:$0xff]  ;;  %v5146_v20 = vpack.c.bf16 %v1516_v10, %v1512_v9  ;;  %v1555_v9 = vld [vmem:[%s6765_s25 + $0xa58] sm:$0xff] }
 0x287   : > { %v1559_v10 = vld [vmem:[%s6765_s25 + $0xa78] sm:$0xff] }
 0x288   : > { %2039 = vmatmul.mubr.f32.gmra.mrb[122].mxu0 %v1206_v12 }
 0x289   : > { %3386 = vmatmul.mubr.f32.gmra.mrb[122].mxu1 %v1206_v12  ;;  %2044 = vmatprep.mubr.f32.mxu0 %v1213_v13  ;;  %v5336_v12 = vpack.c.bf16 %v1519_v4, %v1515_v3  ;;  %v1546_v3 = vld [vmem:[%s6765_s25 + $0xa10] sm:$0xff]  ;;  %v5352_v4 = vpack.c.bf16 %v1551_v60, %v1547_v59  ;;  %v939_v59 = vld [vmem:[%s6757_s10 + $0x318] sm:$0xff] }
 0x28a   : > { %3391 = vmatprep.mubr.f32.mxu1 %v1213_v13  ;;  %v1518_v13 = vld [vmem:[%s6765_s25 + $0x930] sm:$0xff] }
 0x28b   : > { %v5338_v21 = vpack.c.bf16 %v1518_v13, %v1514_v11  ;;  %v897_v11 = vld [vmem:[%s6757_s10 + $0x1c8] sm:$0xff]  ;;  %v938_v60 = vld [vmem:[%s6757_s10 + $0x310] sm:$0xff] }
 0x28c   : > { %2045 = vmatmul.mubr.f32.gmra.mrb[124].mxu0 %v1212_v14 }
 0x28d   : > { %3392 = vmatmul.mubr.f32.gmra.mrb[124].mxu1 %v1212_v14  ;;  %2050 = vmatprep.mubr.f32.mxu0 %v1219_v15  ;;  %v1521_v14 = vld [vmem:[%s6765_s25 + $0x948] sm:$0xff] }
 0x28e   : > { %3397 = vmatprep.mubr.f32.mxu1 %v1219_v15  ;;  %v1525_v15 = vld [vmem:[%s6765_s25 + $0x968] sm:$0xff] }
 0x28f   : > { %v5148_v22 = vpack.c.bf16 %v1525_v15, %v1521_v14  ;;  %v1552_v15 = vld [vmem:[%s6765_s25 + $0xa40] sm:$0xff] }
 0x290   : > { %2051 = vmatmul.mubr.f32.gmra.mrb[126].mxu0 %v1218_v16 }
 0x291   : > { %3398 = vmatmul.mubr.f32.gmra.mrb[126].mxu1 %v1218_v16  ;;  %2121 = vmatprep.mubr.f32.mxu0 %v843_v17  ;;  %v866_v16 = vld [vmem:[%s6757_s10 + $0xd0] sm:$0xff] }
 0x292   : > { %3468 = vmatprep.mubr.f32.mxu1 %v843_v17  ;;  %v1523_v17 = vld [vmem:[%s6765_s25 + $0x958] sm:$0xff] }
 0x293   : > { %v5340_v26 = vpack.c.bf16 %v1527_v18, %v1523_v17  ;;  %v1554_v17 = vld [vmem:[%s6765_s25 + $0xa50] sm:$0xff]  ;;  %v5356_v18 = vpack.c.bf16 %v1559_v10, %v1555_v9 }
 0x294   : > { %2122 = vmatmul.mubr.f32.vlgmr.msra.gmra.mrb[0].mxu0 %v842_v24  ;;  %v1582_v9 = vld [vmem:[%s6765_s25 + $0xb30] sm:$0xff] }
 0x295   : > { %3469 = vmatmul.mubr.f32.vlgmr.msra.gmra.mrb[0].mxu1 %v842_v24  ;;  %5131 = vmatpush1.bf16.msra.mxu0 %v5130_v25  ;;  %v1524_v24 = vld [vmem:[%s6765_s25 + $0x960] sm:$0xff]  ;;  %v1522_v25 = vld [vmem:[%s6765_s25 + $0x950] sm:$0xff] }
 0x296   : > { %5323 = vmatpush1.bf16.msra.mxu1 %v5322_v28  ;;  %2127 = vmatprep.mubr.f32.mxu0 %v849_v29  ;;  %v1529_v28 = vld [vmem:[%s6765_s25 + $0x988] sm:$0xff]  ;;  %v5342_v35 = vpack.c.bf16 %v1526_v27, %v1522_v25  ;;  %v903_v25 = vld [vmem:[%s6757_s10 + $0x1f8] sm:$0xff] }
 0x297   : > { %3474 = vmatprep.mubr.f32.mxu1 %v849_v29  ;;  %5133 = vmatprep.subr.bf16.mxu0 %v5132_v30  ;;  %v1533_v29 = vld [vmem:[%s6765_s25 + $0x9a8] sm:$0xff]  ;;  %v872_v30 = vld [vmem:[%s6757_s10 + $0x100] sm:$0xff] }
 0x298   : > { %2128 = vmatmul.mubr.f32.gmra.mrb[2].mxu0 %v848_v38  ;;  %5325 = vmatprep.subr.bf16.mxu1 %v5324_v34  ;;  %v5150_v34 = vpack.c.bf16 %v1524_v24, %v1520_v23  ;;  %v5152_v36 = vpack.c.bf16 %v1533_v29, %v1529_v28  ;;  %v1563_v23 = vld [vmem:[%s6765_s25 + $0xa98] sm:$0xff]  ;;  %v1560_v29 = vld [vmem:[%s6765_s25 + $0xa80] sm:$0xff] }
 0x299   : > { %3475 = vmatmul.mubr.f32.gmra.mrb[2].mxu1 %v848_v38  ;;  %2133 = vmatprep.mubr.f32.mxu0 %v855_v41  ;;  %v1532_v38 = vld [vmem:[%s6765_s25 + $0x9a0] sm:$0xff]  ;;  %v1567_v24 = vld [vmem:[%s6765_s25 + $0xab8] sm:$0xff] }
 0x29a   : > { %3480 = vmatprep.mubr.f32.mxu1 %v855_v41  ;;  %5135 = vmatpush1.bf16.msra.mxu0 %v5134_v42  ;;  %v1534_v41 = vld [vmem:[%s6765_s25 + $0x9b0] sm:$0xff]  ;;  %v1537_v42 = vld [vmem:[%s6765_s25 + $0x9c8] sm:$0xff]  ;;  %v5360_v31 = vpack.c.bf16 %v1567_v24, %v1563_v23  ;;  %v1587_v23 = vld [vmem:[%s6765_s25 + $0xb58] sm:$0xff] }
 0x29b   : > { %5327 = vmatpush1.bf16.msra.mxu1 %v5326_v43  ;;  %5137 = vmatprep.subr.bf16.mxu0 %v5136_v44  ;;  %v1541_v43 = vld [vmem:[%s6765_s25 + $0x9e8] sm:$0xff]  ;;  %v878_v44 = vld [vmem:[%s6757_s10 + $0x130] sm:$0xff]  ;;  %v5346_v49 = vpack.c.bf16 %v1534_v41, %v1530_v39  ;;  %v915_v39 = vld [vmem:[%s6757_s10 + $0x258] sm:$0xff] }
 0x29c   : > { %2134 = vmatmul.mubr.f32.gmra.mrb[4].mxu0 %v854_v52  ;;  %5329 = vmatprep.subr.bf16.mxu1 %v5328_v48  ;;  %v5154_v48 = vpack.c.bf16 %v1532_v38, %v1528_v37  ;;  %v5156_v50 = vpack.c.bf16 %v1541_v43, %v1537_v42  ;;  %v908_v38 = vld [vmem:[%s6757_s10 + $0x220] sm:$0xff]  ;;  %v921_v41 = vld [vmem:[%s6757_s10 + $0x288] sm:$0xff]  ;;  %v927_v43 = vld [vmem:[%s6757_s10 + $0x2b8] sm:$0xff] }
 0x29d   : > { %3481 = vmatmul.mubr.f32.gmra.mrb[4].mxu1 %v854_v52  ;;  %2139 = vmatprep.mubr.f32.mxu0 %v861_v55  ;;  %v1540_v52 = vld [vmem:[%s6765_s25 + $0x9e0] sm:$0xff]  ;;  %v1591_v24 = vld [vmem:[%s6765_s25 + $0xb78] sm:$0xff] }
 0x29e   : > { %3486 = vmatprep.mubr.f32.mxu1 %v861_v55  ;;  %5139 = vmatpush1.bf16.msra.mxu0 %v5138_v56  ;;  %v1542_v55 = vld [vmem:[%s6765_s25 + $0x9f0] sm:$0xff]  ;;  %v1545_v56 = vld [vmem:[%s6765_s25 + $0xa08] sm:$0xff]  ;;  %v920_v42 = vld [vmem:[%s6757_s10 + $0x280] sm:$0xff] }
 0x29f   : > { %5331 = vmatpush1.bf16.msra.mxu1 %v5330_v57  ;;  %5141 = vmatprep.subr.bf16.mxu0 %v5140_v58  ;;  %v1549_v57 = vld [vmem:[%s6765_s25 + $0xa28] sm:$0xff]  ;;  %v884_v58 = vld [vmem:[%s6757_s10 + $0x160] sm:$0xff]  ;;  %v5350_v63 = vpack.c.bf16 %v1542_v55, %v1538_v53  ;;  %v1574_v53 = vld [vmem:[%s6765_s25 + $0xaf0] sm:$0xff] }
 0x2a0   : > { %2140 = vmatmul.mubr.f32.gmra.mrb[6].mxu0 %v860_v2  ;;  %5333 = vmatprep.subr.bf16.mxu1 %v5332_v62  ;;  %v5158_v62 = vpack.c.bf16 %v1540_v52, %v1536_v51  ;;  %v5160_v0 = vpack.c.bf16 %v1549_v57, %v1545_v56  ;;  %v1572_v51 = vld [vmem:[%s6765_s25 + $0xae0] sm:$0xff]  ;;  %v1570_v52 = vld [vmem:[%s6765_s25 + $0xad0] sm:$0xff]  ;;  %v933_v57 = vld [vmem:[%s6757_s10 + $0x2e8] sm:$0xff] }
 0x2a1   : > { %3487 = vmatmul.mubr.f32.gmra.mrb[6].mxu1 %v860_v2  ;;  %2145 = vmatprep.mubr.f32.mxu0 %v867_v5  ;;  %v1548_v2 = vld [vmem:[%s6765_s25 + $0xa20] sm:$0xff]  ;;  %v5366_v55 = vpack.c.bf16 %v1574_v53, %v1570_v52  ;;  %v926_v56 = vld [vmem:[%s6757_s10 + $0x2b0] sm:$0xff]  ;;  %v1005_v53 = vld [vmem:[%s6757_s10 + $0x528] sm:$0xff] }
 0x2a2   : > { %3492 = vmatprep.mubr.f32.mxu1 %v867_v5  ;;  %5143 = vmatpush1.bf16.msra.mxu0 %v5142_v6  ;;  %v1550_v5 = vld [vmem:[%s6765_s25 + $0xa30] sm:$0xff]  ;;  %v1553_v6 = vld [vmem:[%s6765_s25 + $0xa48] sm:$0xff] }
 0x2a3   : > { %5335 = vmatpush1.bf16.msra.mxu1 %v5334_v7  ;;  %5145 = vmatprep.subr.bf16.mxu0 %v5144_v8  ;;  %v1557_v7 = vld [vmem:[%s6765_s25 + $0xa68] sm:$0xff]  ;;  %v890_v8 = vld [vmem:[%s6757_s10 + $0x190] sm:$0xff]  ;;  %v5354_v13 = vpack.c.bf16 %v1550_v5, %v1546_v3  ;;  %v1579_v3 = vld [vmem:[%s6765_s25 + $0xb18] sm:$0xff] }
 0x2a4   : > { %2146 = vmatmul.mubr.f32.gmra.mrb[8].mxu0 %v866_v16  ;;  %5337 = vmatprep.subr.bf16.mxu1 %v5336_v12  ;;  %v5162_v12 = vpack.c.bf16 %v1548_v2, %v1544_v1  ;;  %v5164_v14 = vpack.c.bf16 %v1557_v7, %v1553_v6  ;;  %v1581_v1 = vld [vmem:[%s6765_s25 + $0xb28] sm:$0xff]  ;;  %v1576_v5 = vld [vmem:[%s6765_s25 + $0xb00] sm:$0xff]  ;;  %v998_v52 = vld [vmem:[%s6757_s10 + $0x4f0] sm:$0xff] }
 0x2a5   : > { %3493 = vmatmul.mubr.f32.gmra.mrb[8].mxu1 %v866_v16  ;;  %2151 = vmatprep.mubr.f32.mxu0 %v873_v19  ;;  %v1556_v16 = vld [vmem:[%s6765_s25 + $0xa60] sm:$0xff] }
 0x2a6   : > { %3498 = vmatprep.mubr.f32.mxu1 %v873_v19  ;;  %5147 = vmatpush1.bf16.msra.mxu0 %v5146_v20  ;;  %v1558_v19 = vld [vmem:[%s6765_s25 + $0xa70] sm:$0xff]  ;;  %v1561_v20 = vld [vmem:[%s6765_s25 + $0xa88] sm:$0xff]  ;;  %v1580_v7 = vld [vmem:[%s6765_s25 + $0xb20] sm:$0xff] }
 0x2a7   : > { %5339 = vmatpush1.bf16.msra.mxu1 %v5338_v21  ;;  %5149 = vmatprep.subr.bf16.mxu0 %v5148_v22  ;;  %v1565_v21 = vld [vmem:[%s6765_s25 + $0xaa8] sm:$0xff]  ;;  %v896_v22 = vld [vmem:[%s6757_s10 + $0x1c0] sm:$0xff]  ;;  %v5358_v27 = vpack.c.bf16 %v1558_v19, %v1554_v17  ;;  %v5178_v10 = vpack.c.bf16 %v1580_v7, %v1576_v5  ;;  %v975_v19 = vld [vmem:[%s6757_s10 + $0x438] sm:$0xff] }
 0x2a8   : > { %2152 = vmatmul.mubr.f32.gmra.mrb[10].mxu0 %v872_v30  ;;  %5341 = vmatprep.subr.bf16.mxu1 %v5340_v26  ;;  %v5166_v26 = vpack.c.bf16 %v1556_v16, %v1552_v15  ;;  %v5168_v28 = vpack.c.bf16 %v1565_v21, %v1561_v20  ;;  %v963_v15 = vld [vmem:[%s6757_s10 + $0x3d8] sm:$0xff]  ;;  %v962_v16 = vld [vmem:[%s6757_s10 + $0x3d0] sm:$0xff]  ;;  %v969_v17 = vld [vmem:[%s6757_s10 + $0x408] sm:$0xff] }
 0x2a9   : > { %3499 = vmatmul.mubr.f32.gmra.mrb[10].mxu1 %v872_v30  ;;  %2157 = vmatprep.mubr.f32.mxu0 %v879_v33  ;;  %v1564_v30 = vld [vmem:[%s6765_s25 + $0xaa0] sm:$0xff]  ;;  %v1585_v20 = vld [vmem:[%s6765_s25 + $0xb48] sm:$0xff]  ;;  %v1606_v5 = vld [vmem:[%s6765_s25 + $0xbf0] sm:$0xff] }
 0x2aa   : > { %3504 = vmatprep.mubr.f32.mxu1 %v879_v33  ;;  %5151 = vmatpush1.bf16.msra.mxu0 %v5150_v34  ;;  %v1566_v33 = vld [vmem:[%s6765_s25 + $0xab0] sm:$0xff]  ;;  %v1589_v21 = vld [vmem:[%s6765_s25 + $0xb68] sm:$0xff] }
 0x2ab   : > { %5343 = vmatpush1.bf16.msra.mxu1 %v5342_v35  ;;  %5153 = vmatprep.subr.bf16.mxu0 %v5152_v36  ;;  %v902_v34 = vld [vmem:[%s6757_s10 + $0x1f0] sm:$0xff]  ;;  %v909_v35 = vld [vmem:[%s6757_s10 + $0x228] sm:$0xff]  ;;  %v5170_v36 = vpack.c.bf16 %v1564_v30, %v1560_v29  ;;  %v5362_v37 = vpack.c.bf16 %v1566_v33, %v1562_v32 }
 0x2ac   : > { %2158 = vmatmul.mubr.f32.gmra.mrb[12].mxu0 %v878_v44  ;;  %5345 = vmatprep.subr.bf16.mxu1 %v5344_v40  ;;  %v914_v40 = vld [vmem:[%s6757_s10 + $0x250] sm:$0xff]  ;;  %v981_v33 = vld [vmem:[%s6757_s10 + $0x468] sm:$0xff] }
 0x2ad   : > { %3505 = vmatmul.mubr.f32.gmra.mrb[12].mxu1 %v878_v44  ;;  %2163 = vmatprep.mubr.f32.mxu0 %v885_v47  ;;  %v1569_v44 = vld [vmem:[%s6765_s25 + $0xac8] sm:$0xff]  ;;  %v1590_v29 = vld [vmem:[%s6765_s25 + $0xb70] sm:$0xff] }
 0x2ae   : > { %3510 = vmatprep.mubr.f32.mxu1 %v885_v47  ;;  %5155 = vmatpush1.bf16.msra.mxu0 %v5154_v48  ;;  %v5172_v46 = vpack.c.bf16 %v1573_v45, %v1569_v44  ;;  %v1571_v47 = vld [vmem:[%s6765_s25 + $0xad8] sm:$0xff]  ;;  %v974_v32 = vld [vmem:[%s6757_s10 + $0x430] sm:$0xff]  ;;  %v1592_v45 = vld [vmem:[%s6765_s25 + $0xb80] sm:$0xff] }
 0x2af   : > { %5347 = vmatpush1.bf16.msra.mxu1 %v5346_v49  ;;  %5157 = vmatprep.subr.bf16.mxu0 %v5156_v50  ;;  %v1575_v48 = vld [vmem:[%s6765_s25 + $0xaf8] sm:$0xff]  ;;  %v1568_v49 = vld [vmem:[%s6765_s25 + $0xac0] sm:$0xff] }
 0x2b0   : > { %2164 = vmatmul.mubr.f32.gmra.mrb[14].mxu0 %v884_v58  ;;  %5349 = vmatprep.subr.bf16.mxu1 %v5348_v54  ;;  %v5364_v50 = vpack.c.bf16 %v1575_v48, %v1571_v47  ;;  %v5174_v54 = vpack.c.bf16 %v1572_v51, %v1568_v49  ;;  %v1599_v44 = vld [vmem:[%s6765_s25 + $0xbb8] sm:$0xff]  ;;  %v1596_v47 = vld [vmem:[%s6765_s25 + $0xba0] sm:$0xff]  ;;  %v1594_v48 = vld [vmem:[%s6765_s25 + $0xb90] sm:$0xff] }
 0x2b1   : > { %3511 = vmatmul.mubr.f32.gmra.mrb[14].mxu1 %v884_v58  ;;  %2169 = vmatprep.mubr.f32.mxu0 %v891_v61  ;;  %v932_v58 = vld [vmem:[%s6757_s10 + $0x2e0] sm:$0xff]  ;;  %v1598_v49 = vld [vmem:[%s6765_s25 + $0xbb0] sm:$0xff] }
 0x2b2   : > { %3516 = vmatprep.mubr.f32.mxu1 %v891_v61  ;;  %5159 = vmatpush1.bf16.msra.mxu0 %v5158_v62  ;;  %v945_v61 = vld [vmem:[%s6757_s10 + $0x348] sm:$0xff]  ;;  %v944_v62 = vld [vmem:[%s6757_s10 + $0x340] sm:$0xff]  ;;  %v5378_v51 = vpack.c.bf16 %v1598_v49, %v1594_v48  ;;  %v1142_v48 = vld [vmem:[%s6757_s10 + $0x970] sm:$0xff] }
 0x2b3   : > { %5351 = vmatpush1.bf16.msra.mxu1 %v5350_v63  ;;  %5161 = vmatprep.subr.bf16.mxu0 %v5160_v0  ;;  %v951_v63 = vld [vmem:[%s6757_s10 + $0x378] sm:$0xff]  ;;  %v1577_v0 = vld [vmem:[%s6765_s25 + $0xb08] sm:$0xff] }
 0x2b4   : > { %2170 = vmatmul.mubr.f32.gmra.mrb[16].mxu0 %v890_v8  ;;  %5353 = vmatprep.subr.bf16.mxu1 %v5352_v4  ;;  %v5176_v2 = vpack.c.bf16 %v1581_v1, %v1577_v0  ;;  %v1583_v4 = vld [vmem:[%s6765_s25 + $0xb38] sm:$0xff]  ;;  %v1600_v1 = vld [vmem:[%s6765_s25 + $0xbc0] sm:$0xff]  ;;  %v1149_v49 = vld [vmem:[%s6757_s10 + $0x9a8] sm:$0xff] }
 0x2b5   : > { %3517 = vmatmul.mubr.f32.gmra.mrb[16].mxu1 %v890_v8  ;;  %2175 = vmatprep.mubr.f32.mxu0 %v897_v11  ;;  %v5368_v6 = vpack.c.bf16 %v1583_v4, %v1579_v3  ;;  %v1578_v8 = vld [vmem:[%s6765_s25 + $0xb10] sm:$0xff]  ;;  %v1607_v0 = vld [vmem:[%s6765_s25 + $0xbf8] sm:$0xff]  ;;  %v1604_v3 = vld [vmem:[%s6765_s25 + $0xbe0] sm:$0xff] }
 0x2b6   : > { %3522 = vmatprep.mubr.f32.mxu1 %v897_v11  ;;  %5163 = vmatpush1.bf16.msra.mxu0 %v5162_v12  ;;  %v5370_v11 = vpack.c.bf16 %v1582_v9, %v1578_v8  ;;  %v950_v12 = vld [vmem:[%s6757_s10 + $0x370] sm:$0xff]  ;;  %v1029_v9 = vld [vmem:[%s6757_s10 + $0x5e8] sm:$0xff] }
 0x2b7   : > { %5355 = vmatpush1.bf16.msra.mxu1 %v5354_v13  ;;  %5165 = vmatprep.subr.bf16.mxu0 %v5164_v14  ;;  %v957_v13 = vld [vmem:[%s6757_s10 + $0x3a8] sm:$0xff]  ;;  %v956_v14 = vld [vmem:[%s6757_s10 + $0x3a0] sm:$0xff]  ;;  %v1602_v4 = vld [vmem:[%s6765_s25 + $0xbd0] sm:$0xff] }
 0x2b8   : > { %2176 = vmatmul.mubr.f32.gmra.mrb[18].mxu0 %v896_v22  ;;  %5357 = vmatprep.subr.bf16.mxu1 %v5356_v18  ;;  %v968_v18 = vld [vmem:[%s6757_s10 + $0x400] sm:$0xff]  ;;  %v5382_v7 = vpack.c.bf16 %v1606_v5, %v1602_v4  ;;  %v1022_v8 = vld [vmem:[%s6757_s10 + $0x5b0] sm:$0xff]  ;;  %v1209_v5 = vld [vmem:[%s6757_s10 + $0xb88] sm:$0xff] }
 0x2b9   : > { %3523 = vmatmul.mubr.f32.gmra.mrb[18].mxu1 %v896_v22  ;;  %2181 = vmatprep.mubr.f32.mxu0 %v903_v25  ;;  %v5180_v22 = vpack.c.bf16 %v1589_v21, %v1585_v20  ;;  %v1058_v20 = vld [vmem:[%s6757_s10 + $0x6d0] sm:$0xff]  ;;  %v1065_v21 = vld [vmem:[%s6757_s10 + $0x708] sm:$0xff] }
 0x2ba   : > { %3528 = vmatprep.mubr.f32.mxu1 %v903_v25  ;;  %5167 = vmatpush1.bf16.msra.mxu0 %v5166_v26  ;;  %v1584_v25 = vld [vmem:[%s6765_s25 + $0xb40] sm:$0xff]  ;;  %v5372_v26 = vpack.c.bf16 %v1591_v24, %v1587_v23  ;;  %v1071_v23 = vld [vmem:[%s6757_s10 + $0x738] sm:$0xff]  ;;  %v1070_v24 = vld [vmem:[%s6757_s10 + $0x730] sm:$0xff] }
 0x2bb   : > { %5359 = vmatpush1.bf16.msra.mxu1 %v5358_v27  ;;  %5169 = vmatprep.subr.bf16.mxu0 %v5168_v28  ;;  %v1588_v27 = vld [vmem:[%s6765_s25 + $0xb60] sm:$0xff]  ;;  %v1586_v28 = vld [vmem:[%s6765_s25 + $0xb50] sm:$0xff] }
 0x2bc   : > { %2182 = vmatmul.mubr.f32.gmra.mrb[20].mxu0 %v902_v34  ;;  %5361 = vmatprep.subr.bf16.mxu1 %v5360_v31  ;;  %v5182_v30 = vpack.c.bf16 %v1588_v27, %v1584_v25  ;;  %v5374_v31 = vpack.c.bf16 %v1590_v29, %v1586_v28  ;;  %v1077_v25 = vld [vmem:[%s6757_s10 + $0x768] sm:$0xff]  ;;  %v1083_v27 = vld [vmem:[%s6757_s10 + $0x798] sm:$0xff]  ;;  %v1082_v28 = vld [vmem:[%s6757_s10 + $0x790] sm:$0xff] }
 0x2bd   : > { %3529 = vmatmul.mubr.f32.gmra.mrb[20].mxu1 %v902_v34  ;;  %2187 = vmatprep.mubr.f32.mxu0 %v909_v35  ;;  %v980_v34 = vld [vmem:[%s6757_s10 + $0x460] sm:$0xff]  ;;  %v1089_v29 = vld [vmem:[%s6757_s10 + $0x7c8] sm:$0xff]  ;;  %v1202_v4 = vld [vmem:[%s6757_s10 + $0xb50] sm:$0xff] }
 0x2be   : > { %3534 = vmatprep.mubr.f32.mxu1 %v909_v35  ;;  %5171 = vmatpush1.bf16.msra.mxu0 %v5170_v36  ;;  %v987_v35 = vld [vmem:[%s6757_s10 + $0x498] sm:$0xff]  ;;  %v986_v36 = vld [vmem:[%s6757_s10 + $0x490] sm:$0xff] }
 0x2bf   : > { %5363 = vmatpush1.bf16.msra.mxu1 %v5362_v37  ;;  %5173 = vmatprep.subr.bf16.mxu0 %v5172_v46  ;;  %v993_v37 = vld [vmem:[%s6757_s10 + $0x4c8] sm:$0xff] }
 0x2c0   : > { %2188 = vmatmul.mubr.f32.gmra.mrb[22].mxu0 %v908_v38  ;;  %5365 = vmatprep.subr.bf16.mxu1 %v5364_v50  ;;  %v5186_v50 = vpack.c.bf16 %v1596_v47, %v1592_v45  ;;  %v1137_v45 = vld [vmem:[%s6757_s10 + $0x948] sm:$0xff]  ;;  %v1143_v47 = vld [vmem:[%s6757_s10 + $0x978] sm:$0xff] }
 0x2c1   : > { %3535 = vmatmul.mubr.f32.gmra.mrb[22].mxu1 %v908_v38  ;;  %2193 = vmatprep.mubr.f32.mxu0 %v915_v39  ;;  %v992_v38 = vld [vmem:[%s6757_s10 + $0x4c0] sm:$0xff] }
 0x2c2   : > { %3540 = vmatprep.mubr.f32.mxu1 %v915_v39  ;;  %5175 = vmatpush1.bf16.msra.mxu0 %v5174_v54  ;;  %v999_v39 = vld [vmem:[%s6757_s10 + $0x4f8] sm:$0xff]  ;;  %v1004_v54 = vld [vmem:[%s6757_s10 + $0x520] sm:$0xff] }
 0x2c3   : > { %5367 = vmatpush1.bf16.msra.mxu1 %v5366_v55  ;;  %5177 = vmatprep.subr.bf16.mxu0 %v5176_v2  ;;  %v1011_v55 = vld [vmem:[%s6757_s10 + $0x558] sm:$0xff] }
 0x2c4   : > { %2194 = vmatmul.mubr.f32.gmra.mrb[24].mxu0 %v914_v40  ;;  %5369 = vmatprep.subr.bf16.mxu1 %v5368_v6  ;;  %v5190_v6 = vpack.c.bf16 %v1604_v3, %v1600_v1  ;;  %v1197_v1 = vld [vmem:[%s6757_s10 + $0xb28] sm:$0xff]  ;;  %v1203_v3 = vld [vmem:[%s6757_s10 + $0xb58] sm:$0xff] }
 0x2c5   : > { %3541 = vmatmul.mubr.f32.gmra.mrb[24].mxu1 %v914_v40  ;;  %2199 = vmatprep.mubr.f32.mxu0 %v921_v41  ;;  %v1593_v40 = vld [vmem:[%s6765_s25 + $0xb88] sm:$0xff] }
 0x2c6   : > { %3546 = vmatprep.mubr.f32.mxu1 %v921_v41  ;;  %5179 = vmatpush1.bf16.msra.mxu0 %v5178_v10  ;;  %v1597_v41 = vld [vmem:[%s6765_s25 + $0xba8] sm:$0xff]  ;;  %v1028_v10 = vld [vmem:[%s6757_s10 + $0x5e0] sm:$0xff] }
 0x2c7   : > { %5371 = vmatpush1.bf16.msra.mxu1 %v5370_v11  ;;  %5181 = vmatprep.subr.bf16.mxu0 %v5180_v22  ;;  %v1035_v11 = vld [vmem:[%s6757_s10 + $0x618] sm:$0xff]  ;;  %v1064_v22 = vld [vmem:[%s6757_s10 + $0x700] sm:$0xff] }
 0x2c8   : > { %2200 = vmatmul.mubr.f32.gmra.mrb[26].mxu0 %v920_v42  ;;  %5373 = vmatprep.subr.bf16.mxu1 %v5372_v26  ;;  %v1076_v26 = vld [vmem:[%s6757_s10 + $0x760] sm:$0xff] }
 0x2c9   : > { %3547 = vmatmul.mubr.f32.gmra.mrb[26].mxu1 %v920_v42  ;;  %2205 = vmatprep.mubr.f32.mxu0 %v927_v43  ;;  %v5184_v42 = vpack.c.bf16 %v1597_v41, %v1593_v40  ;;  %v1118_v40 = vld [vmem:[%s6757_s10 + $0x8b0] sm:$0xff]  ;;  %v1125_v41 = vld [vmem:[%s6757_s10 + $0x8e8] sm:$0xff] }
 0x2ca   : > { %3552 = vmatprep.mubr.f32.mxu1 %v927_v43  ;;  %5183 = vmatpush1.bf16.msra.mxu0 %v5182_v30  ;;  %v1595_v43 = vld [vmem:[%s6765_s25 + $0xb98] sm:$0xff]  ;;  %v1088_v30 = vld [vmem:[%s6757_s10 + $0x7c0] sm:$0xff] }
 0x2cb   : > { %5375 = vmatpush1.bf16.msra.mxu1 %v5374_v31  ;;  %v5376_v46 = vpack.c.bf16 %v1599_v44, %v1595_v43  ;;  %5185 = vmatprep.subr.bf16.mxu0 %v5184_v42  ;;  %v1095_v31 = vld [vmem:[%s6757_s10 + $0x7f8] sm:$0xff]  ;;  %v1124_v42 = vld [vmem:[%s6757_s10 + $0x8e0] sm:$0xff]  ;;  %v1130_v44 = vld [vmem:[%s6757_s10 + $0x910] sm:$0xff] }
 0x2cc   : > { %2206 = vmatmul.mubr.f32.gmra.mrb[28].mxu0 %v926_v56  ;;  %v1131_v43 = vld [vmem:[%s6757_s10 + $0x918] sm:$0xff] }
 0x2cd   : > { %3553 = vmatmul.mubr.f32.gmra.mrb[28].mxu1 %v926_v56  ;;  %2211 = vmatprep.mubr.f32.mxu0 %v933_v57  ;;  %v1010_v56 = vld [vmem:[%s6757_s10 + $0x550] sm:$0xff] }
 0x2ce   : > { %3558 = vmatprep.mubr.f32.mxu1 %v933_v57  ;;  %5377 = vmatprep.subr.bf16.mxu1 %v5376_v46  ;;  %v1017_v57 = vld [vmem:[%s6757_s10 + $0x588] sm:$0xff]  ;;  %v1136_v46 = vld [vmem:[%s6757_s10 + $0x940] sm:$0xff] }
 0x2cf   : > { %5187 = vmatpush1.bf16.msra.mxu0 %v5186_v50  ;;  %5379 = vmatpush1.bf16.msra.mxu1 %v5378_v51  ;;  %v1148_v50 = vld [vmem:[%s6757_s10 + $0x9a0] sm:$0xff]  ;;  %v1155_v51 = vld [vmem:[%s6757_s10 + $0x9d8] sm:$0xff] }
 0x2d0   : > { %2212 = vmatmul.mubr.f32.gmra.mrb[30].mxu0 %v932_v58 }
 0x2d1   : > { %3559 = vmatmul.mubr.f32.gmra.mrb[30].mxu1 %v932_v58  ;;  %2217 = vmatprep.mubr.f32.mxu0 %v939_v59  ;;  %v1016_v58 = vld [vmem:[%s6757_s10 + $0x580] sm:$0xff] }
 0x2d2   : > { %3564 = vmatprep.mubr.f32.mxu1 %v939_v59  ;;  %v1023_v59 = vld [vmem:[%s6757_s10 + $0x5b8] sm:$0xff] }
 0x2d4   : > { %2218 = vmatmul.mubr.f32.gmra.mrb[32].mxu0 %v938_v60 }
 0x2d5   : > { %3565 = vmatmul.mubr.f32.gmra.mrb[32].mxu1 %v938_v60  ;;  %2223 = vmatprep.mubr.f32.mxu0 %v945_v61  ;;  %v1601_v60 = vld [vmem:[%s6765_s25 + $0xbc8] sm:$0xff] }
 0x2d6   : > { %3570 = vmatprep.mubr.f32.mxu1 %v945_v61  ;;  %v1605_v61 = vld [vmem:[%s6765_s25 + $0xbe8] sm:$0xff] }
 0x2d8   : > { %2224 = vmatmul.mubr.f32.gmra.mrb[34].mxu0 %v944_v62 }
 0x2d9   : > { %3571 = vmatmul.mubr.f32.gmra.mrb[34].mxu1 %v944_v62  ;;  %2229 = vmatprep.mubr.f32.mxu0 %v951_v63  ;;  %v5188_v62 = vpack.c.bf16 %v1605_v61, %v1601_v60  ;;  %v1178_v60 = vld [vmem:[%s6757_s10 + $0xa90] sm:$0xff]  ;;  %v1185_v61 = vld [vmem:[%s6757_s10 + $0xac8] sm:$0xff] }
 0x2da   : > { %3576 = vmatprep.mubr.f32.mxu1 %v951_v63  ;;  %v1603_v63 = vld [vmem:[%s6765_s25 + $0xbd8] sm:$0xff]  ;;  %s8768_s25 = sld [smem:[#allocation33_spill]] }
 0x2db   : > { %v5380_v2 = vpack.c.bf16 %v1607_v0, %v1603_v63  ;;  %5189 = vmatprep.subr.bf16.mxu0 %v5188_v62  ;;  %v1184_v62 = vld [vmem:[%s6757_s10 + $0xac0] sm:$0xff]  ;;  %v1191_v63 = vld [vmem:[%s6757_s10 + $0xaf8] sm:$0xff]  ;;  %v1190_v0 = vld [vmem:[%s6757_s10 + $0xaf0] sm:$0xff] }
 0x2dc   : > { %2230 = vmatmul.mubr.f32.gmra.mrb[36].mxu0 %v950_v12 }
 0x2dd   : > { %3577 = vmatmul.mubr.f32.gmra.mrb[36].mxu1 %v950_v12  ;;  %2235 = vmatprep.mubr.f32.mxu0 %v957_v13  ;;  %v1034_v12 = vld [vmem:[%s6757_s10 + $0x610] sm:$0xff] }
 0x2de   : > { %3582 = vmatprep.mubr.f32.mxu1 %v957_v13  ;;  %5381 = vmatprep.subr.bf16.mxu1 %v5380_v2  ;;  %v1041_v13 = vld [vmem:[%s6757_s10 + $0x648] sm:$0xff]  ;;  %v1196_v2 = vld [vmem:[%s6757_s10 + $0xb20] sm:$0xff] }
 0x2df   : > { %5191 = vmatpush1.bf16.msra.mxu0 %v5190_v6  ;;  %5383 = vmatpush1.bf16.msra.mxu1 %v5382_v7  ;;  %v1208_v6 = vld [vmem:[%s6757_s10 + $0xb80] sm:$0xff]  ;;  %v1215_v7 = vld [vmem:[%s6757_s10 + $0xbb8] sm:$0xff] }
 0x2e0   : > { %2236 = vmatmul.mubr.f32.gmra.mrb[38].mxu0 %v956_v14  ;;  %s8769_s3 = smov %s8768_s25 }
 0x2e1   : > { %3583 = vmatmul.mubr.f32.gmra.mrb[38].mxu1 %v956_v14  ;;  %2241 = vmatprep.mubr.f32.mxu0 %v963_v15  ;;  %v1040_v14 = vld [vmem:[%s6757_s10 + $0x640] sm:$0xff] }
 0x2e2   : > { %3588 = vmatprep.mubr.f32.mxu1 %v963_v15  ;;  %v1047_v15 = vld [vmem:[%s6757_s10 + $0x678] sm:$0xff] }
 0x2e4   : > { %2242 = vmatmul.mubr.f32.gmra.mrb[40].mxu0 %v962_v16 }
 0x2e5   : > { %3589 = vmatmul.mubr.f32.gmra.mrb[40].mxu1 %v962_v16  ;;  %2247 = vmatprep.mubr.f32.mxu0 %v969_v17  ;;  %v1046_v16 = vld [vmem:[%s6757_s10 + $0x670] sm:$0xff] }
 0x2e6   : > { %3594 = vmatprep.mubr.f32.mxu1 %v969_v17  ;;  %v1053_v17 = vld [vmem:[%s6757_s10 + $0x6a8] sm:$0xff] }
 0x2e8   : > { %2248 = vmatmul.mubr.f32.gmra.mrb[42].mxu0 %v968_v18 }
 0x2e9   : > { %3595 = vmatmul.mubr.f32.gmra.mrb[42].mxu1 %v968_v18  ;;  %2253 = vmatprep.mubr.f32.mxu0 %v975_v19  ;;  %v1052_v18 = vld [vmem:[%s6757_s10 + $0x6a0] sm:$0xff] }
 0x2ea   : > { %3600 = vmatprep.mubr.f32.mxu1 %v975_v19  ;;  %v1059_v19 = vld [vmem:[%s6757_s10 + $0x6d8] sm:$0xff] }
 0x2ec   : > { %2254 = vmatmul.mubr.f32.gmra.mrb[44].mxu0 %v974_v32 }
 0x2ed   : > { %3601 = vmatmul.mubr.f32.gmra.mrb[44].mxu1 %v974_v32  ;;  %2259 = vmatprep.mubr.f32.mxu0 %v981_v33  ;;  %v1094_v32 = vld [vmem:[%s6757_s10 + $0x7f0] sm:$0xff] }
 0x2ee   : > { %3606 = vmatprep.mubr.f32.mxu1 %v981_v33  ;;  %v1101_v33 = vld [vmem:[%s6757_s10 + $0x828] sm:$0xff] }
 0x2f0   : > { %2260 = vmatmul.mubr.f32.gmra.mrb[46].mxu0 %v980_v34 }
 0x2f1   : > { %3607 = vmatmul.mubr.f32.gmra.mrb[46].mxu1 %v980_v34  ;;  %2265 = vmatprep.mubr.f32.mxu0 %v987_v35  ;;  %v1100_v34 = vld [vmem:[%s6757_s10 + $0x820] sm:$0xff] }
 0x2f2   : > { %3612 = vmatprep.mubr.f32.mxu1 %v987_v35  ;;  %v1107_v35 = vld [vmem:[%s6757_s10 + $0x858] sm:$0xff] }
 0x2f4   : > { %2266 = vmatmul.mubr.f32.gmra.mrb[48].mxu0 %v986_v36 }
 0x2f5   : > { %3613 = vmatmul.mubr.f32.gmra.mrb[48].mxu1 %v986_v36  ;;  %2271 = vmatprep.mubr.f32.mxu0 %v993_v37  ;;  %v1106_v36 = vld [vmem:[%s6757_s10 + $0x850] sm:$0xff] }
 0x2f6   : > { %3618 = vmatprep.mubr.f32.mxu1 %v993_v37  ;;  %v1113_v37 = vld [vmem:[%s6757_s10 + $0x888] sm:$0xff] }
 0x2f8   : > { %2272 = vmatmul.mubr.f32.gmra.mrb[50].mxu0 %v992_v38 }
 0x2f9   : > { %3619 = vmatmul.mubr.f32.gmra.mrb[50].mxu1 %v992_v38  ;;  %2277 = vmatprep.mubr.f32.mxu0 %v999_v39  ;;  %v1112_v38 = vld [vmem:[%s6757_s10 + $0x880] sm:$0xff] }
 0x2fa   : > { %3624 = vmatprep.mubr.f32.mxu1 %v999_v39  ;;  %v1119_v39 = vld [vmem:[%s6757_s10 + $0x8b8] sm:$0xff] }
 0x2fc   : > { %2278 = vmatmul.mubr.f32.gmra.mrb[52].mxu0 %v998_v52 }
 0x2fd   : > { %3625 = vmatmul.mubr.f32.gmra.mrb[52].mxu1 %v998_v52  ;;  %2283 = vmatprep.mubr.f32.mxu0 %v1005_v53  ;;  %v1154_v52 = vld [vmem:[%s6757_s10 + $0x9d0] sm:$0xff] }
 0x2fe   : > { %3630 = vmatprep.mubr.f32.mxu1 %v1005_v53  ;;  %v1161_v53 = vld [vmem:[%s6757_s10 + $0xa08] sm:$0xff] }
 0x300   : > { %2284 = vmatmul.mubr.f32.gmra.mrb[54].mxu0 %v1004_v54 }
 0x301   : > { %3631 = vmatmul.mubr.f32.gmra.mrb[54].mxu1 %v1004_v54  ;;  %2289 = vmatprep.mubr.f32.mxu0 %v1011_v55  ;;  %v1160_v54 = vld [vmem:[%s6757_s10 + $0xa00] sm:$0xff] }
 0x302   : > { %3636 = vmatprep.mubr.f32.mxu1 %v1011_v55  ;;  %v1167_v55 = vld [vmem:[%s6757_s10 + $0xa38] sm:$0xff] }
 0x304   : > { %2290 = vmatmul.mubr.f32.gmra.mrb[56].mxu0 %v1010_v56 }
 0x305   : > { %3637 = vmatmul.mubr.f32.gmra.mrb[56].mxu1 %v1010_v56  ;;  %2295 = vmatprep.mubr.f32.mxu0 %v1017_v57  ;;  %v1166_v56 = vld [vmem:[%s6757_s10 + $0xa30] sm:$0xff] }
 0x306   : > { %3642 = vmatprep.mubr.f32.mxu1 %v1017_v57  ;;  %v1173_v57 = vld [vmem:[%s6757_s10 + $0xa68] sm:$0xff] }
 0x308   : > { %2296 = vmatmul.mubr.f32.gmra.mrb[58].mxu0 %v1016_v58 }
 0x309   : > { %3643 = vmatmul.mubr.f32.gmra.mrb[58].mxu1 %v1016_v58  ;;  %2301 = vmatprep.mubr.f32.mxu0 %v1023_v59  ;;  %v1172_v58 = vld [vmem:[%s6757_s10 + $0xa60] sm:$0xff] }
 0x30a   : > { %3648 = vmatprep.mubr.f32.mxu1 %v1023_v59  ;;  %v1179_v59 = vld [vmem:[%s6757_s10 + $0xa98] sm:$0xff] }
 0x30c   : > { %2302 = vmatmul.mubr.f32.gmra.mrb[60].mxu0 %v1022_v8 }
 0x30d   : > { %3649 = vmatmul.mubr.f32.gmra.mrb[60].mxu1 %v1022_v8  ;;  %2307 = vmatprep.mubr.f32.mxu0 %v1029_v9  ;;  %v1214_v8 = vld [vmem:[%s6757_s10 + $0xbb0] sm:$0xff] }
 0x30e   : > { %3654 = vmatprep.mubr.f32.mxu1 %v1029_v9  ;;  %v1221_v9 = vld [vmem:[%s6757_s10 + $0xbe8] sm:$0xff] }
 0x310   : > { %2308 = vmatmul.mubr.f32.gmra.mrb[62].mxu0 %v1028_v10 }
 0x311   : > { %3655 = vmatmul.mubr.f32.gmra.mrb[62].mxu1 %v1028_v10  ;;  %2313 = vmatprep.mubr.f32.mxu0 %v1035_v11  ;;  %v1220_v10 = vld [vmem:[%s6757_s10 + $0xbe0] sm:$0xff] }
 0x312   : > { %3660 = vmatprep.mubr.f32.mxu1 %v1035_v11  ;;  %v845_v11 = vld [vmem:[%s6757_s10 + $0x28] sm:$0xff] }
 0x314   : > { %2314 = vmatmul.mubr.f32.gmra.mrb[64].mxu0 %v1034_v12 }
 0x315   : > { %3661 = vmatmul.mubr.f32.gmra.mrb[64].mxu1 %v1034_v12  ;;  %2319 = vmatprep.mubr.f32.mxu0 %v1041_v13  ;;  %v844_v12 = vld [vmem:[%s6757_s10 + $0x20] sm:$0xff] }
 0x316   : > { %3666 = vmatprep.mubr.f32.mxu1 %v1041_v13  ;;  %v851_v13 = vld [vmem:[%s6757_s10 + $0x58] sm:$0xff] }
 0x318   : > { %2320 = vmatmul.mubr.f32.gmra.mrb[66].mxu0 %v1040_v14 }
 0x319   : > { %3667 = vmatmul.mubr.f32.gmra.mrb[66].mxu1 %v1040_v14  ;;  %2325 = vmatprep.mubr.f32.mxu0 %v1047_v15  ;;  %v850_v14 = vld [vmem:[%s6757_s10 + $0x50] sm:$0xff] }
 0x31a   : > { %3672 = vmatprep.mubr.f32.mxu1 %v1047_v15  ;;  %v857_v15 = vld [vmem:[%s6757_s10 + $0x88] sm:$0xff] }
 0x31c   : > { %2326 = vmatmul.mubr.f32.gmra.mrb[68].mxu0 %v1046_v16 }
 0x31d   : > { %3673 = vmatmul.mubr.f32.gmra.mrb[68].mxu1 %v1046_v16  ;;  %2331 = vmatprep.mubr.f32.mxu0 %v1053_v17  ;;  %v856_v16 = vld [vmem:[%s6757_s10 + $0x80] sm:$0xff] }
 0x31e   : > { %3678 = vmatprep.mubr.f32.mxu1 %v1053_v17  ;;  %v863_v17 = vld [vmem:[%s6757_s10 + $0xb8] sm:$0xff] }
 0x320   : > { %2332 = vmatmul.mubr.f32.gmra.mrb[70].mxu0 %v1052_v18 }
 0x321   : > { %3679 = vmatmul.mubr.f32.gmra.mrb[70].mxu1 %v1052_v18  ;;  %2337 = vmatprep.mubr.f32.mxu0 %v1059_v19  ;;  %v862_v18 = vld [vmem:[%s6757_s10 + $0xb0] sm:$0xff] }
 0x322   : > { %3684 = vmatprep.mubr.f32.mxu1 %v1059_v19  ;;  %v869_v19 = vld [vmem:[%s6757_s10 + $0xe8] sm:$0xff] }
 0x324   : > { %2338 = vmatmul.mubr.f32.gmra.mrb[72].mxu0 %v1058_v20 }
 0x325   : > { %3685 = vmatmul.mubr.f32.gmra.mrb[72].mxu1 %v1058_v20  ;;  %2343 = vmatprep.mubr.f32.mxu0 %v1065_v21  ;;  %v868_v20 = vld [vmem:[%s6757_s10 + $0xe0] sm:$0xff] }
 0x326   : > { %3690 = vmatprep.mubr.f32.mxu1 %v1065_v21  ;;  %v875_v21 = vld [vmem:[%s6757_s10 + $0x118] sm:$0xff] }
 0x328   : > { %2344 = vmatmul.mubr.f32.gmra.mrb[74].mxu0 %v1064_v22 }
 0x329   : > { %3691 = vmatmul.mubr.f32.gmra.mrb[74].mxu1 %v1064_v22  ;;  %2349 = vmatprep.mubr.f32.mxu0 %v1071_v23  ;;  %v874_v22 = vld [vmem:[%s6757_s10 + $0x110] sm:$0xff] }
 0x32a   : > { %3696 = vmatprep.mubr.f32.mxu1 %v1071_v23  ;;  %v881_v23 = vld [vmem:[%s6757_s10 + $0x148] sm:$0xff] }
 0x32c   : > { %2350 = vmatmul.mubr.f32.gmra.mrb[76].mxu0 %v1070_v24 }
 0x32d   : > { %3697 = vmatmul.mubr.f32.gmra.mrb[76].mxu1 %v1070_v24  ;;  %2355 = vmatprep.mubr.f32.mxu0 %v1077_v25  ;;  %v880_v24 = vld [vmem:[%s6757_s10 + $0x140] sm:$0xff] }
 0x32e   : > { %3702 = vmatprep.mubr.f32.mxu1 %v1077_v25  ;;  %v887_v25 = vld [vmem:[%s6757_s10 + $0x178] sm:$0xff] }
 0x330   : > { %2356 = vmatmul.mubr.f32.gmra.mrb[78].mxu0 %v1076_v26 }
 0x331   : > { %3703 = vmatmul.mubr.f32.gmra.mrb[78].mxu1 %v1076_v26  ;;  %2361 = vmatprep.mubr.f32.mxu0 %v1083_v27  ;;  %v886_v26 = vld [vmem:[%s6757_s10 + $0x170] sm:$0xff] }
 0x332   : > { %3708 = vmatprep.mubr.f32.mxu1 %v1083_v27  ;;  %v893_v27 = vld [vmem:[%s6757_s10 + $0x1a8] sm:$0xff] }
 0x334   : > { %2362 = vmatmul.mubr.f32.gmra.mrb[80].mxu0 %v1082_v28 }
 0x335   : > { %3709 = vmatmul.mubr.f32.gmra.mrb[80].mxu1 %v1082_v28  ;;  %2367 = vmatprep.mubr.f32.mxu0 %v1089_v29  ;;  %v892_v28 = vld [vmem:[%s6757_s10 + $0x1a0] sm:$0xff] }
 0x336   : > { %3714 = vmatprep.mubr.f32.mxu1 %v1089_v29  ;;  %v899_v29 = vld [vmem:[%s6757_s10 + $0x1d8] sm:$0xff] }
 0x338   : > { %2368 = vmatmul.mubr.f32.gmra.mrb[82].mxu0 %v1088_v30 }
 0x339   : > { %3715 = vmatmul.mubr.f32.gmra.mrb[82].mxu1 %v1088_v30  ;;  %2373 = vmatprep.mubr.f32.mxu0 %v1095_v31  ;;  %v898_v30 = vld [vmem:[%s6757_s10 + $0x1d0] sm:$0xff] }
 0x33a   : > { %3720 = vmatprep.mubr.f32.mxu1 %v1095_v31  ;;  %v905_v31 = vld [vmem:[%s6757_s10 + $0x208] sm:$0xff] }
 0x33c   : > { %2374 = vmatmul.mubr.f32.gmra.mrb[84].mxu0 %v1094_v32 }
 0x33d   : > { %3721 = vmatmul.mubr.f32.gmra.mrb[84].mxu1 %v1094_v32  ;;  %2379 = vmatprep.mubr.f32.mxu0 %v1101_v33  ;;  %v904_v32 = vld [vmem:[%s6757_s10 + $0x200] sm:$0xff] }
 0x33e   : > { %3726 = vmatprep.mubr.f32.mxu1 %v1101_v33  ;;  %v911_v33 = vld [vmem:[%s6757_s10 + $0x238] sm:$0xff] }
 0x340   : > { %2380 = vmatmul.mubr.f32.gmra.mrb[86].mxu0 %v1100_v34 }
 0x341   : > { %3727 = vmatmul.mubr.f32.gmra.mrb[86].mxu1 %v1100_v34  ;;  %2385 = vmatprep.mubr.f32.mxu0 %v1107_v35  ;;  %v910_v34 = vld [vmem:[%s6757_s10 + $0x230] sm:$0xff] }
 0x342   : > { %3732 = vmatprep.mubr.f32.mxu1 %v1107_v35  ;;  %v917_v35 = vld [vmem:[%s6757_s10 + $0x268] sm:$0xff] }
 0x344   : > { %2386 = vmatmul.mubr.f32.gmra.mrb[88].mxu0 %v1106_v36 }
 0x345   : > { %3733 = vmatmul.mubr.f32.gmra.mrb[88].mxu1 %v1106_v36  ;;  %2391 = vmatprep.mubr.f32.mxu0 %v1113_v37  ;;  %v916_v36 = vld [vmem:[%s6757_s10 + $0x260] sm:$0xff] }
 0x346   : > { %3738 = vmatprep.mubr.f32.mxu1 %v1113_v37  ;;  %v923_v37 = vld [vmem:[%s6757_s10 + $0x298] sm:$0xff] }
 0x348   : > { %2392 = vmatmul.mubr.f32.gmra.mrb[90].mxu0 %v1112_v38 }
 0x349   : > { %3739 = vmatmul.mubr.f32.gmra.mrb[90].mxu1 %v1112_v38  ;;  %2397 = vmatprep.mubr.f32.mxu0 %v1119_v39  ;;  %v922_v38 = vld [vmem:[%s6757_s10 + $0x290] sm:$0xff] }
 0x34a   : > { %3744 = vmatprep.mubr.f32.mxu1 %v1119_v39  ;;  %v929_v39 = vld [vmem:[%s6757_s10 + $0x2c8] sm:$0xff] }
 0x34c   : > { %2398 = vmatmul.mubr.f32.gmra.mrb[92].mxu0 %v1118_v40 }
 0x34d   : > { %3745 = vmatmul.mubr.f32.gmra.mrb[92].mxu1 %v1118_v40  ;;  %2403 = vmatprep.mubr.f32.mxu0 %v1125_v41  ;;  %v928_v40 = vld [vmem:[%s6757_s10 + $0x2c0] sm:$0xff] }
 0x34e   : > { %3750 = vmatprep.mubr.f32.mxu1 %v1125_v41  ;;  %v935_v41 = vld [vmem:[%s6757_s10 + $0x2f8] sm:$0xff] }
 0x350   : > { %2404 = vmatmul.mubr.f32.gmra.mrb[94].mxu0 %v1124_v42 }
 0x351   : > { %3751 = vmatmul.mubr.f32.gmra.mrb[94].mxu1 %v1124_v42  ;;  %2409 = vmatprep.mubr.f32.mxu0 %v1131_v43  ;;  %v934_v42 = vld [vmem:[%s6757_s10 + $0x2f0] sm:$0xff] }
 0x352   : > { %3756 = vmatprep.mubr.f32.mxu1 %v1131_v43  ;;  %v941_v43 = vld [vmem:[%s6757_s10 + $0x328] sm:$0xff] }
 0x354   : > { %2410 = vmatmul.mubr.f32.gmra.mrb[96].mxu0 %v1130_v44 }
 0x355   : > { %3757 = vmatmul.mubr.f32.gmra.mrb[96].mxu1 %v1130_v44  ;;  %2415 = vmatprep.mubr.f32.mxu0 %v1137_v45  ;;  %v940_v44 = vld [vmem:[%s6757_s10 + $0x320] sm:$0xff] }
 0x356   : > { %3762 = vmatprep.mubr.f32.mxu1 %v1137_v45  ;;  %v947_v45 = vld [vmem:[%s6757_s10 + $0x358] sm:$0xff] }
 0x358   : > { %2416 = vmatmul.mubr.f32.gmra.mrb[98].mxu0 %v1136_v46 }
 0x359   : > { %3763 = vmatmul.mubr.f32.gmra.mrb[98].mxu1 %v1136_v46  ;;  %2421 = vmatprep.mubr.f32.mxu0 %v1143_v47  ;;  %v946_v46 = vld [vmem:[%s6757_s10 + $0x350] sm:$0xff] }
 0x35a   : > { %3768 = vmatprep.mubr.f32.mxu1 %v1143_v47  ;;  %v953_v47 = vld [vmem:[%s6757_s10 + $0x388] sm:$0xff] }
 0x35c   : > { %2422 = vmatmul.mubr.f32.gmra.mrb[100].mxu0 %v1142_v48 }
 0x35d   : > { %3769 = vmatmul.mubr.f32.gmra.mrb[100].mxu1 %v1142_v48  ;;  %2427 = vmatprep.mubr.f32.mxu0 %v1149_v49  ;;  %v952_v48 = vld [vmem:[%s6757_s10 + $0x380] sm:$0xff] }
 0x35e   : > { %3774 = vmatprep.mubr.f32.mxu1 %v1149_v49  ;;  %v959_v49 = vld [vmem:[%s6757_s10 + $0x3b8] sm:$0xff] }
 0x360   : > { %2428 = vmatmul.mubr.f32.gmra.mrb[102].mxu0 %v1148_v50 }
 0x361   : > { %3775 = vmatmul.mubr.f32.gmra.mrb[102].mxu1 %v1148_v50  ;;  %2433 = vmatprep.mubr.f32.mxu0 %v1155_v51  ;;  %v958_v50 = vld [vmem:[%s6757_s10 + $0x3b0] sm:$0xff] }
 0x362   : > { %3780 = vmatprep.mubr.f32.mxu1 %v1155_v51  ;;  %v965_v51 = vld [vmem:[%s6757_s10 + $0x3e8] sm:$0xff] }
 0x364   : > { %2434 = vmatmul.mubr.f32.gmra.mrb[104].mxu0 %v1154_v52 }
 0x365   : > { %3781 = vmatmul.mubr.f32.gmra.mrb[104].mxu1 %v1154_v52  ;;  %2439 = vmatprep.mubr.f32.mxu0 %v1161_v53  ;;  %v964_v52 = vld [vmem:[%s6757_s10 + $0x3e0] sm:$0xff] }
 0x366   : > { %3786 = vmatprep.mubr.f32.mxu1 %v1161_v53  ;;  %v971_v53 = vld [vmem:[%s6757_s10 + $0x418] sm:$0xff] }
 0x368   : > { %2440 = vmatmul.mubr.f32.gmra.mrb[106].mxu0 %v1160_v54 }
 0x369   : > { %3787 = vmatmul.mubr.f32.gmra.mrb[106].mxu1 %v1160_v54  ;;  %2445 = vmatprep.mubr.f32.mxu0 %v1167_v55  ;;  %v970_v54 = vld [vmem:[%s6757_s10 + $0x410] sm:$0xff] }
 0x36a   : > { %3792 = vmatprep.mubr.f32.mxu1 %v1167_v55  ;;  %v977_v55 = vld [vmem:[%s6757_s10 + $0x448] sm:$0xff] }
 0x36c   : > { %2446 = vmatmul.mubr.f32.gmra.mrb[108].mxu0 %v1166_v56 }
 0x36d   : > { %3793 = vmatmul.mubr.f32.gmra.mrb[108].mxu1 %v1166_v56  ;;  %2451 = vmatprep.mubr.f32.mxu0 %v1173_v57  ;;  %v976_v56 = vld [vmem:[%s6757_s10 + $0x440] sm:$0xff] }
 0x36e   : > { %3798 = vmatprep.mubr.f32.mxu1 %v1173_v57  ;;  %v983_v57 = vld [vmem:[%s6757_s10 + $0x478] sm:$0xff] }
 0x370   : > { %2452 = vmatmul.mubr.f32.gmra.mrb[110].mxu0 %v1172_v58 }
 0x371   : > { %3799 = vmatmul.mubr.f32.gmra.mrb[110].mxu1 %v1172_v58  ;;  %2457 = vmatprep.mubr.f32.mxu0 %v1179_v59  ;;  %v982_v58 = vld [vmem:[%s6757_s10 + $0x470] sm:$0xff] }
 0x372   : > { %3804 = vmatprep.mubr.f32.mxu1 %v1179_v59  ;;  %v989_v59 = vld [vmem:[%s6757_s10 + $0x4a8] sm:$0xff] }
 0x374   : > { %2458 = vmatmul.mubr.f32.gmra.mrb[112].mxu0 %v1178_v60 }
 0x375   : > { %3805 = vmatmul.mubr.f32.gmra.mrb[112].mxu1 %v1178_v60  ;;  %2463 = vmatprep.mubr.f32.mxu0 %v1185_v61  ;;  %v988_v60 = vld [vmem:[%s6757_s10 + $0x4a0] sm:$0xff] }
 0x376   : > { %3810 = vmatprep.mubr.f32.mxu1 %v1185_v61  ;;  %v995_v61 = vld [vmem:[%s6757_s10 + $0x4d8] sm:$0xff] }
 0x378   : > { %2464 = vmatmul.mubr.f32.gmra.mrb[114].mxu0 %v1184_v62 }
 0x379   : > { %3811 = vmatmul.mubr.f32.gmra.mrb[114].mxu1 %v1184_v62  ;;  %2469 = vmatprep.mubr.f32.mxu0 %v1191_v63  ;;  %v994_v62 = vld [vmem:[%s6757_s10 + $0x4d0] sm:$0xff] }
 0x37a   : > { %3816 = vmatprep.mubr.f32.mxu1 %v1191_v63  ;;  %v1001_v63 = vld [vmem:[%s6757_s10 + $0x508] sm:$0xff] }
 0x37c   : > { %2470 = vmatmul.mubr.f32.gmra.mrb[116].mxu0 %v1190_v0 }
 0x37d   : > { %3817 = vmatmul.mubr.f32.gmra.mrb[116].mxu1 %v1190_v0  ;;  %2475 = vmatprep.mubr.f32.mxu0 %v1197_v1  ;;  %v1000_v0 = vld [vmem:[%s6757_s10 + $0x500] sm:$0xff] }
 0x37e   : > { %3822 = vmatprep.mubr.f32.mxu1 %v1197_v1  ;;  %v1007_v1 = vld [vmem:[%s6757_s10 + $0x538] sm:$0xff] }
 0x380   : > { %2476 = vmatmul.mubr.f32.gmra.mrb[118].mxu0 %v1196_v2 }
 0x381   : > { %3823 = vmatmul.mubr.f32.gmra.mrb[118].mxu1 %v1196_v2  ;;  %2481 = vmatprep.mubr.f32.mxu0 %v1203_v3  ;;  %v1006_v2 = vld [vmem:[%s6757_s10 + $0x530] sm:$0xff] }
 0x382   : > { %3828 = vmatprep.mubr.f32.mxu1 %v1203_v3  ;;  %v1013_v3 = vld [vmem:[%s6757_s10 + $0x568] sm:$0xff] }
 0x384   : > { %2482 = vmatmul.mubr.f32.gmra.mrb[120].mxu0 %v1202_v4 }
 0x385   : > { %3829 = vmatmul.mubr.f32.gmra.mrb[120].mxu1 %v1202_v4  ;;  %2487 = vmatprep.mubr.f32.mxu0 %v1209_v5  ;;  %v1012_v4 = vld [vmem:[%s6757_s10 + $0x560] sm:$0xff] }
 0x386   : > { %3834 = vmatprep.mubr.f32.mxu1 %v1209_v5  ;;  %v1019_v5 = vld [vmem:[%s6757_s10 + $0x598] sm:$0xff] }
 0x388   : > { %2488 = vmatmul.mubr.f32.gmra.mrb[122].mxu0 %v1208_v6 }
 0x389   : > { %3835 = vmatmul.mubr.f32.gmra.mrb[122].mxu1 %v1208_v6  ;;  %2493 = vmatprep.mubr.f32.mxu0 %v1215_v7  ;;  %v1018_v6 = vld [vmem:[%s6757_s10 + $0x590] sm:$0xff] }
 0x38a   : > { %3840 = vmatprep.mubr.f32.mxu1 %v1215_v7  ;;  %v1025_v7 = vld [vmem:[%s6757_s10 + $0x5c8] sm:$0xff] }
 0x38c   : > { %2494 = vmatmul.mubr.f32.gmra.mrb[124].mxu0 %v1214_v8 }
 0x38d   : > { %3841 = vmatmul.mubr.f32.gmra.mrb[124].mxu1 %v1214_v8  ;;  %2499 = vmatprep.mubr.f32.mxu0 %v1221_v9  ;;  %v1024_v8 = vld [vmem:[%s6757_s10 + $0x5c0] sm:$0xff] }
 0x38e   : > { %3846 = vmatprep.mubr.f32.mxu1 %v1221_v9  ;;  %v1031_v9 = vld [vmem:[%s6757_s10 + $0x5f8] sm:$0xff] }
 0x390   : > { %2500 = vmatmul.mubr.f32.gmra.mrb[126].mxu0 %v1220_v10 }
 0x391   : > { %3847 = vmatmul.mubr.f32.gmra.mrb[126].mxu1 %v1220_v10  ;;  %2570 = vmatprep.mubr.f32.mxu0 %v845_v11  ;;  %v1030_v10 = vld [vmem:[%s6757_s10 + $0x5f0] sm:$0xff] }
 0x392   : > { %3917 = vmatprep.mubr.f32.mxu1 %v845_v11  ;;  %v1037_v11 = vld [vmem:[%s6757_s10 + $0x628] sm:$0xff] }
 0x394   : > { %2571 = vmatmul.mubr.f32.vlgmr.msra.gmra.mrb[0].mxu0 %v844_v12 }
 0x395   : > { %3918 = vmatmul.mubr.f32.vlgmr.msra.gmra.mrb[0].mxu1 %v844_v12  ;;  %2576 = vmatprep.mubr.f32.mxu0 %v851_v13  ;;  %v1036_v12 = vld [vmem:[%s6757_s10 + $0x620] sm:$0xff] }
 0x396   : > { %3923 = vmatprep.mubr.f32.mxu1 %v851_v13  ;;  %v1043_v13 = vld [vmem:[%s6757_s10 + $0x658] sm:$0xff] }
 0x398   : > { %2577 = vmatmul.mubr.f32.gmra.mrb[2].mxu0 %v850_v14 }
 0x399   : > { %3924 = vmatmul.mubr.f32.gmra.mrb[2].mxu1 %v850_v14  ;;  %2582 = vmatprep.mubr.f32.mxu0 %v857_v15  ;;  %v1042_v14 = vld [vmem:[%s6757_s10 + $0x650] sm:$0xff] }
 0x39a   : > { %3929 = vmatprep.mubr.f32.mxu1 %v857_v15  ;;  %v1049_v15 = vld [vmem:[%s6757_s10 + $0x688] sm:$0xff] }
 0x39c   : > { %2583 = vmatmul.mubr.f32.gmra.mrb[4].mxu0 %v856_v16 }
 0x39d   : > { %3930 = vmatmul.mubr.f32.gmra.mrb[4].mxu1 %v856_v16  ;;  %2588 = vmatprep.mubr.f32.mxu0 %v863_v17  ;;  %v1048_v16 = vld [vmem:[%s6757_s10 + $0x680] sm:$0xff] }
 0x39e   : > { %3935 = vmatprep.mubr.f32.mxu1 %v863_v17  ;;  %v1055_v17 = vld [vmem:[%s6757_s10 + $0x6b8] sm:$0xff] }
 0x3a0   : > { %2589 = vmatmul.mubr.f32.gmra.mrb[6].mxu0 %v862_v18 }
 0x3a1   : > { %3936 = vmatmul.mubr.f32.gmra.mrb[6].mxu1 %v862_v18  ;;  %2594 = vmatprep.mubr.f32.mxu0 %v869_v19  ;;  %v1054_v18 = vld [vmem:[%s6757_s10 + $0x6b0] sm:$0xff] }
 0x3a2   : > { %3941 = vmatprep.mubr.f32.mxu1 %v869_v19  ;;  %v1061_v19 = vld [vmem:[%s6757_s10 + $0x6e8] sm:$0xff] }
 0x3a4   : > { %2595 = vmatmul.mubr.f32.gmra.mrb[8].mxu0 %v868_v20 }
 0x3a5   : > { %3942 = vmatmul.mubr.f32.gmra.mrb[8].mxu1 %v868_v20  ;;  %2600 = vmatprep.mubr.f32.mxu0 %v875_v21  ;;  %v1060_v20 = vld [vmem:[%s6757_s10 + $0x6e0] sm:$0xff] }
 0x3a6   : > { %3947 = vmatprep.mubr.f32.mxu1 %v875_v21  ;;  %v1067_v21 = vld [vmem:[%s6757_s10 + $0x718] sm:$0xff] }
 0x3a8   : > { %2601 = vmatmul.mubr.f32.gmra.mrb[10].mxu0 %v874_v22 }
 0x3a9   : > { %3948 = vmatmul.mubr.f32.gmra.mrb[10].mxu1 %v874_v22  ;;  %2606 = vmatprep.mubr.f32.mxu0 %v881_v23  ;;  %v1066_v22 = vld [vmem:[%s6757_s10 + $0x710] sm:$0xff] }
 0x3aa   : > { %3953 = vmatprep.mubr.f32.mxu1 %v881_v23  ;;  %v1073_v23 = vld [vmem:[%s6757_s10 + $0x748] sm:$0xff] }
 0x3ac   : > { %2607 = vmatmul.mubr.f32.gmra.mrb[12].mxu0 %v880_v24 }
 0x3ad   : > { %3954 = vmatmul.mubr.f32.gmra.mrb[12].mxu1 %v880_v24  ;;  %2612 = vmatprep.mubr.f32.mxu0 %v887_v25  ;;  %v1072_v24 = vld [vmem:[%s6757_s10 + $0x740] sm:$0xff] }
 0x3ae   : > { %3959 = vmatprep.mubr.f32.mxu1 %v887_v25  ;;  %v1079_v25 = vld [vmem:[%s6757_s10 + $0x778] sm:$0xff] }
 0x3b0   : > { %2613 = vmatmul.mubr.f32.gmra.mrb[14].mxu0 %v886_v26 }
 0x3b1   : > { %3960 = vmatmul.mubr.f32.gmra.mrb[14].mxu1 %v886_v26  ;;  %2618 = vmatprep.mubr.f32.mxu0 %v893_v27  ;;  %v1078_v26 = vld [vmem:[%s6757_s10 + $0x770] sm:$0xff] }
 0x3b2   : > { %3965 = vmatprep.mubr.f32.mxu1 %v893_v27  ;;  %v1085_v27 = vld [vmem:[%s6757_s10 + $0x7a8] sm:$0xff] }
 0x3b4   : > { %2619 = vmatmul.mubr.f32.gmra.mrb[16].mxu0 %v892_v28 }
 0x3b5   : > { %3966 = vmatmul.mubr.f32.gmra.mrb[16].mxu1 %v892_v28  ;;  %2624 = vmatprep.mubr.f32.mxu0 %v899_v29  ;;  %v1084_v28 = vld [vmem:[%s6757_s10 + $0x7a0] sm:$0xff] }
 0x3b6   : > { %3971 = vmatprep.mubr.f32.mxu1 %v899_v29  ;;  %v1091_v29 = vld [vmem:[%s6757_s10 + $0x7d8] sm:$0xff] }
 0x3b8   : > { %2625 = vmatmul.mubr.f32.gmra.mrb[18].mxu0 %v898_v30 }
 0x3b9   : > { %3972 = vmatmul.mubr.f32.gmra.mrb[18].mxu1 %v898_v30  ;;  %2630 = vmatprep.mubr.f32.mxu0 %v905_v31  ;;  %v1090_v30 = vld [vmem:[%s6757_s10 + $0x7d0] sm:$0xff] }
 0x3ba   : > { %3977 = vmatprep.mubr.f32.mxu1 %v905_v31  ;;  %v1097_v31 = vld [vmem:[%s6757_s10 + $0x808] sm:$0xff] }
 0x3bc   : > { %2631 = vmatmul.mubr.f32.gmra.mrb[20].mxu0 %v904_v32 }
 0x3bd   : > { %3978 = vmatmul.mubr.f32.gmra.mrb[20].mxu1 %v904_v32  ;;  %2636 = vmatprep.mubr.f32.mxu0 %v911_v33  ;;  %v1096_v32 = vld [vmem:[%s6757_s10 + $0x800] sm:$0xff] }
 0x3be   : > { %3983 = vmatprep.mubr.f32.mxu1 %v911_v33  ;;  %v1103_v33 = vld [vmem:[%s6757_s10 + $0x838] sm:$0xff] }
 0x3c0   : > { %2637 = vmatmul.mubr.f32.gmra.mrb[22].mxu0 %v910_v34 }
 0x3c1   : > { %3984 = vmatmul.mubr.f32.gmra.mrb[22].mxu1 %v910_v34  ;;  %2642 = vmatprep.mubr.f32.mxu0 %v917_v35  ;;  %v1102_v34 = vld [vmem:[%s6757_s10 + $0x830] sm:$0xff] }
 0x3c2   : > { %3989 = vmatprep.mubr.f32.mxu1 %v917_v35  ;;  %v1109_v35 = vld [vmem:[%s6757_s10 + $0x868] sm:$0xff] }
 0x3c4   : > { %2643 = vmatmul.mubr.f32.gmra.mrb[24].mxu0 %v916_v36 }
 0x3c5   : > { %3990 = vmatmul.mubr.f32.gmra.mrb[24].mxu1 %v916_v36  ;;  %2648 = vmatprep.mubr.f32.mxu0 %v923_v37  ;;  %v1108_v36 = vld [vmem:[%s6757_s10 + $0x860] sm:$0xff] }
 0x3c6   : > { %3995 = vmatprep.mubr.f32.mxu1 %v923_v37  ;;  %v1115_v37 = vld [vmem:[%s6757_s10 + $0x898] sm:$0xff] }
 0x3c8   : > { %2649 = vmatmul.mubr.f32.gmra.mrb[26].mxu0 %v922_v38 }
 0x3c9   : > { %3996 = vmatmul.mubr.f32.gmra.mrb[26].mxu1 %v922_v38  ;;  %2654 = vmatprep.mubr.f32.mxu0 %v929_v39  ;;  %v1114_v38 = vld [vmem:[%s6757_s10 + $0x890] sm:$0xff] }
 0x3ca   : > { %4001 = vmatprep.mubr.f32.mxu1 %v929_v39  ;;  %v1121_v39 = vld [vmem:[%s6757_s10 + $0x8c8] sm:$0xff] }
 0x3cc   : > { %2655 = vmatmul.mubr.f32.gmra.mrb[28].mxu0 %v928_v40 }
 0x3cd   : > { %4002 = vmatmul.mubr.f32.gmra.mrb[28].mxu1 %v928_v40  ;;  %2660 = vmatprep.mubr.f32.mxu0 %v935_v41  ;;  %v1120_v40 = vld [vmem:[%s6757_s10 + $0x8c0] sm:$0xff] }
 0x3ce   : > { %4007 = vmatprep.mubr.f32.mxu1 %v935_v41  ;;  %v1127_v41 = vld [vmem:[%s6757_s10 + $0x8f8] sm:$0xff] }
 0x3d0   : > { %2661 = vmatmul.mubr.f32.gmra.mrb[30].mxu0 %v934_v42 }
 0x3d1   : > { %4008 = vmatmul.mubr.f32.gmra.mrb[30].mxu1 %v934_v42  ;;  %2666 = vmatprep.mubr.f32.mxu0 %v941_v43  ;;  %v1126_v42 = vld [vmem:[%s6757_s10 + $0x8f0] sm:$0xff] }
 0x3d2   : > { %4013 = vmatprep.mubr.f32.mxu1 %v941_v43  ;;  %v1133_v43 = vld [vmem:[%s6757_s10 + $0x928] sm:$0xff] }
 0x3d4   : > { %2667 = vmatmul.mubr.f32.gmra.mrb[32].mxu0 %v940_v44 }
 0x3d5   : > { %4014 = vmatmul.mubr.f32.gmra.mrb[32].mxu1 %v940_v44  ;;  %2672 = vmatprep.mubr.f32.mxu0 %v947_v45  ;;  %v1132_v44 = vld [vmem:[%s6757_s10 + $0x920] sm:$0xff] }
 0x3d6   : > { %4019 = vmatprep.mubr.f32.mxu1 %v947_v45  ;;  %v1139_v45 = vld [vmem:[%s6757_s10 + $0x958] sm:$0xff] }
 0x3d8   : > { %2673 = vmatmul.mubr.f32.gmra.mrb[34].mxu0 %v946_v46 }
 0x3d9   : > { %4020 = vmatmul.mubr.f32.gmra.mrb[34].mxu1 %v946_v46  ;;  %2678 = vmatprep.mubr.f32.mxu0 %v953_v47  ;;  %v1138_v46 = vld [vmem:[%s6757_s10 + $0x950] sm:$0xff] }
 0x3da   : > { %4025 = vmatprep.mubr.f32.mxu1 %v953_v47  ;;  %v1145_v47 = vld [vmem:[%s6757_s10 + $0x988] sm:$0xff] }
 0x3dc   : > { %2679 = vmatmul.mubr.f32.gmra.mrb[36].mxu0 %v952_v48 }
 0x3dd   : > { %4026 = vmatmul.mubr.f32.gmra.mrb[36].mxu1 %v952_v48  ;;  %2684 = vmatprep.mubr.f32.mxu0 %v959_v49  ;;  %v1144_v48 = vld [vmem:[%s6757_s10 + $0x980] sm:$0xff] }
 0x3de   : > { %4031 = vmatprep.mubr.f32.mxu1 %v959_v49  ;;  %v1151_v49 = vld [vmem:[%s6757_s10 + $0x9b8] sm:$0xff] }
 0x3e0   : > { %2685 = vmatmul.mubr.f32.gmra.mrb[38].mxu0 %v958_v50 }
 0x3e1   : > { %4032 = vmatmul.mubr.f32.gmra.mrb[38].mxu1 %v958_v50  ;;  %2690 = vmatprep.mubr.f32.mxu0 %v965_v51  ;;  %v1150_v50 = vld [vmem:[%s6757_s10 + $0x9b0] sm:$0xff] }
 0x3e2   : > { %4037 = vmatprep.mubr.f32.mxu1 %v965_v51  ;;  %v1157_v51 = vld [vmem:[%s6757_s10 + $0x9e8] sm:$0xff] }
 0x3e4   : > { %2691 = vmatmul.mubr.f32.gmra.mrb[40].mxu0 %v964_v52 }
 0x3e5   : > { %4038 = vmatmul.mubr.f32.gmra.mrb[40].mxu1 %v964_v52  ;;  %2696 = vmatprep.mubr.f32.mxu0 %v971_v53  ;;  %v1156_v52 = vld [vmem:[%s6757_s10 + $0x9e0] sm:$0xff] }
 0x3e6   : > { %4043 = vmatprep.mubr.f32.mxu1 %v971_v53  ;;  %v1163_v53 = vld [vmem:[%s6757_s10 + $0xa18] sm:$0xff] }
 0x3e8   : > { %2697 = vmatmul.mubr.f32.gmra.mrb[42].mxu0 %v970_v54 }
 0x3e9   : > { %4044 = vmatmul.mubr.f32.gmra.mrb[42].mxu1 %v970_v54  ;;  %2702 = vmatprep.mubr.f32.mxu0 %v977_v55  ;;  %v584_v54 = vld [vmem:[%s6779_s13] sm:$0xff] }
 0x3ea   : > { %4049 = vmatprep.mubr.f32.mxu1 %v977_v55  ;;  %v1162_v55 = vld [vmem:[%s6757_s10 + $0xa10] sm:$0xff] }
 0x3ec   : > { %2703 = vmatmul.mubr.f32.gmra.mrb[44].mxu0 %v976_v56 }
 0x3ed   : > { %4050 = vmatmul.mubr.f32.gmra.mrb[44].mxu1 %v976_v56  ;;  %2708 = vmatprep.mubr.f32.mxu0 %v983_v57  ;;  %v586_v56 = vld [vmem:[%s6779_s13 + $0x10] sm:$0xff] }
 0x3ee   : > { %4055 = vmatprep.mubr.f32.mxu1 %v983_v57  ;;  %v585_v57 = vld [vmem:[%s6779_s13 + $0x8] sm:$0xff] }
 0x3f0   : > { %2709 = vmatmul.mubr.f32.gmra.mrb[46].mxu0 %v982_v58 }
 0x3f1   : > { %4056 = vmatmul.mubr.f32.gmra.mrb[46].mxu1 %v982_v58  ;;  %2714 = vmatprep.mubr.f32.mxu0 %v989_v59  ;;  %v1169_v58 = vld [vmem:[%s6757_s10 + $0xa48] sm:$0xff] }
 0x3f2   : > { %4061 = vmatprep.mubr.f32.mxu1 %v989_v59 }
 0x3f4   : > { %2715 = vmatmul.mubr.f32.gmra.mrb[48].mxu0 %v988_v60 }
 0x3f5   : > { %4062 = vmatmul.mubr.f32.gmra.mrb[48].mxu1 %v988_v60  ;;  %2720 = vmatprep.mubr.f32.mxu0 %v995_v61  ;;  %v587_v60 = vld [vmem:[%s6779_s13 + $0x18] sm:$0xff] }
 0x3f6   : > { %4067 = vmatprep.mubr.f32.mxu1 %v995_v61 }
 0x3f8   : > { %2721 = vmatmul.mubr.f32.gmra.mrb[50].mxu0 %v994_v62 }
 0x3f9   : > { %4068 = vmatmul.mubr.f32.gmra.mrb[50].mxu1 %v994_v62  ;;  %2726 = vmatprep.mubr.f32.mxu0 %v1001_v63 }
 0x3fa   : > { %4073 = vmatprep.mubr.f32.mxu1 %v1001_v63 }
 0x3fc   : > { %2727 = vmatmul.mubr.f32.gmra.mrb[52].mxu0 %v1000_v0 }
 0x3fd   : > { %4074 = vmatmul.mubr.f32.gmra.mrb[52].mxu1 %v1000_v0  ;;  %2732 = vmatprep.mubr.f32.mxu0 %v1007_v1 }
 0x3fe   : > { %4079 = vmatprep.mubr.f32.mxu1 %v1007_v1 }
 0x400   : > { %2733 = vmatmul.mubr.f32.gmra.mrb[54].mxu0 %v1006_v2 }
 0x401   : > { %4080 = vmatmul.mubr.f32.gmra.mrb[54].mxu1 %v1006_v2  ;;  %2738 = vmatprep.mubr.f32.mxu0 %v1013_v3 }
 0x402   : > { %4085 = vmatprep.mubr.f32.mxu1 %v1013_v3  ;;  %v588_v3 = vld [vmem:[%s6779_s13 + $0x20] sm:$0xff] }
 0x404   : > { %2739 = vmatmul.mubr.f32.gmra.mrb[56].mxu0 %v1012_v4 }
 0x405   : > { %4086 = vmatmul.mubr.f32.gmra.mrb[56].mxu1 %v1012_v4  ;;  %2744 = vmatprep.mubr.f32.mxu0 %v1019_v5  ;;  %v1168_v4 = vld [vmem:[%s6757_s10 + $0xa40] sm:$0xff] }
 0x406   : > { %4091 = vmatprep.mubr.f32.mxu1 %v1019_v5 }
 0x408   : > { %2745 = vmatmul.mubr.f32.gmra.mrb[58].mxu0 %v1018_v6 }
 0x409   : > { %4092 = vmatmul.mubr.f32.gmra.mrb[58].mxu1 %v1018_v6  ;;  %2750 = vmatprep.mubr.f32.mxu0 %v1025_v7  ;;  %v590_v6 = vld [vmem:[%s6779_s13 + $0x30] sm:$0xff] }
 0x40a   : > { %4097 = vmatprep.mubr.f32.mxu1 %v1025_v7  ;;  %v589_v7 = vld [vmem:[%s6779_s13 + $0x28] sm:$0xff] }
 0x40c   : > { %2751 = vmatmul.mubr.f32.gmra.mrb[60].mxu0 %v1024_v8 }
 0x40d   : > { %4098 = vmatmul.mubr.f32.gmra.mrb[60].mxu1 %v1024_v8  ;;  %2756 = vmatprep.mubr.f32.mxu0 %v1031_v9  ;;  %v1175_v8 = vld [vmem:[%s6757_s10 + $0xa78] sm:$0xff] }
 0x40e   : > { %4103 = vmatprep.mubr.f32.mxu1 %v1031_v9 }
 0x410   : > { %2757 = vmatmul.mubr.f32.gmra.mrb[62].mxu0 %v1030_v10 }
 0x411   : > { %4104 = vmatmul.mubr.f32.gmra.mrb[62].mxu1 %v1030_v10  ;;  %2762 = vmatprep.mubr.f32.mxu0 %v1037_v11  ;;  %v591_v10 = vld [vmem:[%s6779_s13 + $0x38] sm:$0xff] }
 0x412   : > { %4109 = vmatprep.mubr.f32.mxu1 %v1037_v11 }
 0x414   : > { %2763 = vmatmul.mubr.f32.gmra.mrb[64].mxu0 %v1036_v12 }
 0x415   : > { %4110 = vmatmul.mubr.f32.gmra.mrb[64].mxu1 %v1036_v12  ;;  %2768 = vmatprep.mubr.f32.mxu0 %v1043_v13 }
 0x416   : > { %4115 = vmatprep.mubr.f32.mxu1 %v1043_v13 }
 0x418   : > { %2769 = vmatmul.mubr.f32.gmra.mrb[66].mxu0 %v1042_v14 }
 0x419   : > { %4116 = vmatmul.mubr.f32.gmra.mrb[66].mxu1 %v1042_v14  ;;  %2774 = vmatprep.mubr.f32.mxu0 %v1049_v15 }
 0x41a   : > { %4121 = vmatprep.mubr.f32.mxu1 %v1049_v15 }
 0x41c   : > { %2775 = vmatmul.mubr.f32.gmra.mrb[68].mxu0 %v1048_v16 }
 0x41d   : > { %4122 = vmatmul.mubr.f32.gmra.mrb[68].mxu1 %v1048_v16  ;;  %2780 = vmatprep.mubr.f32.mxu0 %v1055_v17 }
 0x41e   : > { %4127 = vmatprep.mubr.f32.mxu1 %v1055_v17  ;;  %v592_v17 = vld [vmem:[%s6779_s13 + $0x40] sm:$0xff] }
 0x420   : > { %2781 = vmatmul.mubr.f32.gmra.mrb[70].mxu0 %v1054_v18 }
 0x421   : > { %4128 = vmatmul.mubr.f32.gmra.mrb[70].mxu1 %v1054_v18  ;;  %2786 = vmatprep.mubr.f32.mxu0 %v1061_v19  ;;  %v1174_v18 = vld [vmem:[%s6757_s10 + $0xa70] sm:$0xff] }
 0x422   : > { %4133 = vmatprep.mubr.f32.mxu1 %v1061_v19 }
 0x424   : > { %2787 = vmatmul.mubr.f32.gmra.mrb[72].mxu0 %v1060_v20 }
 0x425   : > { %4134 = vmatmul.mubr.f32.gmra.mrb[72].mxu1 %v1060_v20  ;;  %2792 = vmatprep.mubr.f32.mxu0 %v1067_v21  ;;  %v594_v20 = vld [vmem:[%s6779_s13 + $0x50] sm:$0xff] }
 0x426   : > { %4139 = vmatprep.mubr.f32.mxu1 %v1067_v21  ;;  %v593_v21 = vld [vmem:[%s6779_s13 + $0x48] sm:$0xff] }
 0x428   : > { %2793 = vmatmul.mubr.f32.gmra.mrb[74].mxu0 %v1066_v22 }
 0x429   : > { %4140 = vmatmul.mubr.f32.gmra.mrb[74].mxu1 %v1066_v22  ;;  %2798 = vmatprep.mubr.f32.mxu0 %v1073_v23  ;;  %v1181_v22 = vld [vmem:[%s6757_s10 + $0xaa8] sm:$0xff] }
 0x42a   : > { %4145 = vmatprep.mubr.f32.mxu1 %v1073_v23 }
 0x42c   : > { %2799 = vmatmul.mubr.f32.gmra.mrb[76].mxu0 %v1072_v24 }
 0x42d   : > { %4146 = vmatmul.mubr.f32.gmra.mrb[76].mxu1 %v1072_v24  ;;  %2804 = vmatprep.mubr.f32.mxu0 %v1079_v25  ;;  %v595_v24 = vld [vmem:[%s6779_s13 + $0x58] sm:$0xff] }
 0x42e   : > { %4151 = vmatprep.mubr.f32.mxu1 %v1079_v25 }
 0x430   : > { %2805 = vmatmul.mubr.f32.gmra.mrb[78].mxu0 %v1078_v26 }
 0x431   : > { %4152 = vmatmul.mubr.f32.gmra.mrb[78].mxu1 %v1078_v26  ;;  %2810 = vmatprep.mubr.f32.mxu0 %v1085_v27 }
 0x432   : > { %4157 = vmatprep.mubr.f32.mxu1 %v1085_v27 }
 0x434   : > { %2811 = vmatmul.mubr.f32.gmra.mrb[80].mxu0 %v1084_v28 }
 0x435   : > { %4158 = vmatmul.mubr.f32.gmra.mrb[80].mxu1 %v1084_v28  ;;  %2816 = vmatprep.mubr.f32.mxu0 %v1091_v29 }
 0x436   : > { %4163 = vmatprep.mubr.f32.mxu1 %v1091_v29 }
 0x438   : > { %2817 = vmatmul.mubr.f32.gmra.mrb[82].mxu0 %v1090_v30 }
 0x439   : > { %4164 = vmatmul.mubr.f32.gmra.mrb[82].mxu1 %v1090_v30  ;;  %2822 = vmatprep.mubr.f32.mxu0 %v1097_v31 }
 0x43a   : > { %4169 = vmatprep.mubr.f32.mxu1 %v1097_v31  ;;  %v596_v31 = vld [vmem:[%s6779_s13 + $0x60] sm:$0xff] }
 0x43c   : > { %2823 = vmatmul.mubr.f32.gmra.mrb[84].mxu0 %v1096_v32 }
 0x43d   : > { %4170 = vmatmul.mubr.f32.gmra.mrb[84].mxu1 %v1096_v32  ;;  %2828 = vmatprep.mubr.f32.mxu0 %v1103_v33  ;;  %v1180_v32 = vld [vmem:[%s6757_s10 + $0xaa0] sm:$0xff] }
 0x43e   : > { %4175 = vmatprep.mubr.f32.mxu1 %v1103_v33 }
 0x440   : > { %2829 = vmatmul.mubr.f32.gmra.mrb[86].mxu0 %v1102_v34 }
 0x441   : > { %4176 = vmatmul.mubr.f32.gmra.mrb[86].mxu1 %v1102_v34  ;;  %2834 = vmatprep.mubr.f32.mxu0 %v1109_v35  ;;  %v598_v34 = vld [vmem:[%s6779_s13 + $0x70] sm:$0xff] }
 0x442   : > { %4181 = vmatprep.mubr.f32.mxu1 %v1109_v35  ;;  %v597_v35 = vld [vmem:[%s6779_s13 + $0x68] sm:$0xff] }
 0x444   : > { %2835 = vmatmul.mubr.f32.gmra.mrb[88].mxu0 %v1108_v36 }
 0x445   : > { %4182 = vmatmul.mubr.f32.gmra.mrb[88].mxu1 %v1108_v36  ;;  %2840 = vmatprep.mubr.f32.mxu0 %v1115_v37  ;;  %v1187_v36 = vld [vmem:[%s6757_s10 + $0xad8] sm:$0xff] }
 0x446   : > { %4187 = vmatprep.mubr.f32.mxu1 %v1115_v37 }
 0x448   : > { %2841 = vmatmul.mubr.f32.gmra.mrb[90].mxu0 %v1114_v38 }
 0x449   : > { %4188 = vmatmul.mubr.f32.gmra.mrb[90].mxu1 %v1114_v38  ;;  %2846 = vmatprep.mubr.f32.mxu0 %v1121_v39  ;;  %v599_v38 = vld [vmem:[%s6779_s13 + $0x78] sm:$0xff] }
 0x44a   : > { %4193 = vmatprep.mubr.f32.mxu1 %v1121_v39 }
 0x44c   : > { %2847 = vmatmul.mubr.f32.gmra.mrb[92].mxu0 %v1120_v40 }
 0x44d   : > { %4194 = vmatmul.mubr.f32.gmra.mrb[92].mxu1 %v1120_v40  ;;  %2852 = vmatprep.mubr.f32.mxu0 %v1127_v41 }
 0x44e   : > { %4199 = vmatprep.mubr.f32.mxu1 %v1127_v41 }
 0x450   : > { %2853 = vmatmul.mubr.f32.gmra.mrb[94].mxu0 %v1126_v42 }
 0x451   : > { %4200 = vmatmul.mubr.f32.gmra.mrb[94].mxu1 %v1126_v42  ;;  %2858 = vmatprep.mubr.f32.mxu0 %v1133_v43 }
 0x452   : > { %4205 = vmatprep.mubr.f32.mxu1 %v1133_v43 }
 0x454   : > { %2859 = vmatmul.mubr.f32.gmra.mrb[96].mxu0 %v1132_v44 }
 0x455   : > { %4206 = vmatmul.mubr.f32.gmra.mrb[96].mxu1 %v1132_v44  ;;  %2864 = vmatprep.mubr.f32.mxu0 %v1139_v45 }
 0x456   : > { %4211 = vmatprep.mubr.f32.mxu1 %v1139_v45  ;;  %v600_v45 = vld [vmem:[%s6779_s13 + $0x80] sm:$0xff] }
 0x458   : > { %2865 = vmatmul.mubr.f32.gmra.mrb[98].mxu0 %v1138_v46 }
 0x459   : > { %4212 = vmatmul.mubr.f32.gmra.mrb[98].mxu1 %v1138_v46  ;;  %2870 = vmatprep.mubr.f32.mxu0 %v1145_v47  ;;  %v1186_v46 = vld [vmem:[%s6757_s10 + $0xad0] sm:$0xff] }
 0x45a   : > { %4217 = vmatprep.mubr.f32.mxu1 %v1145_v47 }
 0x45c   : > { %2871 = vmatmul.mubr.f32.gmra.mrb[100].mxu0 %v1144_v48 }
 0x45d   : > { %4218 = vmatmul.mubr.f32.gmra.mrb[100].mxu1 %v1144_v48  ;;  %2876 = vmatprep.mubr.f32.mxu0 %v1151_v49  ;;  %v602_v48 = vld [vmem:[%s6779_s13 + $0x90] sm:$0xff] }
 0x45e   : > { %4223 = vmatprep.mubr.f32.mxu1 %v1151_v49  ;;  %v601_v49 = vld [vmem:[%s6779_s13 + $0x88] sm:$0xff] }
 0x460   : > { %2877 = vmatmul.mubr.f32.gmra.mrb[102].mxu0 %v1150_v50 }
 0x461   : > { %4224 = vmatmul.mubr.f32.gmra.mrb[102].mxu1 %v1150_v50  ;;  %2882 = vmatprep.mubr.f32.mxu0 %v1157_v51  ;;  %v1193_v50 = vld [vmem:[%s6757_s10 + $0xb08] sm:$0xff] }
 0x462   : > { %4229 = vmatprep.mubr.f32.mxu1 %v1157_v51 }
 0x464   : > { %2883 = vmatmul.mubr.f32.gmra.mrb[104].mxu0 %v1156_v52 }
 0x465   : > { %4230 = vmatmul.mubr.f32.gmra.mrb[104].mxu1 %v1156_v52  ;;  %2888 = vmatprep.mubr.f32.mxu0 %v1163_v53  ;;  %v603_v52 = vld [vmem:[%s6779_s13 + $0x98] sm:$0xff] }
 0x466   : > { %4235 = vmatprep.mubr.f32.mxu1 %v1163_v53 }
 0x467   : > { %v2572_v59 = vpop.f32.mrb[0].mxu0 }
 0x468   : > { %v4302_v61 = vadd.f32 %v2572_v59, %v584_v54  ;;  %v3919_v62 = vpop.f32.mrb[0].mxu1  ;;  %v2574_v63 = vpop.f32.mrb[1].mxu0  ;;  %2889 = vmatmul.mubr.f32.gmra.mrb[106].mxu0 %v1162_v55  ;;  %v604_v59 = vld [vmem:[%s6779_s13 + $0xa0] sm:$0xff] }
 0x469   : > { %v4304_v0 = vadd.f32 %v3919_v62, %v586_v56  ;;  %v4303_v1 = vadd.f32 %v2574_v63, %v585_v57  ;;  %v3921_v2 = vpop.f32.mrb[1].mxu1  ;;  %4236 = vmatmul.mubr.f32.gmra.mrb[106].mxu1 %v1162_v55  ;;  %2894 = vmatprep.mubr.f32.mxu0 %v1169_v58  ;;  %v606_v62 = vld [vmem:[%s6779_s13 + $0xb0] sm:$0xff]  ;;  %v605_v63 = vld [vmem:[%s6779_s13 + $0xa8] sm:$0xff] }
 0x46a   : > { %4558 = vst [vmem:[%s6779_s13] sm:$0xff] %v4302_v61  ;;  %v4305_v5 = vadd.f32 %v3921_v2, %v587_v60  ;;  %4241 = vmatprep.mubr.f32.mxu1 %v1169_v58  ;;  %v1192_v60 = vld [vmem:[%s6757_s10 + $0xb00] sm:$0xff] }
 0x46b   : > { %4560 = vst [vmem:[%s6779_s13 + $0x10] sm:$0xff] %v4304_v0  ;;  %4559 = vst [vmem:[%s6779_s13 + $0x8] sm:$0xff] %v4303_v1  ;;  %v2578_v9 = vpop.f32.mrb[2].mxu0  ;;  %v1199_v0 = vld [vmem:[%s6757_s10 + $0xb38] sm:$0xff]  ;;  %v607_v2 = vld [vmem:[%s6779_s13 + $0xb8] sm:$0xff] }
 0x46c   : > { %4561 = vst [vmem:[%s6779_s13 + $0x18] sm:$0xff] %v4305_v5  ;;  %v4306_v11 = vadd.f32 %v2578_v9, %v588_v3  ;;  %v3925_v12 = vpop.f32.mrb[2].mxu1  ;;  %v2580_v13 = vpop.f32.mrb[3].mxu0  ;;  %2895 = vmatmul.mubr.f32.gmra.mrb[108].mxu0 %v1168_v4  ;;  %v608_v9 = vld [vmem:[%s6779_s13 + $0xc0] sm:$0xff] }
 0x46d   : > { %v4308_v14 = vadd.f32 %v3925_v12, %v590_v6  ;;  %v4307_v15 = vadd.f32 %v2580_v13, %v589_v7  ;;  %v3927_v16 = vpop.f32.mrb[3].mxu1  ;;  %4242 = vmatmul.mubr.f32.gmra.mrb[108].mxu1 %v1168_v4  ;;  %2900 = vmatprep.mubr.f32.mxu0 %v1175_v8  ;;  %v610_v12 = vld [vmem:[%s6779_s13 + $0xd0] sm:$0xff]  ;;  %v609_v13 = vld [vmem:[%s6779_s13 + $0xc8] sm:$0xff] }
 0x46e   : > { %4562 = vst [vmem:[%s6779_s13 + $0x20] sm:$0xff] %v4306_v11  ;;  %v4309_v19 = vadd.f32 %v3927_v16, %v591_v10  ;;  %4247 = vmatprep.mubr.f32.mxu1 %v1175_v8  ;;  %v1198_v10 = vld [vmem:[%s6757_s10 + $0xb30] sm:$0xff]  ;;  %v611_v16 = vld [vmem:[%s6779_s13 + $0xd8] sm:$0xff] }
 0x46f   : > { %4564 = vst [vmem:[%s6779_s13 + $0x30] sm:$0xff] %v4308_v14  ;;  %4563 = vst [vmem:[%s6779_s13 + $0x28] sm:$0xff] %v4307_v15  ;;  %v2584_v23 = vpop.f32.mrb[4].mxu0  ;;  %v1205_v14 = vld [vmem:[%s6757_s10 + $0xb68] sm:$0xff] }
 0x470   : > { %4565 = vst [vmem:[%s6779_s13 + $0x38] sm:$0xff] %v4309_v19  ;;  %v4310_v25 = vadd.f32 %v2584_v23, %v592_v17  ;;  %v3931_v26 = vpop.f32.mrb[4].mxu1  ;;  %v2586_v27 = vpop.f32.mrb[5].mxu0  ;;  %2901 = vmatmul.mubr.f32.gmra.mrb[110].mxu0 %v1174_v18  ;;  %v612_v23 = vld [vmem:[%s6779_s13 + $0xe0] sm:$0xff] }
 0x471   : > { %v4312_v28 = vadd.f32 %v3931_v26, %v594_v20  ;;  %v4311_v29 = vadd.f32 %v2586_v27, %v593_v21  ;;  %v3933_v30 = vpop.f32.mrb[5].mxu1  ;;  %4248 = vmatmul.mubr.f32.gmra.mrb[110].mxu1 %v1174_v18  ;;  %2906 = vmatprep.mubr.f32.mxu0 %v1181_v22  ;;  %v614_v26 = vld [vmem:[%s6779_s13 + $0xf0] sm:$0xff]  ;;  %v613_v27 = vld [vmem:[%s6779_s13 + $0xe8] sm:$0xff] }
 0x472   : > { %4566 = vst [vmem:[%s6779_s13 + $0x40] sm:$0xff] %v4310_v25  ;;  %v4313_v33 = vadd.f32 %v3933_v30, %v595_v24  ;;  %4253 = vmatprep.mubr.f32.mxu1 %v1181_v22  ;;  %v1204_v24 = vld [vmem:[%s6757_s10 + $0xb60] sm:$0xff] }
 0x473   : > { %4568 = vst [vmem:[%s6779_s13 + $0x50] sm:$0xff] %v4312_v28  ;;  %4567 = vst [vmem:[%s6779_s13 + $0x48] sm:$0xff] %v4311_v29  ;;  %v2590_v37 = vpop.f32.mrb[6].mxu0  ;;  %v1211_v28 = vld [vmem:[%s6757_s10 + $0xb98] sm:$0xff]  ;;  %v615_v30 = vld [vmem:[%s6779_s13 + $0xf8] sm:$0xff] }
 0x474   : > { %4569 = vst [vmem:[%s6779_s13 + $0x58] sm:$0xff] %v4313_v33  ;;  %v4314_v39 = vadd.f32 %v2590_v37, %v596_v31  ;;  %v3937_v40 = vpop.f32.mrb[6].mxu1  ;;  %v2592_v41 = vpop.f32.mrb[7].mxu0  ;;  %2907 = vmatmul.mubr.f32.gmra.mrb[112].mxu0 %v1180_v32  ;;  %v616_v37 = vld [vmem:[%s6779_s13 + $0x100] sm:$0xff] }
 0x475   : > { %v4316_v42 = vadd.f32 %v3937_v40, %v598_v34  ;;  %v4315_v43 = vadd.f32 %v2592_v41, %v597_v35  ;;  %v3939_v44 = vpop.f32.mrb[7].mxu1  ;;  %4254 = vmatmul.mubr.f32.gmra.mrb[112].mxu1 %v1180_v32  ;;  %2912 = vmatprep.mubr.f32.mxu0 %v1187_v36  ;;  %v618_v40 = vld [vmem:[%s6779_s13 + $0x110] sm:$0xff]  ;;  %v617_v41 = vld [vmem:[%s6779_s13 + $0x108] sm:$0xff] }
 0x476   : > { %4570 = vst [vmem:[%s6779_s13 + $0x60] sm:$0xff] %v4314_v39  ;;  %v4317_v47 = vadd.f32 %v3939_v44, %v599_v38  ;;  %4259 = vmatprep.mubr.f32.mxu1 %v1187_v36  ;;  %v1210_v38 = vld [vmem:[%s6757_s10 + $0xb90] sm:$0xff]  ;;  %v619_v44 = vld [vmem:[%s6779_s13 + $0x118] sm:$0xff] }
 0x477   : > { %4572 = vst [vmem:[%s6779_s13 + $0x70] sm:$0xff] %v4316_v42  ;;  %4571 = vst [vmem:[%s6779_s13 + $0x68] sm:$0xff] %v4315_v43  ;;  %v2596_v51 = vpop.f32.mrb[8].mxu0  ;;  %v1217_v42 = vld [vmem:[%s6757_s10 + $0xbc8] sm:$0xff] }
 0x478   : > { %4573 = vst [vmem:[%s6779_s13 + $0x78] sm:$0xff] %v4317_v47  ;;  %v4318_v53 = vadd.f32 %v2596_v51, %v600_v45  ;;  %v3943_v54 = vpop.f32.mrb[8].mxu1  ;;  %v2598_v55 = vpop.f32.mrb[9].mxu0  ;;  %2913 = vmatmul.mubr.f32.gmra.mrb[114].mxu0 %v1186_v46  ;;  %v620_v51 = vld [vmem:[%s6779_s13 + $0x120] sm:$0xff] }
 0x479   : > { %v4320_v56 = vadd.f32 %v3943_v54, %v602_v48  ;;  %v4319_v57 = vadd.f32 %v2598_v55, %v601_v49  ;;  %v3945_v58 = vpop.f32.mrb[9].mxu1  ;;  %4260 = vmatmul.mubr.f32.gmra.mrb[114].mxu1 %v1186_v46  ;;  %2918 = vmatprep.mubr.f32.mxu0 %v1193_v50  ;;  %v622_v54 = vld [vmem:[%s6779_s13 + $0x130] sm:$0xff]  ;;  %v621_v55 = vld [vmem:[%s6779_s13 + $0x128] sm:$0xff] }
 0x47a   : > { %4574 = vst [vmem:[%s6779_s13 + $0x80] sm:$0xff] %v4318_v53  ;;  %v4321_v61 = vadd.f32 %v3945_v58, %v603_v52  ;;  %4265 = vmatprep.mubr.f32.mxu1 %v1193_v50  ;;  %v1216_v52 = vld [vmem:[%s6757_s10 + $0xbc0] sm:$0xff] }
 0x47b   : > { %4576 = vst [vmem:[%s6779_s13 + $0x90] sm:$0xff] %v4320_v56  ;;  %4575 = vst [vmem:[%s6779_s13 + $0x88] sm:$0xff] %v4319_v57  ;;  %v2602_v1 = vpop.f32.mrb[10].mxu0  ;;  %v1223_v56 = vld [vmem:[%s6757_s10 + $0xbf8] sm:$0xff]  ;;  %v623_v58 = vld [vmem:[%s6779_s13 + $0x138] sm:$0xff] }
 0x47c   : > { %4577 = vst [vmem:[%s6779_s13 + $0x98] sm:$0xff] %v4321_v61  ;;  %v4322_v3 = vadd.f32 %v2602_v1, %v604_v59  ;;  %v3949_v4 = vpop.f32.mrb[10].mxu1  ;;  %v2604_v5 = vpop.f32.mrb[11].mxu0  ;;  %2919 = vmatmul.mubr.f32.gmra.mrb[116].mxu0 %v1192_v60  ;;  %v624_v1 = vld [vmem:[%s6779_s13 + $0x140] sm:$0xff] }
 0x47d   : > { %v4324_v6 = vadd.f32 %v3949_v4, %v606_v62  ;;  %v4323_v7 = vadd.f32 %v2604_v5, %v605_v63  ;;  %v3951_v8 = vpop.f32.mrb[11].mxu1  ;;  %4266 = vmatmul.mubr.f32.gmra.mrb[116].mxu1 %v1192_v60  ;;  %2924 = vmatprep.mubr.f32.mxu0 %v1199_v0  ;;  %v626_v4 = vld [vmem:[%s6779_s13 + $0x150] sm:$0xff]  ;;  %v625_v5 = vld [vmem:[%s6779_s13 + $0x148] sm:$0xff] }
 0x47e   : > { %4578 = vst [vmem:[%s6779_s13 + $0xa0] sm:$0xff] %v4322_v3  ;;  %v4325_v11 = vadd.f32 %v3951_v8, %v607_v2  ;;  %4271 = vmatprep.mubr.f32.mxu1 %v1199_v0  ;;  %v1222_v2 = vld [vmem:[%s6757_s10 + $0xbf0] sm:$0xff]  ;;  %s4828_s10 = sadd.s32 %s4999_s17, %s4992_s19 }
 0x47f   : > { %4580 = vst [vmem:[%s6779_s13 + $0xb0] sm:$0xff] %v4324_v6  ;;  %4579 = vst [vmem:[%s6779_s13 + $0xa8] sm:$0xff] %v4323_v7  ;;  %v2608_v15 = vpop.f32.mrb[12].mxu0  ;;  %v627_v7 = vld [vmem:[%s6779_s13 + $0x158] sm:$0xff]  ;;  %s4994_s9 = sshll.u32 %s4828_s10, 7 }
 0x480   : > { %4581 = vst [vmem:[%s6779_s13 + $0xb8] sm:$0xff] %v4325_v11  ;;  %v4326_v17 = vadd.f32 %v2608_v15, %v608_v9  ;;  %v3955_v18 = vpop.f32.mrb[12].mxu1  ;;  %v2610_v19 = vpop.f32.mrb[13].mxu0  ;;  %2925 = vmatmul.mubr.f32.gmra.mrb[118].mxu0 %v1198_v10  ;;  %s8584_s29 = scalar_lea.hbm %s8768_s25, %s4994_s9 }
 0x481   : > { %v4328_v20 = vadd.f32 %v3955_v18, %v610_v12  ;;  %v4327_v21 = vadd.f32 %v2610_v19, %v609_v13  ;;  %v3957_v22 = vpop.f32.mrb[13].mxu1  ;;  %4272 = vmatmul.mubr.f32.gmra.mrb[118].mxu1 %v1198_v10  ;;  %2930 = vmatprep.mubr.f32.mxu0 %v1205_v14  ;;  %v631_v19 = vld [vmem:[%s6779_s13 + $0x178] sm:$0xff] }
 0x482   : > { %4582 = vst [vmem:[%s6779_s13 + $0xc0] sm:$0xff] %v4326_v17  ;;  %v4329_v25 = vadd.f32 %v3957_v22, %v611_v16  ;;  %4277 = vmatprep.mubr.f32.mxu1 %v1205_v14  ;;  %v628_v14 = vld [vmem:[%s6779_s13 + $0x160] sm:$0xff]  ;;  %v630_v16 = vld [vmem:[%s6779_s13 + $0x170] sm:$0xff]  ;;  %v629_v17 = vld [vmem:[%s6779_s13 + $0x168] sm:$0xff] }
 0x483   : > { %4584 = vst [vmem:[%s6779_s13 + $0xd0] sm:$0xff] %v4328_v20  ;;  %4583 = vst [vmem:[%s6779_s13 + $0xc8] sm:$0xff] %v4327_v21  ;;  %v2614_v29 = vpop.f32.mrb[14].mxu0 }
 0x484   : > { %4585 = vst [vmem:[%s6779_s13 + $0xd8] sm:$0xff] %v4329_v25  ;;  %v4330_v31 = vadd.f32 %v2614_v29, %v612_v23  ;;  %v3961_v32 = vpop.f32.mrb[14].mxu1  ;;  %v2616_v33 = vpop.f32.mrb[15].mxu0  ;;  %2931 = vmatmul.mubr.f32.gmra.mrb[120].mxu0 %v1204_v24  ;;  %v633_v29 = vld [vmem:[%s6779_s13 + $0x188] sm:$0xff] }
 0x485   : > { %v4332_v34 = vadd.f32 %v3961_v32, %v614_v26  ;;  %v4331_v35 = vadd.f32 %v2616_v33, %v613_v27  ;;  %v3963_v36 = vpop.f32.mrb[15].mxu1  ;;  %4278 = vmatmul.mubr.f32.gmra.mrb[120].mxu1 %v1204_v24  ;;  %2936 = vmatprep.mubr.f32.mxu0 %v1211_v28  ;;  %v632_v26 = vld [vmem:[%s6779_s13 + $0x180] sm:$0xff] }
 0x486   : > { %4586 = vst [vmem:[%s6779_s13 + $0xe0] sm:$0xff] %v4330_v31  ;;  %v4333_v39 = vadd.f32 %v3963_v36, %v615_v30  ;;  %4283 = vmatprep.mubr.f32.mxu1 %v1211_v28  ;;  %v634_v28 = vld [vmem:[%s6779_s13 + $0x190] sm:$0xff]  ;;  %v635_v31 = vld [vmem:[%s6779_s13 + $0x198] sm:$0xff] }
 0x487   : > { %4588 = vst [vmem:[%s6779_s13 + $0xf0] sm:$0xff] %v4332_v34  ;;  %4587 = vst [vmem:[%s6779_s13 + $0xe8] sm:$0xff] %v4331_v35  ;;  %v2620_v43 = vpop.f32.mrb[16].mxu0 }
 0x488   : > { %4589 = vst [vmem:[%s6779_s13 + $0xf8] sm:$0xff] %v4333_v39  ;;  %v4334_v45 = vadd.f32 %v2620_v43, %v616_v37  ;;  %v3967_v46 = vpop.f32.mrb[16].mxu1  ;;  %v2622_v47 = vpop.f32.mrb[17].mxu0  ;;  %2937 = vmatmul.mubr.f32.gmra.mrb[122].mxu0 %v1210_v38  ;;  %v639_v43 = vld [vmem:[%s6779_s13 + $0x1b8] sm:$0xff] }
 0x489   : > { %v4336_v48 = vadd.f32 %v3967_v46, %v618_v40  ;;  %v4335_v49 = vadd.f32 %v2622_v47, %v617_v41  ;;  %v3969_v50 = vpop.f32.mrb[17].mxu1  ;;  %4284 = vmatmul.mubr.f32.gmra.mrb[122].mxu1 %v1210_v38  ;;  %2942 = vmatprep.mubr.f32.mxu0 %v1217_v42  ;;  %v636_v38 = vld [vmem:[%s6779_s13 + $0x1a0] sm:$0xff]  ;;  %v638_v40 = vld [vmem:[%s6779_s13 + $0x1b0] sm:$0xff]  ;;  %v637_v41 = vld [vmem:[%s6779_s13 + $0x1a8] sm:$0xff] }
 0x48a   : > { %4590 = vst [vmem:[%s6779_s13 + $0x100] sm:$0xff] %v4334_v45  ;;  %v4337_v53 = vadd.f32 %v3969_v50, %v619_v44  ;;  %4289 = vmatprep.mubr.f32.mxu1 %v1217_v42  ;;  %v640_v50 = vld [vmem:[%s6779_s13 + $0x1c0] sm:$0xff] }
 0x48b   : > { %4592 = vst [vmem:[%s6779_s13 + $0x110] sm:$0xff] %v4336_v48  ;;  %4591 = vst [vmem:[%s6779_s13 + $0x108] sm:$0xff] %v4335_v49  ;;  %v2626_v57 = vpop.f32.mrb[18].mxu0 }
 0x48c   : > { %4593 = vst [vmem:[%s6779_s13 + $0x118] sm:$0xff] %v4337_v53  ;;  %v4338_v59 = vadd.f32 %v2626_v57, %v620_v51  ;;  %v3973_v60 = vpop.f32.mrb[18].mxu1  ;;  %v2628_v61 = vpop.f32.mrb[19].mxu0  ;;  %2943 = vmatmul.mubr.f32.gmra.mrb[124].mxu0 %v1216_v52  ;;  %v641_v53 = vld [vmem:[%s6779_s13 + $0x1c8] sm:$0xff] }
 0x48d   : > { %v4340_v62 = vadd.f32 %v3973_v60, %v622_v54  ;;  %v4339_v63 = vadd.f32 %v2628_v61, %v621_v55  ;;  %v3975_v0 = vpop.f32.mrb[19].mxu1  ;;  %4290 = vmatmul.mubr.f32.gmra.mrb[124].mxu1 %v1216_v52  ;;  %2948 = vmatprep.mubr.f32.mxu0 %v1223_v56  ;;  %v642_v52 = vld [vmem:[%s6779_s13 + $0x1d0] sm:$0xff]  ;;  %v643_v55 = vld [vmem:[%s6779_s13 + $0x1d8] sm:$0xff] }
 0x48e   : > { %4594 = vst [vmem:[%s6779_s13 + $0x120] sm:$0xff] %v4338_v59  ;;  %v4341_v3 = vadd.f32 %v3975_v0, %v623_v58  ;;  %4295 = vmatprep.mubr.f32.mxu1 %v1223_v56  ;;  %v646_v0 = vld [vmem:[%s6779_s13 + $0x1f0] sm:$0xff] }
 0x48f   : > { %4596 = vst [vmem:[%s6779_s13 + $0x130] sm:$0xff] %v4340_v62  ;;  %4595 = vst [vmem:[%s6779_s13 + $0x128] sm:$0xff] %v4339_v63  ;;  %v2632_v6 = vpop.f32.mrb[20].mxu0  ;;  %v644_v62 = vld [vmem:[%s6779_s13 + $0x1e0] sm:$0xff] }
 0x490   : > { %4597 = vst [vmem:[%s6779_s13 + $0x138] sm:$0xff] %v4341_v3  ;;  %v4342_v8 = vadd.f32 %v2632_v6, %v624_v1  ;;  %v3979_v9 = vpop.f32.mrb[20].mxu1  ;;  %v2634_v10 = vpop.f32.mrb[21].mxu0  ;;  %2949 = vmatmul.mubr.f32.gmra.mrb[126].mxu0 %v1222_v2  ;;  %v645_v1 = vld [vmem:[%s6779_s13 + $0x1e8] sm:$0xff]  ;;  %v647_v3 = vld [vmem:[%s6779_s13 + $0x1f8] sm:$0xff] }
 0x491   : > { %v4344_v11 = vadd.f32 %v3979_v9, %v626_v4  ;;  %v4343_v12 = vadd.f32 %v2634_v10, %v625_v5  ;;  %v3981_v13 = vpop.f32.mrb[21].mxu1  ;;  %4296 = vmatmul.mubr.f32.gmra.mrb[126].mxu1 %v1222_v2  ;;  %v648_v10 = vld [vmem:[%s6779_s13 + $0x200] sm:$0xff] }
 0x492   : > { %4598 = vst [vmem:[%s6779_s13 + $0x140] sm:$0xff] %v4342_v8  ;;  %v4345_v15 = vadd.f32 %v3981_v13, %v627_v7  ;;  %v649_v13 = vld [vmem:[%s6779_s13 + $0x208] sm:$0xff] }
 0x493   : > { %4600 = vst [vmem:[%s6779_s13 + $0x150] sm:$0xff] %v4344_v11  ;;  %4599 = vst [vmem:[%s6779_s13 + $0x148] sm:$0xff] %v4343_v12  ;;  %v2638_v18 = vpop.f32.mrb[22].mxu0  ;;  %v650_v12 = vld [vmem:[%s6779_s13 + $0x210] sm:$0xff] }
 0x494   : > { %4601 = vst [vmem:[%s6779_s13 + $0x158] sm:$0xff] %v4345_v15  ;;  %v4346_v20 = vadd.f32 %v2638_v18, %v628_v14  ;;  %v3985_v21 = vpop.f32.mrb[22].mxu1  ;;  %v2640_v22 = vpop.f32.mrb[23].mxu0  ;;  %v651_v15 = vld [vmem:[%s6779_s13 + $0x218] sm:$0xff] }
 0x495   : > { %v4348_v23 = vadd.f32 %v3985_v21, %v630_v16  ;;  %v4347_v24 = vadd.f32 %v2640_v22, %v629_v17  ;;  %v3987_v25 = vpop.f32.mrb[23].mxu1  ;;  %v652_v22 = vld [vmem:[%s6779_s13 + $0x220] sm:$0xff] }
 0x496   : > { %4602 = vst [vmem:[%s6779_s13 + $0x160] sm:$0xff] %v4346_v20  ;;  %v4349_v27 = vadd.f32 %v3987_v25, %v631_v19  ;;  %v653_v25 = vld [vmem:[%s6779_s13 + $0x228] sm:$0xff] }
 0x497   : > { %4604 = vst [vmem:[%s6779_s13 + $0x170] sm:$0xff] %v4348_v23  ;;  %4603 = vst [vmem:[%s6779_s13 + $0x168] sm:$0xff] %v4347_v24  ;;  %v2644_v30 = vpop.f32.mrb[24].mxu0  ;;  %v654_v24 = vld [vmem:[%s6779_s13 + $0x230] sm:$0xff] }
 0x498   : > { %4605 = vst [vmem:[%s6779_s13 + $0x178] sm:$0xff] %v4349_v27  ;;  %v4350_v32 = vadd.f32 %v2644_v30, %v632_v26  ;;  %v3991_v33 = vpop.f32.mrb[24].mxu1  ;;  %v2646_v34 = vpop.f32.mrb[25].mxu0  ;;  %v655_v27 = vld [vmem:[%s6779_s13 + $0x238] sm:$0xff] }
 0x499   : > { %v4352_v35 = vadd.f32 %v3991_v33, %v634_v28  ;;  %v4351_v36 = vadd.f32 %v2646_v34, %v633_v29  ;;  %v3993_v37 = vpop.f32.mrb[25].mxu1  ;;  %v656_v34 = vld [vmem:[%s6779_s13 + $0x240] sm:$0xff] }
 0x49a   : > { %4606 = vst [vmem:[%s6779_s13 + $0x180] sm:$0xff] %v4350_v32  ;;  %v4353_v39 = vadd.f32 %v3993_v37, %v635_v31  ;;  %v657_v37 = vld [vmem:[%s6779_s13 + $0x248] sm:$0xff] }
 0x49b   : > { %4608 = vst [vmem:[%s6779_s13 + $0x190] sm:$0xff] %v4352_v35  ;;  %4607 = vst [vmem:[%s6779_s13 + $0x188] sm:$0xff] %v4351_v36  ;;  %v2650_v42 = vpop.f32.mrb[26].mxu0  ;;  %v658_v36 = vld [vmem:[%s6779_s13 + $0x250] sm:$0xff] }
 0x49c   : > { %4609 = vst [vmem:[%s6779_s13 + $0x198] sm:$0xff] %v4353_v39  ;;  %v4354_v44 = vadd.f32 %v2650_v42, %v636_v38  ;;  %v3997_v45 = vpop.f32.mrb[26].mxu1  ;;  %v2652_v46 = vpop.f32.mrb[27].mxu0  ;;  %v659_v39 = vld [vmem:[%s6779_s13 + $0x258] sm:$0xff] }
 0x49d   : > { %v4356_v47 = vadd.f32 %v3997_v45, %v638_v40  ;;  %v4355_v48 = vadd.f32 %v2652_v46, %v637_v41  ;;  %v3999_v49 = vpop.f32.mrb[27].mxu1  ;;  %v660_v46 = vld [vmem:[%s6779_s13 + $0x260] sm:$0xff] }
 0x49e   : > { %4610 = vst [vmem:[%s6779_s13 + $0x1a0] sm:$0xff] %v4354_v44  ;;  %v4357_v51 = vadd.f32 %v3999_v49, %v639_v43  ;;  %v661_v49 = vld [vmem:[%s6779_s13 + $0x268] sm:$0xff] }
 0x49f   : > { %4612 = vst [vmem:[%s6779_s13 + $0x1b0] sm:$0xff] %v4356_v47  ;;  %4611 = vst [vmem:[%s6779_s13 + $0x1a8] sm:$0xff] %v4355_v48  ;;  %v2656_v54 = vpop.f32.mrb[28].mxu0  ;;  %v662_v48 = vld [vmem:[%s6779_s13 + $0x270] sm:$0xff] }
 0x4a0   : > { %4613 = vst [vmem:[%s6779_s13 + $0x1b8] sm:$0xff] %v4357_v51  ;;  %v4358_v56 = vadd.f32 %v2656_v54, %v640_v50  ;;  %v4003_v57 = vpop.f32.mrb[28].mxu1  ;;  %v2658_v58 = vpop.f32.mrb[29].mxu0  ;;  %v663_v51 = vld [vmem:[%s6779_s13 + $0x278] sm:$0xff] }
 0x4a1   : > { %v4360_v59 = vadd.f32 %v4003_v57, %v642_v52  ;;  %v4359_v60 = vadd.f32 %v2658_v58, %v641_v53  ;;  %v4005_v61 = vpop.f32.mrb[29].mxu1  ;;  %v664_v58 = vld [vmem:[%s6779_s13 + $0x280] sm:$0xff] }
 0x4a2   : > { %4614 = vst [vmem:[%s6779_s13 + $0x1c0] sm:$0xff] %v4358_v56  ;;  %v4361_v63 = vadd.f32 %v4005_v61, %v643_v55  ;;  %v665_v61 = vld [vmem:[%s6779_s13 + $0x288] sm:$0xff] }
 0x4a3   : > { %4616 = vst [vmem:[%s6779_s13 + $0x1d0] sm:$0xff] %v4360_v59  ;;  %4615 = vst [vmem:[%s6779_s13 + $0x1c8] sm:$0xff] %v4359_v60  ;;  %v2662_v2 = vpop.f32.mrb[30].mxu0  ;;  %v666_v60 = vld [vmem:[%s6779_s13 + $0x290] sm:$0xff] }
 0x4a4   : > { %4617 = vst [vmem:[%s6779_s13 + $0x1d8] sm:$0xff] %v4361_v63  ;;  %v4362_v4 = vadd.f32 %v2662_v2, %v644_v62  ;;  %v4009_v5 = vpop.f32.mrb[30].mxu1  ;;  %v2664_v6 = vpop.f32.mrb[31].mxu0  ;;  %v667_v63 = vld [vmem:[%s6779_s13 + $0x298] sm:$0xff] }
 0x4a5   : > { %v4364_v7 = vadd.f32 %v4009_v5, %v646_v0  ;;  %v4363_v8 = vadd.f32 %v2664_v6, %v645_v1  ;;  %v4011_v9 = vpop.f32.mrb[31].mxu1  ;;  %v668_v6 = vld [vmem:[%s6779_s13 + $0x2a0] sm:$0xff] }
 0x4a6   : > { %4618 = vst [vmem:[%s6779_s13 + $0x1e0] sm:$0xff] %v4362_v4  ;;  %v4365_v11 = vadd.f32 %v4011_v9, %v647_v3  ;;  %v669_v9 = vld [vmem:[%s6779_s13 + $0x2a8] sm:$0xff] }
 0x4a7   : > { %4620 = vst [vmem:[%s6779_s13 + $0x1f0] sm:$0xff] %v4364_v7  ;;  %4619 = vst [vmem:[%s6779_s13 + $0x1e8] sm:$0xff] %v4363_v8  ;;  %v2668_v14 = vpop.f32.mrb[32].mxu0  ;;  %v670_v8 = vld [vmem:[%s6779_s13 + $0x2b0] sm:$0xff] }
 0x4a8   : > { %4621 = vst [vmem:[%s6779_s13 + $0x1f8] sm:$0xff] %v4365_v11  ;;  %v4366_v16 = vadd.f32 %v2668_v14, %v648_v10  ;;  %v4015_v17 = vpop.f32.mrb[32].mxu1  ;;  %v2670_v18 = vpop.f32.mrb[33].mxu0  ;;  %v671_v11 = vld [vmem:[%s6779_s13 + $0x2b8] sm:$0xff] }
 0x4a9   : > { %v4368_v19 = vadd.f32 %v4015_v17, %v650_v12  ;;  %v4367_v20 = vadd.f32 %v2670_v18, %v649_v13  ;;  %v4017_v21 = vpop.f32.mrb[33].mxu1  ;;  %v672_v18 = vld [vmem:[%s6779_s13 + $0x2c0] sm:$0xff] }
 0x4aa   : > { %4622 = vst [vmem:[%s6779_s13 + $0x200] sm:$0xff] %v4366_v16  ;;  %v4369_v23 = vadd.f32 %v4017_v21, %v651_v15  ;;  %v673_v21 = vld [vmem:[%s6779_s13 + $0x2c8] sm:$0xff] }
 0x4ab   : > { %4624 = vst [vmem:[%s6779_s13 + $0x210] sm:$0xff] %v4368_v19  ;;  %4623 = vst [vmem:[%s6779_s13 + $0x208] sm:$0xff] %v4367_v20  ;;  %v2674_v26 = vpop.f32.mrb[34].mxu0  ;;  %v674_v20 = vld [vmem:[%s6779_s13 + $0x2d0] sm:$0xff] }
 0x4ac   : > { %4625 = vst [vmem:[%s6779_s13 + $0x218] sm:$0xff] %v4369_v23  ;;  %v4370_v28 = vadd.f32 %v2674_v26, %v652_v22  ;;  %v4021_v29 = vpop.f32.mrb[34].mxu1  ;;  %v2676_v30 = vpop.f32.mrb[35].mxu0  ;;  %v675_v23 = vld [vmem:[%s6779_s13 + $0x2d8] sm:$0xff] }
 0x4ad   : > { %v4372_v31 = vadd.f32 %v4021_v29, %v654_v24  ;;  %v4371_v32 = vadd.f32 %v2676_v30, %v653_v25  ;;  %v4023_v33 = vpop.f32.mrb[35].mxu1  ;;  %v676_v30 = vld [vmem:[%s6779_s13 + $0x2e0] sm:$0xff] }
 0x4ae   : > { %4626 = vst [vmem:[%s6779_s13 + $0x220] sm:$0xff] %v4370_v28  ;;  %v4373_v35 = vadd.f32 %v4023_v33, %v655_v27  ;;  %v677_v33 = vld [vmem:[%s6779_s13 + $0x2e8] sm:$0xff] }
 0x4af   : > { %4628 = vst [vmem:[%s6779_s13 + $0x230] sm:$0xff] %v4372_v31  ;;  %4627 = vst [vmem:[%s6779_s13 + $0x228] sm:$0xff] %v4371_v32  ;;  %v2680_v38 = vpop.f32.mrb[36].mxu0  ;;  %v678_v32 = vld [vmem:[%s6779_s13 + $0x2f0] sm:$0xff] }
 0x4b0   : > { %4629 = vst [vmem:[%s6779_s13 + $0x238] sm:$0xff] %v4373_v35  ;;  %v4374_v40 = vadd.f32 %v2680_v38, %v656_v34  ;;  %v4027_v41 = vpop.f32.mrb[36].mxu1  ;;  %v2682_v42 = vpop.f32.mrb[37].mxu0  ;;  %v679_v35 = vld [vmem:[%s6779_s13 + $0x2f8] sm:$0xff] }
 0x4b1   : > { %v4376_v43 = vadd.f32 %v4027_v41, %v658_v36  ;;  %v4375_v44 = vadd.f32 %v2682_v42, %v657_v37  ;;  %v4029_v45 = vpop.f32.mrb[37].mxu1  ;;  %v680_v42 = vld [vmem:[%s6779_s13 + $0x300] sm:$0xff] }
 0x4b2   : > { %4630 = vst [vmem:[%s6779_s13 + $0x240] sm:$0xff] %v4374_v40  ;;  %v4377_v47 = vadd.f32 %v4029_v45, %v659_v39  ;;  %v681_v45 = vld [vmem:[%s6779_s13 + $0x308] sm:$0xff] }
 0x4b3   : > { %4632 = vst [vmem:[%s6779_s13 + $0x250] sm:$0xff] %v4376_v43  ;;  %4631 = vst [vmem:[%s6779_s13 + $0x248] sm:$0xff] %v4375_v44  ;;  %v2686_v50 = vpop.f32.mrb[38].mxu0  ;;  %v682_v44 = vld [vmem:[%s6779_s13 + $0x310] sm:$0xff] }
 0x4b4   : > { %4633 = vst [vmem:[%s6779_s13 + $0x258] sm:$0xff] %v4377_v47  ;;  %v4378_v52 = vadd.f32 %v2686_v50, %v660_v46  ;;  %v4033_v53 = vpop.f32.mrb[38].mxu1  ;;  %v2688_v54 = vpop.f32.mrb[39].mxu0  ;;  %v683_v47 = vld [vmem:[%s6779_s13 + $0x318] sm:$0xff] }
 0x4b5   : > { %v4380_v55 = vadd.f32 %v4033_v53, %v662_v48  ;;  %v4379_v56 = vadd.f32 %v2688_v54, %v661_v49  ;;  %v4035_v57 = vpop.f32.mrb[39].mxu1  ;;  %v684_v54 = vld [vmem:[%s6779_s13 + $0x320] sm:$0xff] }
 0x4b6   : > { %4634 = vst [vmem:[%s6779_s13 + $0x260] sm:$0xff] %v4378_v52  ;;  %v4381_v59 = vadd.f32 %v4035_v57, %v663_v51  ;;  %v685_v57 = vld [vmem:[%s6779_s13 + $0x328] sm:$0xff] }
 0x4b7   : > { %4636 = vst [vmem:[%s6779_s13 + $0x270] sm:$0xff] %v4380_v55  ;;  %4635 = vst [vmem:[%s6779_s13 + $0x268] sm:$0xff] %v4379_v56  ;;  %v2692_v62 = vpop.f32.mrb[40].mxu0  ;;  %v686_v56 = vld [vmem:[%s6779_s13 + $0x330] sm:$0xff] }
 0x4b8   : > { %4637 = vst [vmem:[%s6779_s13 + $0x278] sm:$0xff] %v4381_v59  ;;  %v4382_v0 = vadd.f32 %v2692_v62, %v664_v58  ;;  %v4039_v1 = vpop.f32.mrb[40].mxu1  ;;  %v2694_v2 = vpop.f32.mrb[41].mxu0  ;;  %v687_v59 = vld [vmem:[%s6779_s13 + $0x338] sm:$0xff] }
 0x4b9   : > { %v4384_v3 = vadd.f32 %v4039_v1, %v666_v60  ;;  %v4383_v4 = vadd.f32 %v2694_v2, %v665_v61  ;;  %v4041_v5 = vpop.f32.mrb[41].mxu1  ;;  %v688_v2 = vld [vmem:[%s6779_s13 + $0x340] sm:$0xff] }
 0x4ba   : > { %4638 = vst [vmem:[%s6779_s13 + $0x280] sm:$0xff] %v4382_v0  ;;  %v4385_v7 = vadd.f32 %v4041_v5, %v667_v63  ;;  %v689_v5 = vld [vmem:[%s6779_s13 + $0x348] sm:$0xff] }
 0x4bb   : > { %4640 = vst [vmem:[%s6779_s13 + $0x290] sm:$0xff] %v4384_v3  ;;  %4639 = vst [vmem:[%s6779_s13 + $0x288] sm:$0xff] %v4383_v4  ;;  %v2698_v10 = vpop.f32.mrb[42].mxu0  ;;  %v690_v4 = vld [vmem:[%s6779_s13 + $0x350] sm:$0xff] }
 0x4bc   : > { %4641 = vst [vmem:[%s6779_s13 + $0x298] sm:$0xff] %v4385_v7  ;;  %v4386_v12 = vadd.f32 %v2698_v10, %v668_v6  ;;  %v4045_v13 = vpop.f32.mrb[42].mxu1  ;;  %v2700_v14 = vpop.f32.mrb[43].mxu0  ;;  %v691_v7 = vld [vmem:[%s6779_s13 + $0x358] sm:$0xff] }
 0x4bd   : > { %v4388_v15 = vadd.f32 %v4045_v13, %v670_v8  ;;  %v4387_v16 = vadd.f32 %v2700_v14, %v669_v9  ;;  %v4047_v17 = vpop.f32.mrb[43].mxu1  ;;  %v692_v14 = vld [vmem:[%s6779_s13 + $0x360] sm:$0xff] }
 0x4be   : > { %4642 = vst [vmem:[%s6779_s13 + $0x2a0] sm:$0xff] %v4386_v12  ;;  %v4389_v19 = vadd.f32 %v4047_v17, %v671_v11  ;;  %v693_v17 = vld [vmem:[%s6779_s13 + $0x368] sm:$0xff] }
 0x4bf   : > { %4644 = vst [vmem:[%s6779_s13 + $0x2b0] sm:$0xff] %v4388_v15  ;;  %4643 = vst [vmem:[%s6779_s13 + $0x2a8] sm:$0xff] %v4387_v16  ;;  %v2704_v22 = vpop.f32.mrb[44].mxu0  ;;  %v694_v16 = vld [vmem:[%s6779_s13 + $0x370] sm:$0xff] }
 0x4c0   : > { %4645 = vst [vmem:[%s6779_s13 + $0x2b8] sm:$0xff] %v4389_v19  ;;  %v4390_v24 = vadd.f32 %v2704_v22, %v672_v18  ;;  %v4051_v25 = vpop.f32.mrb[44].mxu1  ;;  %v2706_v26 = vpop.f32.mrb[45].mxu0  ;;  %v695_v19 = vld [vmem:[%s6779_s13 + $0x378] sm:$0xff] }
 0x4c1   : > { %v4392_v27 = vadd.f32 %v4051_v25, %v674_v20  ;;  %v4391_v28 = vadd.f32 %v2706_v26, %v673_v21  ;;  %v4053_v29 = vpop.f32.mrb[45].mxu1  ;;  %v696_v26 = vld [vmem:[%s6779_s13 + $0x380] sm:$0xff] }
 0x4c2   : > { %4646 = vst [vmem:[%s6779_s13 + $0x2c0] sm:$0xff] %v4390_v24  ;;  %v4393_v31 = vadd.f32 %v4053_v29, %v675_v23  ;;  %v697_v29 = vld [vmem:[%s6779_s13 + $0x388] sm:$0xff] }
 0x4c3   : > { %4648 = vst [vmem:[%s6779_s13 + $0x2d0] sm:$0xff] %v4392_v27  ;;  %4647 = vst [vmem:[%s6779_s13 + $0x2c8] sm:$0xff] %v4391_v28  ;;  %v2710_v34 = vpop.f32.mrb[46].mxu0  ;;  %v698_v28 = vld [vmem:[%s6779_s13 + $0x390] sm:$0xff] }
 0x4c4   : > { %4649 = vst [vmem:[%s6779_s13 + $0x2d8] sm:$0xff] %v4393_v31  ;;  %v4394_v36 = vadd.f32 %v2710_v34, %v676_v30  ;;  %v4057_v37 = vpop.f32.mrb[46].mxu1  ;;  %v2712_v38 = vpop.f32.mrb[47].mxu0  ;;  %v699_v31 = vld [vmem:[%s6779_s13 + $0x398] sm:$0xff] }
 0x4c5   : > { %v4396_v39 = vadd.f32 %v4057_v37, %v678_v32  ;;  %v4395_v40 = vadd.f32 %v2712_v38, %v677_v33  ;;  %v4059_v41 = vpop.f32.mrb[47].mxu1  ;;  %v700_v38 = vld [vmem:[%s6779_s13 + $0x3a0] sm:$0xff] }
 0x4c6   : > { %4650 = vst [vmem:[%s6779_s13 + $0x2e0] sm:$0xff] %v4394_v36  ;;  %v4397_v43 = vadd.f32 %v4059_v41, %v679_v35  ;;  %v701_v41 = vld [vmem:[%s6779_s13 + $0x3a8] sm:$0xff] }
 0x4c7   : > { %4652 = vst [vmem:[%s6779_s13 + $0x2f0] sm:$0xff] %v4396_v39  ;;  %4651 = vst [vmem:[%s6779_s13 + $0x2e8] sm:$0xff] %v4395_v40  ;;  %v2716_v46 = vpop.f32.mrb[48].mxu0  ;;  %v702_v40 = vld [vmem:[%s6779_s13 + $0x3b0] sm:$0xff] }
 0x4c8   : > { %4653 = vst [vmem:[%s6779_s13 + $0x2f8] sm:$0xff] %v4397_v43  ;;  %v4398_v48 = vadd.f32 %v2716_v46, %v680_v42  ;;  %v4063_v49 = vpop.f32.mrb[48].mxu1  ;;  %v2718_v50 = vpop.f32.mrb[49].mxu0  ;;  %v703_v43 = vld [vmem:[%s6779_s13 + $0x3b8] sm:$0xff] }
 0x4c9   : > { %v4400_v51 = vadd.f32 %v4063_v49, %v682_v44  ;;  %v4399_v52 = vadd.f32 %v2718_v50, %v681_v45  ;;  %v4065_v53 = vpop.f32.mrb[49].mxu1  ;;  %v704_v50 = vld [vmem:[%s6779_s13 + $0x3c0] sm:$0xff] }
 0x4ca   : > { %4654 = vst [vmem:[%s6779_s13 + $0x300] sm:$0xff] %v4398_v48  ;;  %v4401_v55 = vadd.f32 %v4065_v53, %v683_v47  ;;  %v705_v53 = vld [vmem:[%s6779_s13 + $0x3c8] sm:$0xff] }
 0x4cb   : > { %4656 = vst [vmem:[%s6779_s13 + $0x310] sm:$0xff] %v4400_v51  ;;  %4655 = vst [vmem:[%s6779_s13 + $0x308] sm:$0xff] %v4399_v52  ;;  %v2722_v58 = vpop.f32.mrb[50].mxu0  ;;  %v706_v52 = vld [vmem:[%s6779_s13 + $0x3d0] sm:$0xff] }
 0x4cc   : > { %4657 = vst [vmem:[%s6779_s13 + $0x318] sm:$0xff] %v4401_v55  ;;  %v4402_v60 = vadd.f32 %v2722_v58, %v684_v54  ;;  %v4069_v61 = vpop.f32.mrb[50].mxu1  ;;  %v2724_v62 = vpop.f32.mrb[51].mxu0  ;;  %v707_v55 = vld [vmem:[%s6779_s13 + $0x3d8] sm:$0xff] }
 0x4cd   : > { %v4404_v63 = vadd.f32 %v4069_v61, %v686_v56  ;;  %v4403_v0 = vadd.f32 %v2724_v62, %v685_v57  ;;  %v4071_v1 = vpop.f32.mrb[51].mxu1  ;;  %v708_v62 = vld [vmem:[%s6779_s13 + $0x3e0] sm:$0xff] }
 0x4ce   : > { %4658 = vst [vmem:[%s6779_s13 + $0x320] sm:$0xff] %v4402_v60  ;;  %v4405_v3 = vadd.f32 %v4071_v1, %v687_v59  ;;  %v709_v1 = vld [vmem:[%s6779_s13 + $0x3e8] sm:$0xff] }
 0x4cf   : > { %4660 = vst [vmem:[%s6779_s13 + $0x330] sm:$0xff] %v4404_v63  ;;  %4659 = vst [vmem:[%s6779_s13 + $0x328] sm:$0xff] %v4403_v0  ;;  %v2728_v6 = vpop.f32.mrb[52].mxu0  ;;  %v710_v0 = vld [vmem:[%s6779_s13 + $0x3f0] sm:$0xff] }
 0x4d0   : > { %4661 = vst [vmem:[%s6779_s13 + $0x338] sm:$0xff] %v4405_v3  ;;  %v4406_v8 = vadd.f32 %v2728_v6, %v688_v2  ;;  %v4075_v9 = vpop.f32.mrb[52].mxu1  ;;  %v2730_v10 = vpop.f32.mrb[53].mxu0  ;;  %v711_v3 = vld [vmem:[%s6779_s13 + $0x3f8] sm:$0xff] }
 0x4d1   : > { %v4408_v11 = vadd.f32 %v4075_v9, %v690_v4  ;;  %v4407_v12 = vadd.f32 %v2730_v10, %v689_v5  ;;  %v4077_v13 = vpop.f32.mrb[53].mxu1  ;;  %v712_v10 = vld [vmem:[%s6779_s13 + $0x400] sm:$0xff] }
 0x4d2   : > { %4662 = vst [vmem:[%s6779_s13 + $0x340] sm:$0xff] %v4406_v8  ;;  %v4409_v15 = vadd.f32 %v4077_v13, %v691_v7  ;;  %v713_v13 = vld [vmem:[%s6779_s13 + $0x408] sm:$0xff] }
 0x4d3   : > { %4664 = vst [vmem:[%s6779_s13 + $0x350] sm:$0xff] %v4408_v11  ;;  %4663 = vst [vmem:[%s6779_s13 + $0x348] sm:$0xff] %v4407_v12  ;;  %v2734_v18 = vpop.f32.mrb[54].mxu0  ;;  %v714_v12 = vld [vmem:[%s6779_s13 + $0x410] sm:$0xff] }
 0x4d4   : > { %4665 = vst [vmem:[%s6779_s13 + $0x358] sm:$0xff] %v4409_v15  ;;  %v4410_v20 = vadd.f32 %v2734_v18, %v692_v14  ;;  %v4081_v21 = vpop.f32.mrb[54].mxu1  ;;  %v2736_v22 = vpop.f32.mrb[55].mxu0  ;;  %v715_v15 = vld [vmem:[%s6779_s13 + $0x418] sm:$0xff] }
 0x4d5   : > { %v4412_v23 = vadd.f32 %v4081_v21, %v694_v16  ;;  %v4411_v24 = vadd.f32 %v2736_v22, %v693_v17  ;;  %v4083_v25 = vpop.f32.mrb[55].mxu1  ;;  %v716_v22 = vld [vmem:[%s6779_s13 + $0x420] sm:$0xff] }
 0x4d6   : > { %4666 = vst [vmem:[%s6779_s13 + $0x360] sm:$0xff] %v4410_v20  ;;  %v4413_v27 = vadd.f32 %v4083_v25, %v695_v19  ;;  %v717_v25 = vld [vmem:[%s6779_s13 + $0x428] sm:$0xff] }
 0x4d7   : > { %4668 = vst [vmem:[%s6779_s13 + $0x370] sm:$0xff] %v4412_v23  ;;  %4667 = vst [vmem:[%s6779_s13 + $0x368] sm:$0xff] %v4411_v24  ;;  %v2740_v30 = vpop.f32.mrb[56].mxu0  ;;  %v718_v24 = vld [vmem:[%s6779_s13 + $0x430] sm:$0xff] }
 0x4d8   : > { %4669 = vst [vmem:[%s6779_s13 + $0x378] sm:$0xff] %v4413_v27  ;;  %v4414_v32 = vadd.f32 %v2740_v30, %v696_v26  ;;  %v4087_v33 = vpop.f32.mrb[56].mxu1  ;;  %v2742_v34 = vpop.f32.mrb[57].mxu0  ;;  %v719_v27 = vld [vmem:[%s6779_s13 + $0x438] sm:$0xff] }
 0x4d9   : > { %v4416_v35 = vadd.f32 %v4087_v33, %v698_v28  ;;  %v4415_v36 = vadd.f32 %v2742_v34, %v697_v29  ;;  %v4089_v37 = vpop.f32.mrb[57].mxu1  ;;  %v720_v34 = vld [vmem:[%s6779_s13 + $0x440] sm:$0xff] }
 0x4da   : > { %4670 = vst [vmem:[%s6779_s13 + $0x380] sm:$0xff] %v4414_v32  ;;  %v4417_v39 = vadd.f32 %v4089_v37, %v699_v31  ;;  %v721_v37 = vld [vmem:[%s6779_s13 + $0x448] sm:$0xff] }
 0x4db   : > { %4672 = vst [vmem:[%s6779_s13 + $0x390] sm:$0xff] %v4416_v35  ;;  %4671 = vst [vmem:[%s6779_s13 + $0x388] sm:$0xff] %v4415_v36  ;;  %v2746_v42 = vpop.f32.mrb[58].mxu0  ;;  %v722_v36 = vld [vmem:[%s6779_s13 + $0x450] sm:$0xff] }
 0x4dc   : > { %4673 = vst [vmem:[%s6779_s13 + $0x398] sm:$0xff] %v4417_v39  ;;  %v4418_v44 = vadd.f32 %v2746_v42, %v700_v38  ;;  %v4093_v45 = vpop.f32.mrb[58].mxu1  ;;  %v2748_v46 = vpop.f32.mrb[59].mxu0  ;;  %v723_v39 = vld [vmem:[%s6779_s13 + $0x458] sm:$0xff] }
 0x4dd   : > { %v4420_v47 = vadd.f32 %v4093_v45, %v702_v40  ;;  %v4419_v48 = vadd.f32 %v2748_v46, %v701_v41  ;;  %v4095_v49 = vpop.f32.mrb[59].mxu1  ;;  %v724_v46 = vld [vmem:[%s6779_s13 + $0x460] sm:$0xff] }
 0x4de   : > { %4674 = vst [vmem:[%s6779_s13 + $0x3a0] sm:$0xff] %v4418_v44  ;;  %v4421_v51 = vadd.f32 %v4095_v49, %v703_v43  ;;  %v725_v49 = vld [vmem:[%s6779_s13 + $0x468] sm:$0xff] }
 0x4df   : > { %4676 = vst [vmem:[%s6779_s13 + $0x3b0] sm:$0xff] %v4420_v47  ;;  %4675 = vst [vmem:[%s6779_s13 + $0x3a8] sm:$0xff] %v4419_v48  ;;  %v2752_v54 = vpop.f32.mrb[60].mxu0  ;;  %v726_v48 = vld [vmem:[%s6779_s13 + $0x470] sm:$0xff] }
 0x4e0   : > { %4677 = vst [vmem:[%s6779_s13 + $0x3b8] sm:$0xff] %v4421_v51  ;;  %v4422_v56 = vadd.f32 %v2752_v54, %v704_v50  ;;  %v4099_v57 = vpop.f32.mrb[60].mxu1  ;;  %v2754_v58 = vpop.f32.mrb[61].mxu0  ;;  %v727_v51 = vld [vmem:[%s6779_s13 + $0x478] sm:$0xff] }
 0x4e1   : > { %v4424_v59 = vadd.f32 %v4099_v57, %v706_v52  ;;  %v4423_v60 = vadd.f32 %v2754_v58, %v705_v53  ;;  %v4101_v61 = vpop.f32.mrb[61].mxu1  ;;  %v728_v58 = vld [vmem:[%s6779_s13 + $0x480] sm:$0xff] }
 0x4e2   : > { %4678 = vst [vmem:[%s6779_s13 + $0x3c0] sm:$0xff] %v4422_v56  ;;  %v4425_v63 = vadd.f32 %v4101_v61, %v707_v55  ;;  %v729_v61 = vld [vmem:[%s6779_s13 + $0x488] sm:$0xff] }
 0x4e3   : > { %4680 = vst [vmem:[%s6779_s13 + $0x3d0] sm:$0xff] %v4424_v59  ;;  %4679 = vst [vmem:[%s6779_s13 + $0x3c8] sm:$0xff] %v4423_v60  ;;  %v2758_v2 = vpop.f32.mrb[62].mxu0  ;;  %v730_v60 = vld [vmem:[%s6779_s13 + $0x490] sm:$0xff] }
 0x4e4   : > { %4681 = vst [vmem:[%s6779_s13 + $0x3d8] sm:$0xff] %v4425_v63  ;;  %v4426_v4 = vadd.f32 %v2758_v2, %v708_v62  ;;  %v4105_v5 = vpop.f32.mrb[62].mxu1  ;;  %v2760_v6 = vpop.f32.mrb[63].mxu0  ;;  %v731_v63 = vld [vmem:[%s6779_s13 + $0x498] sm:$0xff] }
 0x4e5   : > { %v4428_v7 = vadd.f32 %v4105_v5, %v710_v0  ;;  %v4427_v8 = vadd.f32 %v2760_v6, %v709_v1  ;;  %v4107_v9 = vpop.f32.mrb[63].mxu1  ;;  %v732_v6 = vld [vmem:[%s6779_s13 + $0x4a0] sm:$0xff] }
 0x4e6   : > { %4682 = vst [vmem:[%s6779_s13 + $0x3e0] sm:$0xff] %v4426_v4  ;;  %v4429_v11 = vadd.f32 %v4107_v9, %v711_v3  ;;  %v733_v9 = vld [vmem:[%s6779_s13 + $0x4a8] sm:$0xff] }
 0x4e7   : > { %4684 = vst [vmem:[%s6779_s13 + $0x3f0] sm:$0xff] %v4428_v7  ;;  %4683 = vst [vmem:[%s6779_s13 + $0x3e8] sm:$0xff] %v4427_v8  ;;  %v2764_v14 = vpop.f32.mrb[64].mxu0  ;;  %v734_v8 = vld [vmem:[%s6779_s13 + $0x4b0] sm:$0xff] }
 0x4e8   : > { %4685 = vst [vmem:[%s6779_s13 + $0x3f8] sm:$0xff] %v4429_v11  ;;  %v4430_v16 = vadd.f32 %v2764_v14, %v712_v10  ;;  %v4111_v17 = vpop.f32.mrb[64].mxu1  ;;  %v2766_v18 = vpop.f32.mrb[65].mxu0  ;;  %v735_v11 = vld [vmem:[%s6779_s13 + $0x4b8] sm:$0xff] }
 0x4e9   : > { %v4432_v19 = vadd.f32 %v4111_v17, %v714_v12  ;;  %v4431_v20 = vadd.f32 %v2766_v18, %v713_v13  ;;  %v4113_v21 = vpop.f32.mrb[65].mxu1  ;;  %v736_v18 = vld [vmem:[%s6779_s13 + $0x4c0] sm:$0xff] }
 0x4ea   : > { %4686 = vst [vmem:[%s6779_s13 + $0x400] sm:$0xff] %v4430_v16  ;;  %v4433_v23 = vadd.f32 %v4113_v21, %v715_v15  ;;  %v737_v21 = vld [vmem:[%s6779_s13 + $0x4c8] sm:$0xff] }
 0x4eb   : > { %4688 = vst [vmem:[%s6779_s13 + $0x410] sm:$0xff] %v4432_v19  ;;  %4687 = vst [vmem:[%s6779_s13 + $0x408] sm:$0xff] %v4431_v20  ;;  %v2770_v26 = vpop.f32.mrb[66].mxu0  ;;  %v738_v20 = vld [vmem:[%s6779_s13 + $0x4d0] sm:$0xff] }
 0x4ec   : > { %4689 = vst [vmem:[%s6779_s13 + $0x418] sm:$0xff] %v4433_v23  ;;  %v4434_v28 = vadd.f32 %v2770_v26, %v716_v22  ;;  %v4117_v29 = vpop.f32.mrb[66].mxu1  ;;  %v2772_v30 = vpop.f32.mrb[67].mxu0  ;;  %v739_v23 = vld [vmem:[%s6779_s13 + $0x4d8] sm:$0xff] }
 0x4ed   : > { %v4436_v31 = vadd.f32 %v4117_v29, %v718_v24  ;;  %v4435_v32 = vadd.f32 %v2772_v30, %v717_v25  ;;  %v4119_v33 = vpop.f32.mrb[67].mxu1  ;;  %v740_v30 = vld [vmem:[%s6779_s13 + $0x4e0] sm:$0xff] }
 0x4ee   : > { %4690 = vst [vmem:[%s6779_s13 + $0x420] sm:$0xff] %v4434_v28  ;;  %v4437_v35 = vadd.f32 %v4119_v33, %v719_v27  ;;  %v741_v33 = vld [vmem:[%s6779_s13 + $0x4e8] sm:$0xff] }
 0x4ef   : > { %4692 = vst [vmem:[%s6779_s13 + $0x430] sm:$0xff] %v4436_v31  ;;  %4691 = vst [vmem:[%s6779_s13 + $0x428] sm:$0xff] %v4435_v32  ;;  %v2776_v38 = vpop.f32.mrb[68].mxu0  ;;  %v742_v32 = vld [vmem:[%s6779_s13 + $0x4f0] sm:$0xff] }
 0x4f0   : > { %4693 = vst [vmem:[%s6779_s13 + $0x438] sm:$0xff] %v4437_v35  ;;  %v4438_v40 = vadd.f32 %v2776_v38, %v720_v34  ;;  %v4123_v41 = vpop.f32.mrb[68].mxu1  ;;  %v2778_v42 = vpop.f32.mrb[69].mxu0  ;;  %v743_v35 = vld [vmem:[%s6779_s13 + $0x4f8] sm:$0xff] }
 0x4f1   : > { %v4440_v43 = vadd.f32 %v4123_v41, %v722_v36  ;;  %v4439_v44 = vadd.f32 %v2778_v42, %v721_v37  ;;  %v4125_v45 = vpop.f32.mrb[69].mxu1  ;;  %v744_v42 = vld [vmem:[%s6779_s13 + $0x500] sm:$0xff] }
 0x4f2   : > { %4694 = vst [vmem:[%s6779_s13 + $0x440] sm:$0xff] %v4438_v40  ;;  %v4441_v47 = vadd.f32 %v4125_v45, %v723_v39  ;;  %v745_v45 = vld [vmem:[%s6779_s13 + $0x508] sm:$0xff] }
 0x4f3   : > { %4696 = vst [vmem:[%s6779_s13 + $0x450] sm:$0xff] %v4440_v43  ;;  %4695 = vst [vmem:[%s6779_s13 + $0x448] sm:$0xff] %v4439_v44  ;;  %v2782_v50 = vpop.f32.mrb[70].mxu0  ;;  %v746_v44 = vld [vmem:[%s6779_s13 + $0x510] sm:$0xff] }
 0x4f4   : > { %4697 = vst [vmem:[%s6779_s13 + $0x458] sm:$0xff] %v4441_v47  ;;  %v4442_v52 = vadd.f32 %v2782_v50, %v724_v46  ;;  %v4129_v53 = vpop.f32.mrb[70].mxu1  ;;  %v2784_v54 = vpop.f32.mrb[71].mxu0  ;;  %v747_v47 = vld [vmem:[%s6779_s13 + $0x518] sm:$0xff] }
 0x4f5   : > { %v4444_v55 = vadd.f32 %v4129_v53, %v726_v48  ;;  %v4443_v56 = vadd.f32 %v2784_v54, %v725_v49  ;;  %v4131_v57 = vpop.f32.mrb[71].mxu1  ;;  %v748_v54 = vld [vmem:[%s6779_s13 + $0x520] sm:$0xff] }
 0x4f6   : > { %4698 = vst [vmem:[%s6779_s13 + $0x460] sm:$0xff] %v4442_v52  ;;  %v4445_v59 = vadd.f32 %v4131_v57, %v727_v51  ;;  %v749_v57 = vld [vmem:[%s6779_s13 + $0x528] sm:$0xff] }
 0x4f7   : > { %4700 = vst [vmem:[%s6779_s13 + $0x470] sm:$0xff] %v4444_v55  ;;  %4699 = vst [vmem:[%s6779_s13 + $0x468] sm:$0xff] %v4443_v56  ;;  %v2788_v62 = vpop.f32.mrb[72].mxu0  ;;  %v750_v56 = vld [vmem:[%s6779_s13 + $0x530] sm:$0xff] }
 0x4f8   : > { %4701 = vst [vmem:[%s6779_s13 + $0x478] sm:$0xff] %v4445_v59  ;;  %v4446_v0 = vadd.f32 %v2788_v62, %v728_v58  ;;  %v4135_v1 = vpop.f32.mrb[72].mxu1  ;;  %v2790_v2 = vpop.f32.mrb[73].mxu0  ;;  %v751_v59 = vld [vmem:[%s6779_s13 + $0x538] sm:$0xff] }
 0x4f9   : > { %v4448_v3 = vadd.f32 %v4135_v1, %v730_v60  ;;  %v4447_v4 = vadd.f32 %v2790_v2, %v729_v61  ;;  %v4137_v5 = vpop.f32.mrb[73].mxu1  ;;  %v752_v2 = vld [vmem:[%s6779_s13 + $0x540] sm:$0xff] }
 0x4fa   : > { %4702 = vst [vmem:[%s6779_s13 + $0x480] sm:$0xff] %v4446_v0  ;;  %v4449_v7 = vadd.f32 %v4137_v5, %v731_v63  ;;  %v753_v5 = vld [vmem:[%s6779_s13 + $0x548] sm:$0xff] }
 0x4fb   : > { %4704 = vst [vmem:[%s6779_s13 + $0x490] sm:$0xff] %v4448_v3  ;;  %4703 = vst [vmem:[%s6779_s13 + $0x488] sm:$0xff] %v4447_v4  ;;  %v2794_v10 = vpop.f32.mrb[74].mxu0  ;;  %v754_v4 = vld [vmem:[%s6779_s13 + $0x550] sm:$0xff] }
 0x4fc   : > { %4705 = vst [vmem:[%s6779_s13 + $0x498] sm:$0xff] %v4449_v7  ;;  %v4450_v12 = vadd.f32 %v2794_v10, %v732_v6  ;;  %v4141_v13 = vpop.f32.mrb[74].mxu1  ;;  %v2796_v14 = vpop.f32.mrb[75].mxu0  ;;  %v755_v7 = vld [vmem:[%s6779_s13 + $0x558] sm:$0xff] }
 0x4fd   : > { %v4452_v15 = vadd.f32 %v4141_v13, %v734_v8  ;;  %v4451_v16 = vadd.f32 %v2796_v14, %v733_v9  ;;  %v4143_v17 = vpop.f32.mrb[75].mxu1  ;;  %v756_v14 = vld [vmem:[%s6779_s13 + $0x560] sm:$0xff] }
 0x4fe   : > { %4706 = vst [vmem:[%s6779_s13 + $0x4a0] sm:$0xff] %v4450_v12  ;;  %v4453_v19 = vadd.f32 %v4143_v17, %v735_v11  ;;  %v757_v17 = vld [vmem:[%s6779_s13 + $0x568] sm:$0xff] }
 0x4ff   : > { %4708 = vst [vmem:[%s6779_s13 + $0x4b0] sm:$0xff] %v4452_v15  ;;  %4707 = vst [vmem:[%s6779_s13 + $0x4a8] sm:$0xff] %v4451_v16  ;;  %v2800_v22 = vpop.f32.mrb[76].mxu0  ;;  %v758_v16 = vld [vmem:[%s6779_s13 + $0x570] sm:$0xff] }
 0x500   : > { %4709 = vst [vmem:[%s6779_s13 + $0x4b8] sm:$0xff] %v4453_v19  ;;  %v4454_v24 = vadd.f32 %v2800_v22, %v736_v18  ;;  %v4147_v25 = vpop.f32.mrb[76].mxu1  ;;  %v2802_v26 = vpop.f32.mrb[77].mxu0  ;;  %v759_v19 = vld [vmem:[%s6779_s13 + $0x578] sm:$0xff] }
 0x501   : > { %v4456_v27 = vadd.f32 %v4147_v25, %v738_v20  ;;  %v4455_v28 = vadd.f32 %v2802_v26, %v737_v21  ;;  %v4149_v29 = vpop.f32.mrb[77].mxu1  ;;  %v760_v26 = vld [vmem:[%s6779_s13 + $0x580] sm:$0xff] }
 0x502   : > { %4710 = vst [vmem:[%s6779_s13 + $0x4c0] sm:$0xff] %v4454_v24  ;;  %v4457_v31 = vadd.f32 %v4149_v29, %v739_v23  ;;  %v761_v29 = vld [vmem:[%s6779_s13 + $0x588] sm:$0xff] }
 0x503   : > { %4712 = vst [vmem:[%s6779_s13 + $0x4d0] sm:$0xff] %v4456_v27  ;;  %4711 = vst [vmem:[%s6779_s13 + $0x4c8] sm:$0xff] %v4455_v28  ;;  %v2806_v34 = vpop.f32.mrb[78].mxu0  ;;  %v762_v28 = vld [vmem:[%s6779_s13 + $0x590] sm:$0xff] }
 0x504   : > { %4713 = vst [vmem:[%s6779_s13 + $0x4d8] sm:$0xff] %v4457_v31  ;;  %v4458_v36 = vadd.f32 %v2806_v34, %v740_v30  ;;  %v4153_v37 = vpop.f32.mrb[78].mxu1  ;;  %v2808_v38 = vpop.f32.mrb[79].mxu0  ;;  %v763_v31 = vld [vmem:[%s6779_s13 + $0x598] sm:$0xff] }
 0x505   : > { %v4460_v39 = vadd.f32 %v4153_v37, %v742_v32  ;;  %v4459_v40 = vadd.f32 %v2808_v38, %v741_v33  ;;  %v4155_v41 = vpop.f32.mrb[79].mxu1  ;;  %v764_v38 = vld [vmem:[%s6779_s13 + $0x5a0] sm:$0xff] }
 0x506   : > { %4714 = vst [vmem:[%s6779_s13 + $0x4e0] sm:$0xff] %v4458_v36  ;;  %v4461_v43 = vadd.f32 %v4155_v41, %v743_v35  ;;  %v765_v41 = vld [vmem:[%s6779_s13 + $0x5a8] sm:$0xff] }
 0x507   : > { %4716 = vst [vmem:[%s6779_s13 + $0x4f0] sm:$0xff] %v4460_v39  ;;  %4715 = vst [vmem:[%s6779_s13 + $0x4e8] sm:$0xff] %v4459_v40  ;;  %v2812_v46 = vpop.f32.mrb[80].mxu0  ;;  %v766_v40 = vld [vmem:[%s6779_s13 + $0x5b0] sm:$0xff] }
 0x508   : > { %4717 = vst [vmem:[%s6779_s13 + $0x4f8] sm:$0xff] %v4461_v43  ;;  %v4462_v48 = vadd.f32 %v2812_v46, %v744_v42  ;;  %v4159_v49 = vpop.f32.mrb[80].mxu1  ;;  %v2814_v50 = vpop.f32.mrb[81].mxu0  ;;  %v767_v43 = vld [vmem:[%s6779_s13 + $0x5b8] sm:$0xff] }
 0x509   : > { %v4464_v51 = vadd.f32 %v4159_v49, %v746_v44  ;;  %v4463_v52 = vadd.f32 %v2814_v50, %v745_v45  ;;  %v4161_v53 = vpop.f32.mrb[81].mxu1  ;;  %v768_v50 = vld [vmem:[%s6779_s13 + $0x5c0] sm:$0xff] }
 0x50a   : > { %4718 = vst [vmem:[%s6779_s13 + $0x500] sm:$0xff] %v4462_v48  ;;  %v4465_v55 = vadd.f32 %v4161_v53, %v747_v47  ;;  %v769_v53 = vld [vmem:[%s6779_s13 + $0x5c8] sm:$0xff] }
 0x50b   : > { %4720 = vst [vmem:[%s6779_s13 + $0x510] sm:$0xff] %v4464_v51  ;;  %4719 = vst [vmem:[%s6779_s13 + $0x508] sm:$0xff] %v4463_v52  ;;  %v2818_v58 = vpop.f32.mrb[82].mxu0  ;;  %v770_v52 = vld [vmem:[%s6779_s13 + $0x5d0] sm:$0xff] }
 0x50c   : > { %4721 = vst [vmem:[%s6779_s13 + $0x518] sm:$0xff] %v4465_v55  ;;  %v4466_v60 = vadd.f32 %v2818_v58, %v748_v54  ;;  %v4165_v61 = vpop.f32.mrb[82].mxu1  ;;  %v2820_v62 = vpop.f32.mrb[83].mxu0  ;;  %v771_v55 = vld [vmem:[%s6779_s13 + $0x5d8] sm:$0xff] }
 0x50d   : > { %v4468_v63 = vadd.f32 %v4165_v61, %v750_v56  ;;  %v4467_v0 = vadd.f32 %v2820_v62, %v749_v57  ;;  %v4167_v1 = vpop.f32.mrb[83].mxu1  ;;  %v772_v62 = vld [vmem:[%s6779_s13 + $0x5e0] sm:$0xff] }
 0x50e   : > { %4722 = vst [vmem:[%s6779_s13 + $0x520] sm:$0xff] %v4466_v60  ;;  %v4469_v3 = vadd.f32 %v4167_v1, %v751_v59  ;;  %v773_v1 = vld [vmem:[%s6779_s13 + $0x5e8] sm:$0xff] }
 0x50f   : > { %4724 = vst [vmem:[%s6779_s13 + $0x530] sm:$0xff] %v4468_v63  ;;  %4723 = vst [vmem:[%s6779_s13 + $0x528] sm:$0xff] %v4467_v0  ;;  %v2824_v6 = vpop.f32.mrb[84].mxu0  ;;  %v774_v0 = vld [vmem:[%s6779_s13 + $0x5f0] sm:$0xff] }
 0x510   : > { %4725 = vst [vmem:[%s6779_s13 + $0x538] sm:$0xff] %v4469_v3  ;;  %v4470_v8 = vadd.f32 %v2824_v6, %v752_v2  ;;  %v4171_v9 = vpop.f32.mrb[84].mxu1  ;;  %v2826_v10 = vpop.f32.mrb[85].mxu0  ;;  %v775_v3 = vld [vmem:[%s6779_s13 + $0x5f8] sm:$0xff] }
 0x511   : > { %v4472_v11 = vadd.f32 %v4171_v9, %v754_v4  ;;  %v4471_v12 = vadd.f32 %v2826_v10, %v753_v5  ;;  %v4173_v13 = vpop.f32.mrb[85].mxu1  ;;  %v776_v10 = vld [vmem:[%s6779_s13 + $0x600] sm:$0xff] }
 0x512   : > { %4726 = vst [vmem:[%s6779_s13 + $0x540] sm:$0xff] %v4470_v8  ;;  %v4473_v15 = vadd.f32 %v4173_v13, %v755_v7  ;;  %v777_v13 = vld [vmem:[%s6779_s13 + $0x608] sm:$0xff] }
 0x513   : > { %4728 = vst [vmem:[%s6779_s13 + $0x550] sm:$0xff] %v4472_v11  ;;  %4727 = vst [vmem:[%s6779_s13 + $0x548] sm:$0xff] %v4471_v12  ;;  %v2830_v18 = vpop.f32.mrb[86].mxu0  ;;  %v778_v12 = vld [vmem:[%s6779_s13 + $0x610] sm:$0xff] }
 0x514   : > { %4729 = vst [vmem:[%s6779_s13 + $0x558] sm:$0xff] %v4473_v15  ;;  %v4474_v20 = vadd.f32 %v2830_v18, %v756_v14  ;;  %v4177_v21 = vpop.f32.mrb[86].mxu1  ;;  %v2832_v22 = vpop.f32.mrb[87].mxu0  ;;  %v779_v15 = vld [vmem:[%s6779_s13 + $0x618] sm:$0xff] }
 0x515   : > { %v4476_v23 = vadd.f32 %v4177_v21, %v758_v16  ;;  %v4475_v24 = vadd.f32 %v2832_v22, %v757_v17  ;;  %v4179_v25 = vpop.f32.mrb[87].mxu1  ;;  %v780_v22 = vld [vmem:[%s6779_s13 + $0x620] sm:$0xff] }
 0x516   : > { %4730 = vst [vmem:[%s6779_s13 + $0x560] sm:$0xff] %v4474_v20  ;;  %v4477_v27 = vadd.f32 %v4179_v25, %v759_v19  ;;  %v781_v25 = vld [vmem:[%s6779_s13 + $0x628] sm:$0xff] }
 0x517   : > { %4732 = vst [vmem:[%s6779_s13 + $0x570] sm:$0xff] %v4476_v23  ;;  %4731 = vst [vmem:[%s6779_s13 + $0x568] sm:$0xff] %v4475_v24  ;;  %v2836_v30 = vpop.f32.mrb[88].mxu0  ;;  %v782_v24 = vld [vmem:[%s6779_s13 + $0x630] sm:$0xff] }
 0x518   : > { %4733 = vst [vmem:[%s6779_s13 + $0x578] sm:$0xff] %v4477_v27  ;;  %v4478_v32 = vadd.f32 %v2836_v30, %v760_v26  ;;  %v4183_v33 = vpop.f32.mrb[88].mxu1  ;;  %v2838_v34 = vpop.f32.mrb[89].mxu0  ;;  %v783_v27 = vld [vmem:[%s6779_s13 + $0x638] sm:$0xff] }
 0x519   : > { %v4480_v35 = vadd.f32 %v4183_v33, %v762_v28  ;;  %v4479_v36 = vadd.f32 %v2838_v34, %v761_v29  ;;  %v4185_v37 = vpop.f32.mrb[89].mxu1  ;;  %v784_v34 = vld [vmem:[%s6779_s13 + $0x640] sm:$0xff] }
 0x51a   : > { %4734 = vst [vmem:[%s6779_s13 + $0x580] sm:$0xff] %v4478_v32  ;;  %v4481_v39 = vadd.f32 %v4185_v37, %v763_v31  ;;  %v785_v37 = vld [vmem:[%s6779_s13 + $0x648] sm:$0xff] }
 0x51b   : > { %4736 = vst [vmem:[%s6779_s13 + $0x590] sm:$0xff] %v4480_v35  ;;  %4735 = vst [vmem:[%s6779_s13 + $0x588] sm:$0xff] %v4479_v36  ;;  %v2842_v42 = vpop.f32.mrb[90].mxu0  ;;  %v786_v36 = vld [vmem:[%s6779_s13 + $0x650] sm:$0xff] }
 0x51c   : > { %4737 = vst [vmem:[%s6779_s13 + $0x598] sm:$0xff] %v4481_v39  ;;  %v4482_v44 = vadd.f32 %v2842_v42, %v764_v38  ;;  %v4189_v45 = vpop.f32.mrb[90].mxu1  ;;  %v2844_v46 = vpop.f32.mrb[91].mxu0  ;;  %v787_v39 = vld [vmem:[%s6779_s13 + $0x658] sm:$0xff] }
 0x51d   : > { %v4484_v47 = vadd.f32 %v4189_v45, %v766_v40  ;;  %v4483_v48 = vadd.f32 %v2844_v46, %v765_v41  ;;  %v4191_v49 = vpop.f32.mrb[91].mxu1  ;;  %v788_v46 = vld [vmem:[%s6779_s13 + $0x660] sm:$0xff] }
 0x51e   : > { %4738 = vst [vmem:[%s6779_s13 + $0x5a0] sm:$0xff] %v4482_v44  ;;  %v4485_v51 = vadd.f32 %v4191_v49, %v767_v43  ;;  %v789_v49 = vld [vmem:[%s6779_s13 + $0x668] sm:$0xff] }
 0x51f   : > { %4740 = vst [vmem:[%s6779_s13 + $0x5b0] sm:$0xff] %v4484_v47  ;;  %4739 = vst [vmem:[%s6779_s13 + $0x5a8] sm:$0xff] %v4483_v48  ;;  %v2848_v54 = vpop.f32.mrb[92].mxu0  ;;  %v790_v48 = vld [vmem:[%s6779_s13 + $0x670] sm:$0xff] }
 0x520   : > { %4741 = vst [vmem:[%s6779_s13 + $0x5b8] sm:$0xff] %v4485_v51  ;;  %v4486_v56 = vadd.f32 %v2848_v54, %v768_v50  ;;  %v4195_v57 = vpop.f32.mrb[92].mxu1  ;;  %v2850_v58 = vpop.f32.mrb[93].mxu0  ;;  %v791_v51 = vld [vmem:[%s6779_s13 + $0x678] sm:$0xff] }
 0x521   : > { %v4488_v59 = vadd.f32 %v4195_v57, %v770_v52  ;;  %v4487_v60 = vadd.f32 %v2850_v58, %v769_v53  ;;  %v4197_v61 = vpop.f32.mrb[93].mxu1  ;;  %v792_v58 = vld [vmem:[%s6779_s13 + $0x680] sm:$0xff] }
 0x522   : > { %4742 = vst [vmem:[%s6779_s13 + $0x5c0] sm:$0xff] %v4486_v56  ;;  %v4489_v63 = vadd.f32 %v4197_v61, %v771_v55  ;;  %v793_v61 = vld [vmem:[%s6779_s13 + $0x688] sm:$0xff] }
 0x523   : > { %4744 = vst [vmem:[%s6779_s13 + $0x5d0] sm:$0xff] %v4488_v59  ;;  %4743 = vst [vmem:[%s6779_s13 + $0x5c8] sm:$0xff] %v4487_v60  ;;  %v2854_v2 = vpop.f32.mrb[94].mxu0  ;;  %v794_v60 = vld [vmem:[%s6779_s13 + $0x690] sm:$0xff] }
 0x524   : > { %4745 = vst [vmem:[%s6779_s13 + $0x5d8] sm:$0xff] %v4489_v63  ;;  %v4490_v4 = vadd.f32 %v2854_v2, %v772_v62  ;;  %v4201_v5 = vpop.f32.mrb[94].mxu1  ;;  %v2856_v6 = vpop.f32.mrb[95].mxu0  ;;  %v795_v63 = vld [vmem:[%s6779_s13 + $0x698] sm:$0xff] }
 0x525   : > { %v4492_v7 = vadd.f32 %v4201_v5, %v774_v0  ;;  %v4491_v8 = vadd.f32 %v2856_v6, %v773_v1  ;;  %v4203_v9 = vpop.f32.mrb[95].mxu1  ;;  %v796_v6 = vld [vmem:[%s6779_s13 + $0x6a0] sm:$0xff] }
 0x526   : > { %4746 = vst [vmem:[%s6779_s13 + $0x5e0] sm:$0xff] %v4490_v4  ;;  %v4493_v11 = vadd.f32 %v4203_v9, %v775_v3  ;;  %v797_v9 = vld [vmem:[%s6779_s13 + $0x6a8] sm:$0xff] }
 0x527   : > { %4748 = vst [vmem:[%s6779_s13 + $0x5f0] sm:$0xff] %v4492_v7  ;;  %4747 = vst [vmem:[%s6779_s13 + $0x5e8] sm:$0xff] %v4491_v8  ;;  %v2860_v14 = vpop.f32.mrb[96].mxu0  ;;  %v798_v8 = vld [vmem:[%s6779_s13 + $0x6b0] sm:$0xff] }
 0x528   : > { %4749 = vst [vmem:[%s6779_s13 + $0x5f8] sm:$0xff] %v4493_v11  ;;  %v4494_v16 = vadd.f32 %v2860_v14, %v776_v10  ;;  %v4207_v17 = vpop.f32.mrb[96].mxu1  ;;  %v2862_v18 = vpop.f32.mrb[97].mxu0  ;;  %v799_v11 = vld [vmem:[%s6779_s13 + $0x6b8] sm:$0xff] }
 0x529   : > { %v4496_v19 = vadd.f32 %v4207_v17, %v778_v12  ;;  %v4495_v20 = vadd.f32 %v2862_v18, %v777_v13  ;;  %v4209_v21 = vpop.f32.mrb[97].mxu1  ;;  %v800_v18 = vld [vmem:[%s6779_s13 + $0x6c0] sm:$0xff] }
 0x52a   : > { %4750 = vst [vmem:[%s6779_s13 + $0x600] sm:$0xff] %v4494_v16  ;;  %v4497_v23 = vadd.f32 %v4209_v21, %v779_v15  ;;  %v801_v21 = vld [vmem:[%s6779_s13 + $0x6c8] sm:$0xff] }
 0x52b   : > { %4752 = vst [vmem:[%s6779_s13 + $0x610] sm:$0xff] %v4496_v19  ;;  %4751 = vst [vmem:[%s6779_s13 + $0x608] sm:$0xff] %v4495_v20  ;;  %v2866_v26 = vpop.f32.mrb[98].mxu0  ;;  %v802_v20 = vld [vmem:[%s6779_s13 + $0x6d0] sm:$0xff] }
 0x52c   : > { %4753 = vst [vmem:[%s6779_s13 + $0x618] sm:$0xff] %v4497_v23  ;;  %v4498_v28 = vadd.f32 %v2866_v26, %v780_v22  ;;  %v4213_v29 = vpop.f32.mrb[98].mxu1  ;;  %v2868_v30 = vpop.f32.mrb[99].mxu0  ;;  %v803_v23 = vld [vmem:[%s6779_s13 + $0x6d8] sm:$0xff] }
 0x52d   : > { %v4500_v31 = vadd.f32 %v4213_v29, %v782_v24  ;;  %v4499_v32 = vadd.f32 %v2868_v30, %v781_v25  ;;  %v4215_v33 = vpop.f32.mrb[99].mxu1  ;;  %v804_v30 = vld [vmem:[%s6779_s13 + $0x6e0] sm:$0xff] }
 0x52e   : > { %4754 = vst [vmem:[%s6779_s13 + $0x620] sm:$0xff] %v4498_v28  ;;  %v4501_v35 = vadd.f32 %v4215_v33, %v783_v27  ;;  %v805_v33 = vld [vmem:[%s6779_s13 + $0x6e8] sm:$0xff] }
 0x52f   : > { %4756 = vst [vmem:[%s6779_s13 + $0x630] sm:$0xff] %v4500_v31  ;;  %4755 = vst [vmem:[%s6779_s13 + $0x628] sm:$0xff] %v4499_v32  ;;  %v2872_v38 = vpop.f32.mrb[100].mxu0  ;;  %v806_v32 = vld [vmem:[%s6779_s13 + $0x6f0] sm:$0xff] }
 0x530   : > { %4757 = vst [vmem:[%s6779_s13 + $0x638] sm:$0xff] %v4501_v35  ;;  %v4502_v40 = vadd.f32 %v2872_v38, %v784_v34  ;;  %v4219_v41 = vpop.f32.mrb[100].mxu1  ;;  %v2874_v42 = vpop.f32.mrb[101].mxu0  ;;  %v807_v35 = vld [vmem:[%s6779_s13 + $0x6f8] sm:$0xff] }
 0x531   : > { %v4504_v43 = vadd.f32 %v4219_v41, %v786_v36  ;;  %v4503_v44 = vadd.f32 %v2874_v42, %v785_v37  ;;  %v4221_v45 = vpop.f32.mrb[101].mxu1  ;;  %v808_v42 = vld [vmem:[%s6779_s13 + $0x700] sm:$0xff] }
 0x532   : > { %4758 = vst [vmem:[%s6779_s13 + $0x640] sm:$0xff] %v4502_v40  ;;  %v4505_v47 = vadd.f32 %v4221_v45, %v787_v39  ;;  %v809_v45 = vld [vmem:[%s6779_s13 + $0x708] sm:$0xff] }
 0x533   : > { %4760 = vst [vmem:[%s6779_s13 + $0x650] sm:$0xff] %v4504_v43  ;;  %4759 = vst [vmem:[%s6779_s13 + $0x648] sm:$0xff] %v4503_v44  ;;  %v2878_v50 = vpop.f32.mrb[102].mxu0  ;;  %v810_v44 = vld [vmem:[%s6779_s13 + $0x710] sm:$0xff] }
 0x534   : > { %4761 = vst [vmem:[%s6779_s13 + $0x658] sm:$0xff] %v4505_v47  ;;  %v4506_v52 = vadd.f32 %v2878_v50, %v788_v46  ;;  %v4225_v53 = vpop.f32.mrb[102].mxu1  ;;  %v2880_v54 = vpop.f32.mrb[103].mxu0  ;;  %v811_v47 = vld [vmem:[%s6779_s13 + $0x718] sm:$0xff] }
 0x535   : > { %v4508_v55 = vadd.f32 %v4225_v53, %v790_v48  ;;  %v4507_v56 = vadd.f32 %v2880_v54, %v789_v49  ;;  %v4227_v57 = vpop.f32.mrb[103].mxu1  ;;  %v812_v54 = vld [vmem:[%s6779_s13 + $0x720] sm:$0xff] }
 0x536   : > { %4762 = vst [vmem:[%s6779_s13 + $0x660] sm:$0xff] %v4506_v52  ;;  %v4509_v59 = vadd.f32 %v4227_v57, %v791_v51  ;;  %v813_v57 = vld [vmem:[%s6779_s13 + $0x728] sm:$0xff] }
 0x537   : > { %4764 = vst [vmem:[%s6779_s13 + $0x670] sm:$0xff] %v4508_v55  ;;  %4763 = vst [vmem:[%s6779_s13 + $0x668] sm:$0xff] %v4507_v56  ;;  %v2884_v62 = vpop.f32.mrb[104].mxu0  ;;  %v814_v56 = vld [vmem:[%s6779_s13 + $0x730] sm:$0xff] }
 0x538   : > { %4765 = vst [vmem:[%s6779_s13 + $0x678] sm:$0xff] %v4509_v59  ;;  %v4510_v0 = vadd.f32 %v2884_v62, %v792_v58  ;;  %v4231_v1 = vpop.f32.mrb[104].mxu1  ;;  %v2886_v2 = vpop.f32.mrb[105].mxu0  ;;  %v815_v59 = vld [vmem:[%s6779_s13 + $0x738] sm:$0xff] }
 0x539   : > { %v4512_v3 = vadd.f32 %v4231_v1, %v794_v60  ;;  %v4511_v4 = vadd.f32 %v2886_v2, %v793_v61  ;;  %v4233_v5 = vpop.f32.mrb[105].mxu1  ;;  %v816_v2 = vld [vmem:[%s6779_s13 + $0x740] sm:$0xff] }
 0x53a   : > { %4766 = vst [vmem:[%s6779_s13 + $0x680] sm:$0xff] %v4510_v0  ;;  %v4513_v7 = vadd.f32 %v4233_v5, %v795_v63  ;;  %v817_v5 = vld [vmem:[%s6779_s13 + $0x748] sm:$0xff] }
 0x53b   : > { %4768 = vst [vmem:[%s6779_s13 + $0x690] sm:$0xff] %v4512_v3  ;;  %4767 = vst [vmem:[%s6779_s13 + $0x688] sm:$0xff] %v4511_v4  ;;  %v2890_v10 = vpop.f32.mrb[106].mxu0  ;;  %v818_v4 = vld [vmem:[%s6779_s13 + $0x750] sm:$0xff] }
 0x53c   : > { %4769 = vst [vmem:[%s6779_s13 + $0x698] sm:$0xff] %v4513_v7  ;;  %v4514_v12 = vadd.f32 %v2890_v10, %v796_v6  ;;  %v4237_v13 = vpop.f32.mrb[106].mxu1  ;;  %v2892_v14 = vpop.f32.mrb[107].mxu0  ;;  %v819_v7 = vld [vmem:[%s6779_s13 + $0x758] sm:$0xff] }
 0x53d   : > { %v4516_v15 = vadd.f32 %v4237_v13, %v798_v8  ;;  %v4515_v16 = vadd.f32 %v2892_v14, %v797_v9  ;;  %v4239_v17 = vpop.f32.mrb[107].mxu1  ;;  %v820_v14 = vld [vmem:[%s6779_s13 + $0x760] sm:$0xff] }
 0x53e   : > { %4770 = vst [vmem:[%s6779_s13 + $0x6a0] sm:$0xff] %v4514_v12  ;;  %v4517_v19 = vadd.f32 %v4239_v17, %v799_v11  ;;  %v821_v17 = vld [vmem:[%s6779_s13 + $0x768] sm:$0xff] }
 0x53f   : > { %4772 = vst [vmem:[%s6779_s13 + $0x6b0] sm:$0xff] %v4516_v15  ;;  %4771 = vst [vmem:[%s6779_s13 + $0x6a8] sm:$0xff] %v4515_v16  ;;  %v2896_v22 = vpop.f32.mrb[108].mxu0  ;;  %v822_v16 = vld [vmem:[%s6779_s13 + $0x770] sm:$0xff] }
 0x540   : > { %4773 = vst [vmem:[%s6779_s13 + $0x6b8] sm:$0xff] %v4517_v19  ;;  %v4518_v24 = vadd.f32 %v2896_v22, %v800_v18  ;;  %v4243_v25 = vpop.f32.mrb[108].mxu1  ;;  %v2898_v26 = vpop.f32.mrb[109].mxu0  ;;  %v823_v19 = vld [vmem:[%s6779_s13 + $0x778] sm:$0xff] }
 0x541   : > { %v4520_v27 = vadd.f32 %v4243_v25, %v802_v20  ;;  %v4519_v28 = vadd.f32 %v2898_v26, %v801_v21  ;;  %v4245_v29 = vpop.f32.mrb[109].mxu1  ;;  %v824_v26 = vld [vmem:[%s6779_s13 + $0x780] sm:$0xff] }
 0x542   : > { %4774 = vst [vmem:[%s6779_s13 + $0x6c0] sm:$0xff] %v4518_v24  ;;  %v4521_v31 = vadd.f32 %v4245_v29, %v803_v23  ;;  %v825_v29 = vld [vmem:[%s6779_s13 + $0x788] sm:$0xff] }
 0x543   : > { %4776 = vst [vmem:[%s6779_s13 + $0x6d0] sm:$0xff] %v4520_v27  ;;  %4775 = vst [vmem:[%s6779_s13 + $0x6c8] sm:$0xff] %v4519_v28  ;;  %v2902_v34 = vpop.f32.mrb[110].mxu0  ;;  %v826_v28 = vld [vmem:[%s6779_s13 + $0x790] sm:$0xff] }
 0x544   : > { %4777 = vst [vmem:[%s6779_s13 + $0x6d8] sm:$0xff] %v4521_v31  ;;  %v4522_v36 = vadd.f32 %v2902_v34, %v804_v30  ;;  %v4249_v37 = vpop.f32.mrb[110].mxu1  ;;  %v2904_v38 = vpop.f32.mrb[111].mxu0  ;;  %v827_v31 = vld [vmem:[%s6779_s13 + $0x798] sm:$0xff] }
 0x545   : > { %v4524_v39 = vadd.f32 %v4249_v37, %v806_v32  ;;  %v4523_v40 = vadd.f32 %v2904_v38, %v805_v33  ;;  %v4251_v41 = vpop.f32.mrb[111].mxu1  ;;  %v828_v38 = vld [vmem:[%s6779_s13 + $0x7a0] sm:$0xff] }
 0x546   : > { %4778 = vst [vmem:[%s6779_s13 + $0x6e0] sm:$0xff] %v4522_v36  ;;  %v4525_v43 = vadd.f32 %v4251_v41, %v807_v35  ;;  %v829_v41 = vld [vmem:[%s6779_s13 + $0x7a8] sm:$0xff] }
 0x547   : > { %4780 = vst [vmem:[%s6779_s13 + $0x6f0] sm:$0xff] %v4524_v39  ;;  %4779 = vst [vmem:[%s6779_s13 + $0x6e8] sm:$0xff] %v4523_v40  ;;  %v2908_v46 = vpop.f32.mrb[112].mxu0  ;;  %v830_v40 = vld [vmem:[%s6779_s13 + $0x7b0] sm:$0xff] }
 0x548   : > { %4781 = vst [vmem:[%s6779_s13 + $0x6f8] sm:$0xff] %v4525_v43  ;;  %v4526_v48 = vadd.f32 %v2908_v46, %v808_v42  ;;  %v4255_v49 = vpop.f32.mrb[112].mxu1  ;;  %v2910_v50 = vpop.f32.mrb[113].mxu0  ;;  %v831_v43 = vld [vmem:[%s6779_s13 + $0x7b8] sm:$0xff] }
 0x549   : > { %v4528_v51 = vadd.f32 %v4255_v49, %v810_v44  ;;  %v4527_v52 = vadd.f32 %v2910_v50, %v809_v45  ;;  %v4257_v53 = vpop.f32.mrb[113].mxu1  ;;  %v832_v50 = vld [vmem:[%s6779_s13 + $0x7c0] sm:$0xff] }
 0x54a   : > { %4782 = vst [vmem:[%s6779_s13 + $0x700] sm:$0xff] %v4526_v48  ;;  %v4529_v55 = vadd.f32 %v4257_v53, %v811_v47  ;;  %v833_v53 = vld [vmem:[%s6779_s13 + $0x7c8] sm:$0xff] }
 0x54b   : > { %4784 = vst [vmem:[%s6779_s13 + $0x710] sm:$0xff] %v4528_v51  ;;  %4783 = vst [vmem:[%s6779_s13 + $0x708] sm:$0xff] %v4527_v52  ;;  %v2914_v58 = vpop.f32.mrb[114].mxu0  ;;  %v834_v52 = vld [vmem:[%s6779_s13 + $0x7d0] sm:$0xff] }
 0x54c   : > { %4785 = vst [vmem:[%s6779_s13 + $0x718] sm:$0xff] %v4529_v55  ;;  %v4530_v60 = vadd.f32 %v2914_v58, %v812_v54  ;;  %v4261_v61 = vpop.f32.mrb[114].mxu1  ;;  %v2916_v62 = vpop.f32.mrb[115].mxu0  ;;  %v835_v55 = vld [vmem:[%s6779_s13 + $0x7d8] sm:$0xff] }
 0x54d   : > { %v4532_v63 = vadd.f32 %v4261_v61, %v814_v56  ;;  %v4531_v0 = vadd.f32 %v2916_v62, %v813_v57  ;;  %v4263_v1 = vpop.f32.mrb[115].mxu1  ;;  %v836_v62 = vld [vmem:[%s6779_s13 + $0x7e0] sm:$0xff] }
 0x54e   : > { %4786 = vst [vmem:[%s6779_s13 + $0x720] sm:$0xff] %v4530_v60  ;;  %v4533_v3 = vadd.f32 %v4263_v1, %v815_v59  ;;  %v837_v1 = vld [vmem:[%s6779_s13 + $0x7e8] sm:$0xff] }
 0x54f   : > { %4788 = vst [vmem:[%s6779_s13 + $0x730] sm:$0xff] %v4532_v63  ;;  %4787 = vst [vmem:[%s6779_s13 + $0x728] sm:$0xff] %v4531_v0  ;;  %v2920_v6 = vpop.f32.mrb[116].mxu0  ;;  %v838_v0 = vld [vmem:[%s6779_s13 + $0x7f0] sm:$0xff] }
 0x550   : > { %4789 = vst [vmem:[%s6779_s13 + $0x738] sm:$0xff] %v4533_v3  ;;  %v4534_v8 = vadd.f32 %v2920_v6, %v816_v2  ;;  %v4267_v9 = vpop.f32.mrb[116].mxu1  ;;  %v2922_v10 = vpop.f32.mrb[117].mxu0  ;;  %v839_v3 = vld [vmem:[%s6779_s13 + $0x7f8] sm:$0xff] }
 0x551   : > { %v4536_v11 = vadd.f32 %v4267_v9, %v818_v4  ;;  %v4535_v12 = vadd.f32 %v2922_v10, %v817_v5  ;;  %v4269_v13 = vpop.f32.mrb[117].mxu1 }
 0x552   : > { %4790 = vst [vmem:[%s6779_s13 + $0x740] sm:$0xff] %v4534_v8  ;;  %v4537_v15 = vadd.f32 %v4269_v13, %v819_v7 }
 0x553   : > { %4792 = vst [vmem:[%s6779_s13 + $0x750] sm:$0xff] %v4536_v11  ;;  %4791 = vst [vmem:[%s6779_s13 + $0x748] sm:$0xff] %v4535_v12  ;;  %v2926_v18 = vpop.f32.mrb[118].mxu0 }
 0x554   : > { %4793 = vst [vmem:[%s6779_s13 + $0x758] sm:$0xff] %v4537_v15  ;;  %v4538_v20 = vadd.f32 %v2926_v18, %v820_v14  ;;  %v4273_v21 = vpop.f32.mrb[118].mxu1  ;;  %v2928_v22 = vpop.f32.mrb[119].mxu0 }
 0x555   : > { %v4540_v23 = vadd.f32 %v4273_v21, %v822_v16  ;;  %v4539_v24 = vadd.f32 %v2928_v22, %v821_v17  ;;  %v4275_v25 = vpop.f32.mrb[119].mxu1 }
 0x556   : > { %4794 = vst [vmem:[%s6779_s13 + $0x760] sm:$0xff] %v4538_v20  ;;  %v4541_v27 = vadd.f32 %v4275_v25, %v823_v19 }
 0x557   : > { %4796 = vst [vmem:[%s6779_s13 + $0x770] sm:$0xff] %v4540_v23  ;;  %4795 = vst [vmem:[%s6779_s13 + $0x768] sm:$0xff] %v4539_v24  ;;  %v2932_v30 = vpop.f32.mrb[120].mxu0 }
 0x558   : > { %4797 = vst [vmem:[%s6779_s13 + $0x778] sm:$0xff] %v4541_v27  ;;  %v4542_v32 = vadd.f32 %v2932_v30, %v824_v26  ;;  %v4279_v33 = vpop.f32.mrb[120].mxu1  ;;  %v2934_v34 = vpop.f32.mrb[121].mxu0 }
 0x559   : > { %v4544_v35 = vadd.f32 %v4279_v33, %v826_v28  ;;  %v4543_v36 = vadd.f32 %v2934_v34, %v825_v29  ;;  %v4281_v37 = vpop.f32.mrb[121].mxu1 }
 0x55a   : > { %4798 = vst [vmem:[%s6779_s13 + $0x780] sm:$0xff] %v4542_v32  ;;  %v4545_v39 = vadd.f32 %v4281_v37, %v827_v31 }
 0x55b   : > { %4800 = vst [vmem:[%s6779_s13 + $0x790] sm:$0xff] %v4544_v35  ;;  %4799 = vst [vmem:[%s6779_s13 + $0x788] sm:$0xff] %v4543_v36  ;;  %v2938_v42 = vpop.f32.mrb[122].mxu0 }
 0x55c   : > { %4801 = vst [vmem:[%s6779_s13 + $0x798] sm:$0xff] %v4545_v39  ;;  %v4546_v44 = vadd.f32 %v2938_v42, %v828_v38  ;;  %v4285_v45 = vpop.f32.mrb[122].mxu1  ;;  %v2940_v46 = vpop.f32.mrb[123].mxu0 }
 0x55d   : > { %v4548_v47 = vadd.f32 %v4285_v45, %v830_v40  ;;  %v4547_v48 = vadd.f32 %v2940_v46, %v829_v41  ;;  %v4287_v49 = vpop.f32.mrb[123].mxu1 }
 0x55e   : > { %4802 = vst [vmem:[%s6779_s13 + $0x7a0] sm:$0xff] %v4546_v44  ;;  %v4549_v51 = vadd.f32 %v4287_v49, %v831_v43 }
 0x55f   : > { %4804 = vst [vmem:[%s6779_s13 + $0x7b0] sm:$0xff] %v4548_v47  ;;  %4803 = vst [vmem:[%s6779_s13 + $0x7a8] sm:$0xff] %v4547_v48  ;;  %v2944_v54 = vpop.f32.mrb[124].mxu0 }
 0x560   : > { %4805 = vst [vmem:[%s6779_s13 + $0x7b8] sm:$0xff] %v4549_v51  ;;  %v4550_v56 = vadd.f32 %v2944_v54, %v832_v50  ;;  %v4291_v57 = vpop.f32.mrb[124].mxu1  ;;  %v2946_v58 = vpop.f32.mrb[125].mxu0 }
 0x561   : > { %v4552_v59 = vadd.f32 %v4291_v57, %v834_v52  ;;  %v4551_v60 = vadd.f32 %v2946_v58, %v833_v53  ;;  %v4293_v61 = vpop.f32.mrb[125].mxu1 }
 0x562   : > { %4806 = vst [vmem:[%s6779_s13 + $0x7c0] sm:$0xff] %v4550_v56  ;;  %v4553_v63 = vadd.f32 %v4293_v61, %v835_v55 }
 0x563   : > { %4808 = vst [vmem:[%s6779_s13 + $0x7d0] sm:$0xff] %v4552_v59  ;;  %4807 = vst [vmem:[%s6779_s13 + $0x7c8] sm:$0xff] %v4551_v60  ;;  %v2950_v2 = vpop.f32.mrb[126].mxu0 }
 0x564   : > { %4809 = vst [vmem:[%s6779_s13 + $0x7d8] sm:$0xff] %v4553_v63  ;;  %v4554_v4 = vadd.f32 %v2950_v2, %v836_v62  ;;  %v4297_v5 = vpop.f32.mrb[126].mxu1  ;;  %v2952_v6 = vpop.f32.mrb[127].mxu0 }
 0x565   : > { %v4556_v7 = vadd.f32 %v4297_v5, %v838_v0  ;;  %v4555_v8 = vadd.f32 %v2952_v6, %v837_v1  ;;  %v4299_v9 = vpop.f32.mrb[127].mxu1 }
 0x566   : > { %4810 = vst [vmem:[%s6779_s13 + $0x7e0] sm:$0xff] %v4554_v4  ;;  %v4557_v10 = vadd.f32 %v4299_v9, %v839_v3 }
 0x567   : > { %4812 = vst [vmem:[%s6779_s13 + $0x7f0] sm:$0xff] %v4556_v7  ;;  %4811 = vst [vmem:[%s6779_s13 + $0x7e8] sm:$0xff] %v4555_v8 }
 0x568   : > { %4813 = vst [vmem:[%s6779_s13 + $0x7f8] sm:$0xff] %v4557_v10 }
 0x569   : > { %6189 = shalt.err (!%p6186_p12)
}
 0x56a   : > { %s6190_s15 = scalar_lea.hbm %s8584_s29, 32768  ;;  %s6194_s21 = scalar_lea.hbm %s8769_s3, 262144 }
 0x56b   : > { %p6191_p2 = scmp.ne.s32.totalorder %s8584_s29, %s6190_s15  ;;  %p6195_p6 = scmp.lt.u32.totalorder %s8584_s29, %s8769_s3 }
 0x56c   : > { %p6196_p7 = scmp.lt.u32.totalorder %s6194_s21, %s6190_s15  ;;  %p6198_p5 = scmp.lt.u32.totalorder %s6190_s15, %s8584_s29 }
 0x56d   : > { %p6192_p4 = pnand %p6191_p2, %p8770_p13 }
 0x56e   : > { %p6197_p8 = por %p6196_p7, %p6195_p6 }
 0x56f   : > { %p6193_p9 = pneg %p6192_p4 }
 0x570   : > { %p6199_p0 = por %p6198_p5, %p6197_p8 }
 0x572   : > { %p6200_p10 = pnand %p6199_p0, %p6193_p9 }
 0x574   : > { %6203 = shalt.err (!%p6200_p10)
}
 0x575   : > { %s6382_s10 = smov 512   ;;  %s6383_s9 = smov 1024  }
 0x576   : > { %s6384_s23 = smov 32  }
 0x577   : > { %5907 = dma.vmem_to_hbm [thread:$0]  (%p8770_p13), %s8586_s26, 32768, %s8584_s29, %s8594_s24, %s6382_s10, %s6383_s9, %s6384_s23  }
 0x578 PF: > { %s8771_s12 = sld [smem:[#allocation13_spill]]  ;;  %p5924_p3 = scmp.ge.s32.totalorder %s6370_s30, 2 }
 0x579   : > { %p8772_p11 = scmp.ne.s32.totalorder %s8753_s4, 0 }
 0x57b   : > { %p5920_p1 = pnand %p5924_p3, %p8772_p11 }
 0x57e   : > { %s4846_s18 = sand.u32 1, %s8771_s12  }
 0x57f   : > { %s4847_s25 = scalar_lea.sflag [#allocation4], %s4846_s18 }
 0x580   : > { %6293 = dma.done.wait (!%p5920_p1), %s4847_s25, 32768  }
 0x581   : > { %6295 = vsyncadd (!%p5920_p1), %s4847_s25, 4294934528  ;;  %s22_s30 = sadd.s32 1, %s6370_s30   ;;  %s8774_s12 = sld [smem:[#allocation14_spill]] }
 0x582   : > { %p8623_p12 = scmp.ge.s32.totalorder %s22_s30, 18   ;;  %s8775_s15 = sld [smem:[#allocation16_spill]] }
 0x583   : > { %s8776_s16 = sld [smem:[#allocation17_spill]]  ;;  %s8777_s18 = sld [smem:[#allocation19_spill]] }
 0x584   : > { %s8778_s5 = sld [smem:[#allocation20_spill]]  ;;  %s8779_s23 = sld [smem:[#allocation29_spill]] }
 0x585   : > { %s8780_s24 = sld [smem:[#allocation24_spill]]  ;;  %s8781_s26 = sld [smem:[#allocation25_spill]] }
 0x586   : > { %s8782_s4 = sld [smem:[#allocation26_spill]]  ;;  %s8783_s29 = sld [smem:[#allocation27_spill]] }
 0x587   : > { %s8784_s13 = smov %s6306_s14  ;;  %s8785_s0 = sld [smem:[#allocation28_spill]] }
 0x588   : > { %s8786_s14 = smov %s6622_s11  ;;  %s8788_s17 = smov %s6682_s8 }
 0x589   : > { %s8789_s19 = smov %s6330_s20  ;;  %s8790_s20 = smov %s6541_s2 }
 0x58a   : > { %s8791_s21 = smov %s6338_s22  ;;  %s8792_s22 = smov %s8778_s5 }
 0x58b   : > { %s8793_s25 = smov %s6362_s28  ;;  %21 = sbr.rel (!%p8623_p12) target bundleno = 20 (0x14), region = 105 }
 0x58c   : > { %s8794_s27 = smov %s8782_s4  ;;  %s8795_s28 = smov %s8783_s29 }
 0x58d   : > { %s8796_s29 = smov %s8785_s0 }
 0x592   :  { %4852 = vsyncpa [#allocation3], 1 }
 0x593   :  { %4854 = vsyncpa [#allocation3 + $0x1], 1 }
 0x594   :  { %4855 = vsyncpa [#allocation6], 1 }
 0x595   :  { %4857 = vsyncpa [#allocation6 + $0x1], 1 }
 0x596   :  { %4858 = vsyncpa [#allocation4], 1 }
 0x597   :  { %4860 = vsyncpa [#allocation4 + $0x1], 1 }

</bundles_post_ra>
